<compile_context>
chip_gen: v7x
topology: tpu7x:2x2x1
jax: 0.10.0
libtpu: 0.0.40
codegen_flags: <defaults>
</compile_context>

<pallas_src>
import functools

import jax
import jax.numpy as jnp
from jax import lax
from jax.experimental import pallas as pl
from jax.experimental.pallas import tpu as pltpu


# ----------------------------------------------------------------------------
# helpers (glue)
# ----------------------------------------------------------------------------
def generate_coord_feature(B, H, W):
    # TODO(synk): exact `generate_coord_feature` was not provided with the source
    # module; the (+2)-channel signature implies 2 normalized coordinate maps, so we
    # use x,y in [-1, 1] (channel 0 = x over W, channel 1 = y over H).
    xs = jnp.linspace(-1.0, 1.0, W, dtype=jnp.float32)
    ys = jnp.linspace(-1.0, 1.0, H, dtype=jnp.float32)
    xg = jnp.broadcast_to(xs[None, :], (H, W))
    yg = jnp.broadcast_to(ys[:, None], (H, W))
    coord = jnp.stack([xg, yg], axis=0)                       # (2, H, W)
    return jnp.broadcast_to(coord[None], (B, 2, H, W))


def init_params(key, C, D, hidden):
    """Deterministic synthetic parameters (shapes follow the nn.Module __init__)."""
    Hh = hidden // 2
    Cin = C + 2
    ks = jax.random.split(key, 8)
    return dict(
        conv_w=0.1 * jax.random.normal(ks[0], (3, 3, Cin, hidden), jnp.float32),
        conv_b=0.1 * jax.random.normal(ks[1], (hidden,), jnp.float32),
        gamma=jnp.ones((hidden,), jnp.float32),    # GroupNorm weight default
        beta=jnp.zeros((hidden,), jnp.float32),    # GroupNorm bias default
        wih=0.1 * jax.random.normal(ks[2], (2, 4, D, Hh), jnp.float32),   # [dir, gate(i,f,g,o), D, Hh]
        whh=0.1 * jax.random.normal(ks[3], (2, 4, Hh, Hh), jnp.float32),
        blstm=0.1 * jax.random.normal(ks[4], (2, 4, 1, Hh), jnp.float32),  # b_ih + b_hh combined
        lin_w=0.1 * jax.random.normal(ks[5], (D, C), jnp.float32),
        lin_b=0.1 * jax.random.normal(ks[6], (C,), jnp.float32),
    )


# ----------------------------------------------------------------------------
# Fully fused kernel: whole batch in one invocation.
#   conv3x3 (in-kernel im2col via lane rolls) + GroupNorm(folded affine) + ReLU +
#   L2-normalize -> per-batch HW-sum (algebraic collapse of the bmm+sum)
#   -> batched bidirectional LSTM (fused gates, resident RHS, unrolled L)
#   -> per-batch softmax attention, Linear+sigmoid gate
#   -> single lane-dense (B*C, HW) gated store.
# ----------------------------------------------------------------------------
def _fused_kernel(x_ref, hw_ref, cwt_ref, gn_ref, txt_ref,
                  wf_ref, wb_ref, whh_ref, bl_ref, lin_ref,
                  vis_ref, o_ref, *, groups, w_img):
    f32 = jnp.float32
    Cin, tot = x_ref.shape
    hidden = cwt_ref.shape[1]
    BtC, HW = vis_ref.shape
    Wimg = w_img
    Himg = HW // Wimg
    Bt = tot // HW
    C = BtC // Bt
    BtL, D = txt_ref.shape
    L = BtL // Bt
    Hh = whh_ref.shape[0] // 2
    Cg = hidden // groups

    # ---------------- conv3x3: in-kernel im2col via lane-rolls + masked taps ---------
    x = x_ref[...]                                        # (Cin, Bt*HW)  f32, lane-dense
    hq = hw_ref[0:1, :]                                   # (1, Bt*HW) int32 row index
    wq = hw_ref[1:2, :]                                   # (1, Bt*HW) int32 col index
    acc = jnp.zeros((hidden, tot), f32)
    for k in range(9):
        dy, dx = k // 3, k % 3
        shift = (dy - 1) * Wimg + (dx - 1)                # flat lane offset of this tap
        xs = x if shift == 0 else pltpu.roll(x, (-shift) % tot, 1)
        conds = []
        if dy == 0:
            conds.append(hq >= 1)
        if dy == 2:
            conds.append(hq <= Himg - 2)
        if dx == 0:
            conds.append(wq >= 1)
        if dx == 2:
            conds.append(wq <= Wimg - 2)
        if conds:
            m = conds[0]
            for extra in conds[1:]:
                m = jnp.logical_and(m, extra)
            xs = jnp.where(m, xs, 0.0)                    # zero-padding at image borders
        acc = acc + jnp.dot(cwt_ref[k], xs.astype(jnp.bfloat16),
                            preferred_element_type=f32)
    xc = acc + gn_ref[:, 0:1]                             # + conv bias    (hidden, Bt*HW)

    # ---------------- GroupNorm (folded affine) + ReLU + L2-normalize, per batch -----
    gam = gn_ref[:, 1:2]
    bet = gn_ref[:, 2:3]
    inv_n = 1.0 / float(HW * Cg)
    if Cg > 1:   # dead at tested config (groups == hidden); kept for generality
        gi = lax.broadcasted_iota(jnp.int32, (hidden, hidden), 0) // Cg
        gj = lax.broadcasted_iota(jnp.int32, (hidden, hidden), 1) // Cg
        m_grp = (gi == gj).astype(f32)
    vis_sum = []
    for b in range(Bt):
        xb = xc[:, b * HW:(b + 1) * HW]                   # (hidden, HW) lane-dense
        s1 = jnp.sum(xb, axis=1, keepdims=True)
        s2 = jnp.sum(xb * xb, axis=1, keepdims=True)
        if Cg > 1:
            s1 = jnp.dot(m_grp, s1, preferred_element_type=f32)
            s2 = jnp.dot(m_grp, s2, preferred_element_type=f32)
        mean = s1 * inv_n
        var = s2 * inv_n - mean * mean
        a = gam * lax.rsqrt(var + 1e-5)                   # folded GN scale
        bb = bet - mean * a                               # folded GN shift
        y = jnp.maximum(xb * a + bb, 0.0)                 # GroupNorm + ReLU
        nrm = jnp.sqrt(jnp.sum(y * y, axis=0, keepdims=True))        # per-position L2 norm
        yn = y * pl.reciprocal(jnp.maximum(nrm, 1e-12), approx=True)
        # algebraic collapse:  sum_p (sent @ vis_red^T)[l,p] == sent @ sum_p vis_red[:,p]
        vis_sum.append(jnp.sum(yn, axis=1, keepdims=True))           # (hidden, 1)

    # ---------------- bidirectional LSTM: batched recurrence, fused gates ------------
    txt2 = txt_ref[...]                                   # (Bt*L, D), row = b*L + t
    xpf = jnp.dot(txt2, wf_ref[...], preferred_element_type=f32) + bl_ref[...]
    xpb = jnp.dot(txt2, wb_ref[...], preferred_element_type=f32)
    whh = whh_ref[...]                                    # block-diag RHS, resident across steps
    h = jnp.zeros((Bt, 2 * Hh), f32)                      # [h_fwd | h_bwd]
    c = jnp.zeros((Bt, 2 * Hh), f32)
    hs = []
    for t in range(L):                                    # static unroll (L is small)
        x_in = jnp.concatenate(
            [xpf[b * L + t:b * L + t + 1, :] + xpb[b * L + (L - 1 - t):b * L + (L - t), :]
             for b in range(Bt)], axis=0)                 # (Bt, 8*Hh)
        gates = x_in + jnp.dot(h, whh, preferred_element_type=f32)
        sig = jax.nn.sigmoid(gates[:, :6 * Hh])           # [i_f i_b | f_f f_b | o_f o_b]
        g_g = jnp.tanh(gates[:, 6 * Hh:])                 # [g_f g_b]
        i_g = sig[:, 0:2 * Hh]
        f_g = sig[:, 2 * Hh:4 * Hh]
        o_g = sig[:, 4 * Hh:6 * Hh]
        c = f_g * c + i_g * g_g
        h = o_g * jnp.tanh(c)
        hs.append(h)

    # ---------------- attention + gating (per batch; all tiny) -----------------------
    colh = lax.broadcasted_iota(jnp.int32, (1, 2 * Hh), 1)
    lin_all = lin_ref[...]                                # (D+1, C): [W ; b]
    lw = lin_all[:D, :]
    lb = lin_all[D:D + 1, :]
    eyeC = (lax.broadcasted_iota(jnp.int32, (C, C), 0) ==
            lax.broadcasted_iota(jnp.int32, (C, C), 1))
    scale_cols = []
    for b in range(Bt):
        # sent[t] = [h_fwd(step t) | h_bwd(step L-1-t)] for this batch row
        sent = jnp.concatenate(
            [jnp.where(colh < Hh, hs[t][b:b + 1, :], hs[L - 1 - t][b:b + 1, :])
             for t in range(L)], axis=0)                  # (L, hidden)
        sn = jnp.sqrt(jnp.sum(sent * sent, axis=1, keepdims=True))
        sent_n = sent * pl.reciprocal(jnp.maximum(sn, 1e-12), approx=True)
        s_att = jnp.dot(sent_n, vis_sum[b], preferred_element_type=f32)   # (L, 1)
        e = jnp.exp(s_att - jnp.max(s_att, axis=0, keepdims=True))
        w_att = e * pl.reciprocal(jnp.sum(e, axis=0, keepdims=True), approx=True)
        txt_b = txt2[b * L:(b + 1) * L, :]                # (L, D)
        txt_attn = jnp.sum(w_att * txt_b, axis=0, keepdims=True)          # (1, D)
        gate = jax.nn.sigmoid(
            jnp.dot(txt_attn, lw, preferred_element_type=f32) + lb)       # (1, C)
        # row -> column without a transpose: pick the diagonal of eyeC * gate
        gate_col = jnp.sum(jnp.where(eyeC, gate, 0.0), axis=1, keepdims=True)  # (C, 1)
        scale_cols.append(1.0 + gate_col)
    scale = scale_cols[0] if Bt == 1 else jnp.concatenate(scale_cols, axis=0)  # (Bt*C, 1)

    # single unmasked lane-dense (Bt*C, HW) store:  x + x*gate
    o_ref[...] = vis_ref[...] * scale


# ----------------------------------------------------------------------------
# Wrapper
# ----------------------------------------------------------------------------
def cross_modal_attention_fusion(vis_org, txt, params):
    B, C, H, W = vis_org.shape
    _, L, D = txt.shape
    hidden = params["conv_w"].shape[-1]
    Hh = params["wih"].shape[-1]
    HW = H * W
    Cin = C + 2
    G = 32
    assert 2 * Hh == hidden and hidden % G == 0

    # conv input, channel-major lane-dense: (Cin, B*HW)  (no 9x im2col in HBM)
    coord = generate_coord_feature(B, H, W)
    xcat = jnp.concatenate([vis_org, coord], axis=1)                  # (B, Cin, H, W)
    x_cm = jnp.transpose(xcat, (1, 0, 2, 3)).reshape(Cin, B * HW)

    # per-lane (h, w) indices for the in-kernel 3x3 boundary masks
    hh = jnp.broadcast_to(jnp.arange(H, dtype=jnp.int32)[:, None], (H, W)).reshape(-1)
    ww = jnp.broadcast_to(jnp.arange(W, dtype=jnp.int32)[None, :], (H, W)).reshape(-1)
    hw_idx = jnp.tile(jnp.stack([hh, ww], axis=0), (1, B))            # (2, B*HW) int32

    # conv taps, transposed & bf16: (9, hidden, Cin)
    conv_wt = jnp.transpose(params["conv_w"], (0, 1, 3, 2)).reshape(9, hidden, Cin)
    conv_wt = conv_wt.astype(jnp.bfloat16)

    # GroupNorm / conv-bias columns packed: (hidden, 3) = [conv_b | gamma | beta]
    gn_cols = jnp.stack([params["conv_b"], params["gamma"], params["beta"]], axis=1)

    # packed LSTM weights: gate order (i, f, o, g), direction-interleaved columns
    g_ord = (0, 1, 3, 2)
    wih_r = jnp.stack([params["wih"][:, g] for g in g_ord], axis=1)    # (2, 4, D, Hh)
    whh_r = jnp.stack([params["whh"][:, g] for g in g_ord], axis=1)    # (2, 4, Hh, Hh)
    b_r = jnp.stack([params["blstm"][:, g] for g in g_ord], axis=1)    # (2, 4, 1, Hh)
    wih_g = jnp.transpose(wih_r, (2, 1, 0, 3))                         # (D, gate, dir, Hh)
    dmask = jnp.array([1.0, 0.0], jnp.float32)[None, None, :, None]
    wih_fwd = (wih_g * dmask).reshape(D, 8 * Hh)                       # fwd-direction columns
    wih_bwd = (wih_g * (1.0 - dmask)).reshape(D, 8 * Hh)               # bwd-direction columns
    b_p = jnp.transpose(b_r, (2, 1, 0, 3)).reshape(1, 8 * Hh)
    whh_bd = jnp.zeros((2 * Hh, 8 * Hh), jnp.float32)                  # block-diag recurrence
    for d in range(2):
        for g in range(4):
            whh_bd = whh_bd.at[d * Hh:(d + 1) * Hh,
                               (2 * g + d) * Hh:(2 * g + d + 1) * Hh].set(whh_r[d, g])

    lin_pack = jnp.concatenate([params["lin_w"], params["lin_b"][None, :]], axis=0)  # (D+1, C)
    txt2d = txt.reshape(B * L, D)                                      # rows = b*L + t
    vis2d = vis_org.reshape(B * C, HW)                                 # flattened NCHW

    conv_flops = 2 * 9 * Cin * hidden * B * HW
    lstm_flops = 2 * B * L * (2 * D * 8 * Hh + 2 * Hh * 8 * Hh)
    attn_flops = 2 * B * L * (hidden + D) + 2 * B * D * C
    bytes_accessed = 4 * (x_cm.size + hw_idx.size + gn_cols.size + txt2d.size
                          + wih_fwd.size + wih_bwd.size + whh_bd.size + b_p.size
                          + lin_pack.size + 2 * vis2d.size) + 2 * conv_wt.size
    cost = pl.CostEstimate(flops=conv_flops + lstm_flops + attn_flops,
                           transcendentals=B * (2 * HW + 10 * L * Hh + 2 * L + C),
                           bytes_accessed=bytes_accessed)

    # TODO(synk): on v7x (2 TensorCores) split the batch over a length-2 "parallel"
    # grid; at these sizes a single fused step is fastest on v5e/v6e (single TC).
    out = pl.pallas_call(
        functools.partial(_fused_kernel, groups=G, w_img=W),
        out_shape=jax.ShapeDtypeStruct((B * C, HW), jnp.float32),
        grid=(1,),
        in_specs=[
            pl.BlockSpec((Cin, B * HW), lambda i: (0, 0)),        # conv input (channel-major)
            pl.BlockSpec((2, B * HW), lambda i: (0, 0)),          # (h, w) lane indices
            pl.BlockSpec((9, hidden, Cin), lambda i: (0, 0, 0)),  # conv taps (bf16)
            pl.BlockSpec((hidden, 3), lambda i: (0, 0)),          # conv_b | gamma | beta
            pl.BlockSpec((B * L, D), lambda i: (0, 0)),           # txt (rows = b*L + t)
            pl.BlockSpec((D, 8 * Hh), lambda i: (0, 0)),          # LSTM W_ih (fwd cols)
            pl.BlockSpec((D, 8 * Hh), lambda i: (0, 0)),          # LSTM W_ih (bwd cols)
            pl.BlockSpec((2 * Hh, 8 * Hh), lambda i: (0, 0)),     # LSTM W_hh block-diag
            pl.BlockSpec((1, 8 * Hh), lambda i: (0, 0)),          # LSTM bias
            pl.BlockSpec((D + 1, C), lambda i: (0, 0)),           # Linear [W ; b]
            pl.BlockSpec((B * C, HW), lambda i: (0, 0)),          # vis_org (flattened NCHW)
        ],
        out_specs=pl.BlockSpec((B * C, HW), lambda i: (0, 0)),
        compiler_params=pltpu.CompilerParams(dimension_semantics=("arbitrary",)),
        cost_estimate=cost,
    )(x_cm, hw_idx, conv_wt, gn_cols, txt2d, wih_fwd, wih_bwd, whh_bd, b_p,
      lin_pack, vis2d)

    return out.reshape(B, C, H, W)                                     # already NCHW


# ----------------------------------------------------------------------------
# Pure-JAX reference (for a sanity check)
# ----------------------------------------------------------------------------
def reference_forward(vis_org, txt, p):
    B, C, H, W = vis_org.shape
    _, L, D = txt.shape
    hidden = p["conv_w"].shape[-1]
    coord = generate_coord_feature(B, H, W)
    x = jnp.concatenate([vis_org, coord], axis=1)
    y = lax.conv_general_dilated(x, p["conv_w"], (1, 1), "SAME",
                                 dimension_numbers=("NCHW", "HWIO", "NCHW"))
    y = y + p["conv_b"][None, :, None, None]
    G = 32
    Cg = hidden // G
    yr = y.reshape(B, G, Cg, H, W)
    mean = yr.mean(axis=(2, 3, 4), keepdims=True)
    var = yr.var(axis=(2, 3, 4), keepdims=True)
    yn = ((yr - mean) / jnp.sqrt(var + 1e-5)).reshape(B, hidden, H, W)
    yn = yn * p["gamma"][None, :, None, None] + p["beta"][None, :, None, None]
    yn = jnp.maximum(yn, 0.0)
    nrm = jnp.sqrt(jnp.sum(yn * yn, axis=1, keepdims=True))
    vr = (yn / jnp.maximum(nrm, 1e-12)).reshape(B, hidden, H * W)

    Hh = p["wih"].shape[-1]

    def lstm_dir(xb, d):
        def step(carry, xt):
            h, c = carry
            def gate(g):
                return xt @ p["wih"][d, g] + h @ p["whh"][d, g] + p["blstm"][d, g, 0]
            i = jax.nn.sigmoid(gate(0)); f = jax.nn.sigmoid(gate(1))
            gg = jnp.tanh(gate(2)); o = jax.nn.sigmoid(gate(3))
            c = f * c + i * gg
            h = o * jnp.tanh(c)
            return (h, c), h
        _, hs = lax.scan(step, (jnp.zeros((Hh,)), jnp.zeros((Hh,))), xb)
        return hs

    sents = []
    for b in range(B):
        hf = lstm_dir(txt[b], 0)
        hb = lstm_dir(txt[b][::-1], 1)[::-1]
        sents.append(jnp.concatenate([hf, hb], axis=-1))
    sent = jnp.stack(sents)
    sn = jnp.sqrt(jnp.sum(sent * sent, axis=2, keepdims=True))
    sent = sent / jnp.maximum(sn, 1e-12)
    A = jnp.einsum("blh,bhp->blp", sent, vr)
    w = jax.nn.softmax(A.sum(axis=2), axis=1)[..., None]
    txt_attn = jnp.sum(w * txt, axis=1)
    gate = jax.nn.sigmoid(txt_attn @ p["lin_w"] + p["lin_b"])
    return vis_org + vis_org * gate[:, :, None, None]


# ----------------------------------------------------------------------------
if __name__ == "__main__":
    key = jax.random.PRNGKey(0)
    B, C, H, W = 2, 4, 16, 16         # visual_feature_dim = 4
    L, D, hidden = 8, 32, 32          # sentence_length=8, sentence_feature_dim=32, hidden_dim=32

    k1, k2, k3 = jax.random.split(key, 3)
    visual_feature_org = jax.random.normal(k1, (B, C, H, W), jnp.float32)
    txt_feature = jax.random.normal(k2, (B, L, D), jnp.float32)
    params = init_params(k3, C, D, hidden)

    out = cross_modal_attention_fusion(visual_feature_org, txt_feature, params)
    out = jax.block_until_ready(out)
    assert out.shape == (B, C, H, W)

    ref = jax.block_until_ready(reference_forward(visual_feature_org, txt_feature, params))
    err = float(jnp.max(jnp.abs(out - ref)))
    assert jnp.all(jnp.isfinite(out)) and err < 5e-2, f"max abs err = {err}"

    print("KERNEL_OK")
</pallas_src>

<mosaic_0001>
module attributes {stable_mosaic.version = 11 : i64} {
  func.func @_fused_kernel(%arg0: i32, %arg1: memref<6x512xf32, #tpu.memory_space<vmem>>, %arg2: memref<2x512xi32, #tpu.memory_space<vmem>>, %arg3: memref<9x32x6xbf16, #tpu.memory_space<vmem>>, %arg4: memref<32x3xf32, #tpu.memory_space<vmem>>, %arg5: memref<16x32xf32, #tpu.memory_space<vmem>>, %arg6: memref<32x128xf32, #tpu.memory_space<vmem>>, %arg7: memref<32x128xf32, #tpu.memory_space<vmem>>, %arg8: memref<32x128xf32, #tpu.memory_space<vmem>>, %arg9: memref<1x128xf32, #tpu.memory_space<vmem>>, %arg10: memref<33x4xf32, #tpu.memory_space<vmem>>, %arg11: memref<8x256xf32, #tpu.memory_space<vmem>>, %arg12: memref<8x256xf32, #tpu.memory_space<vmem>>) attributes {dimension_semantics = [#tpu.dimension_semantics<arbitrary>], iteration_bounds = array<i64: 1>, scalar_prefetch = 0 : i64, scratch_operands = 0 : i64, tpu.core_type = #tpu.core_type<tc>, window_params = [{pipeline_mode = #tpu.pipeline_mode<synchronous>, transform_indices = @transform_0, window_bounds = array<i64: 6, 512>}, {pipeline_mode = #tpu.pipeline_mode<synchronous>, transform_indices = @transform_1, window_bounds = array<i64: 2, 512>}, {pipeline_mode = #tpu.pipeline_mode<synchronous>, transform_indices = @transform_2, window_bounds = array<i64: 9, 32, 6>}, {pipeline_mode = #tpu.pipeline_mode<synchronous>, transform_indices = @transform_3, window_bounds = array<i64: 32, 3>}, {pipeline_mode = #tpu.pipeline_mode<synchronous>, transform_indices = @transform_4, window_bounds = array<i64: 16, 32>}, {pipeline_mode = #tpu.pipeline_mode<synchronous>, transform_indices = @transform_5, window_bounds = array<i64: 32, 128>}, {pipeline_mode = #tpu.pipeline_mode<synchronous>, transform_indices = @transform_6, window_bounds = array<i64: 32, 128>}, {pipeline_mode = #tpu.pipeline_mode<synchronous>, transform_indices = @transform_7, window_bounds = array<i64: 32, 128>}, {pipeline_mode = #tpu.pipeline_mode<synchronous>, transform_indices = @transform_8, window_bounds = array<i64: 1, 128>}, {pipeline_mode = #tpu.pipeline_mode<synchronous>, transform_indices = @transform_9, window_bounds = array<i64: 33, 4>}, {pipeline_mode = #tpu.pipeline_mode<synchronous>, transform_indices = @transform_10, window_bounds = array<i64: 8, 256>}, {pipeline_mode = #tpu.pipeline_mode<synchronous>, transform_indices = @transform_11, window_bounds = array<i64: 8, 256>}]} {
    %c0 = arith.constant 0 : index
    %c0_0 = arith.constant 0 : index
    %0 = vector.load %arg1[%c0, %c0_0] : memref<6x512xf32, #tpu.memory_space<vmem>>, vector<6x512xf32>
    %c0_1 = arith.constant 0 : index
    %c0_2 = arith.constant 0 : index
    %1 = vector.load %arg2[%c0_1, %c0_2] : memref<2x512xi32, #tpu.memory_space<vmem>>, vector<1x512xi32>
    %c1 = arith.constant 1 : index
    %c0_3 = arith.constant 0 : index
    %2 = vector.load %arg2[%c1, %c0_3] : memref<2x512xi32, #tpu.memory_space<vmem>>, vector<1x512xi32>
    %cst = arith.constant 0.000000e+00 : f32
    %3 = vector.broadcast %cst : f32 to vector<32x512xf32>
    %c17_i32 = arith.constant 17 : i32
    %4 = tpu.dynamic_rotate %0 by %c17_i32 dim 1 : vector<6x512xf32>, i32 -> vector<6x512xf32>
    %c1_i32 = arith.constant 1 : i32
    %5 = vector.broadcast %c1_i32 : i32 to vector<1x512xi32>
    %6 = arith.cmpi sge, %1, %5 : vector<1x512xi32>
    %c1_i32_4 = arith.constant 1 : i32
    %7 = vector.broadcast %c1_i32_4 : i32 to vector<1x512xi32>
    %8 = arith.cmpi sge, %2, %7 : vector<1x512xi32>
    %9 = arith.andi %6, %8 : vector<1x512xi1>
    %cst_5 = arith.constant 0.000000e+00 : f32
    %10 = vector.shape_cast %9 : vector<1x512xi1> to vector<1x512xi1>
    %11 = vector.broadcast %10 : vector<1x512xi1> to vector<6x512xi1>
    %12 = vector.broadcast %cst_5 : f32 to vector<6x512xf32>
    %13 = arith.select %11, %4, %12 : vector<6x512xi1>, vector<6x512xf32>
    %c0_6 = arith.constant 0 : index
    %c0_7 = arith.constant 0 : index
    %c0_8 = arith.constant 0 : index
    %14 = vector.load %arg3[%c0_6, %c0_7, %c0_8] : memref<9x32x6xbf16, #tpu.memory_space<vmem>>, vector<1x32x6xbf16>
    %15 = vector.shape_cast %14 : vector<1x32x6xbf16> to vector<32x6xbf16>
    %16 = arith.truncf %13 : vector<6x512xf32> to vector<6x512xbf16>
    %cst_9 = arith.constant dense<0.000000e+00> : vector<32x512xf32>
    %17 = tpu.matmul %15, %16, %cst_9 {dimension_numbers = #tpu.dot_dimension_numbers<[1], [0], [0], [1], [0, 0, 1, 1], [], []>} : vector<32x6xbf16>, vector<6x512xbf16>, vector<32x512xf32> -> vector<32x512xf32>
    %18 = arith.addf %3, %17 : vector<32x512xf32>
    %c16_i32 = arith.constant 16 : i32
    %19 = tpu.dynamic_rotate %0 by %c16_i32 dim 1 : vector<6x512xf32>, i32 -> vector<6x512xf32>
    %c1_i32_10 = arith.constant 1 : i32
    %20 = vector.broadcast %c1_i32_10 : i32 to vector<1x512xi32>
    %21 = arith.cmpi sge, %1, %20 : vector<1x512xi32>
    %cst_11 = arith.constant 0.000000e+00 : f32
    %22 = vector.shape_cast %21 : vector<1x512xi1> to vector<1x512xi1>
    %23 = vector.broadcast %22 : vector<1x512xi1> to vector<6x512xi1>
    %24 = vector.broadcast %cst_11 : f32 to vector<6x512xf32>
    %25 = arith.select %23, %19, %24 : vector<6x512xi1>, vector<6x512xf32>
    %c1_12 = arith.constant 1 : index
    %c0_13 = arith.constant 0 : index
    %c0_14 = arith.constant 0 : index
    %26 = vector.load %arg3[%c1_12, %c0_13, %c0_14] : memref<9x32x6xbf16, #tpu.memory_space<vmem>>, vector<1x32x6xbf16>
    %27 = vector.shape_cast %26 : vector<1x32x6xbf16> to vector<32x6xbf16>
    %28 = arith.truncf %25 : vector<6x512xf32> to vector<6x512xbf16>
    %cst_15 = arith.constant dense<0.000000e+00> : vector<32x512xf32>
    %29 = tpu.matmul %27, %28, %cst_15 {dimension_numbers = #tpu.dot_dimension_numbers<[1], [0], [0], [1], [0, 0, 1, 1], [], []>} : vector<32x6xbf16>, vector<6x512xbf16>, vector<32x512xf32> -> vector<32x512xf32>
    %30 = arith.addf %18, %29 : vector<32x512xf32>
    %c15_i32 = arith.constant 15 : i32
    %31 = tpu.dynamic_rotate %0 by %c15_i32 dim 1 : vector<6x512xf32>, i32 -> vector<6x512xf32>
    %c1_i32_16 = arith.constant 1 : i32
    %32 = vector.broadcast %c1_i32_16 : i32 to vector<1x512xi32>
    %33 = arith.cmpi sge, %1, %32 : vector<1x512xi32>
    %c14_i32 = arith.constant 14 : i32
    %34 = vector.broadcast %c14_i32 : i32 to vector<1x512xi32>
    %35 = arith.cmpi sle, %2, %34 : vector<1x512xi32>
    %36 = arith.andi %33, %35 : vector<1x512xi1>
    %cst_17 = arith.constant 0.000000e+00 : f32
    %37 = vector.shape_cast %36 : vector<1x512xi1> to vector<1x512xi1>
    %38 = vector.broadcast %37 : vector<1x512xi1> to vector<6x512xi1>
    %39 = vector.broadcast %cst_17 : f32 to vector<6x512xf32>
    %40 = arith.select %38, %31, %39 : vector<6x512xi1>, vector<6x512xf32>
    %c2 = arith.constant 2 : index
    %c0_18 = arith.constant 0 : index
    %c0_19 = arith.constant 0 : index
    %41 = vector.load %arg3[%c2, %c0_18, %c0_19] : memref<9x32x6xbf16, #tpu.memory_space<vmem>>, vector<1x32x6xbf16>
    %42 = vector.shape_cast %41 : vector<1x32x6xbf16> to vector<32x6xbf16>
    %43 = arith.truncf %40 : vector<6x512xf32> to vector<6x512xbf16>
    %cst_20 = arith.constant dense<0.000000e+00> : vector<32x512xf32>
    %44 = tpu.matmul %42, %43, %cst_20 {dimension_numbers = #tpu.dot_dimension_numbers<[1], [0], [0], [1], [0, 0, 1, 1], [], []>} : vector<32x6xbf16>, vector<6x512xbf16>, vector<32x512xf32> -> vector<32x512xf32>
    %45 = arith.addf %30, %44 : vector<32x512xf32>
    %c1_i32_21 = arith.constant 1 : i32
    %46 = tpu.dynamic_rotate %0 by %c1_i32_21 dim 1 : vector<6x512xf32>, i32 -> vector<6x512xf32>
    %c1_i32_22 = arith.constant 1 : i32
    %47 = vector.broadcast %c1_i32_22 : i32 to vector<1x512xi32>
    %48 = arith.cmpi sge, %2, %47 : vector<1x512xi32>
    %cst_23 = arith.constant 0.000000e+00 : f32
    %49 = vector.shape_cast %48 : vector<1x512xi1> to vector<1x512xi1>
    %50 = vector.broadcast %49 : vector<1x512xi1> to vector<6x512xi1>
    %51 = vector.broadcast %cst_23 : f32 to vector<6x512xf32>
    %52 = arith.select %50, %46, %51 : vector<6x512xi1>, vector<6x512xf32>
    %c3 = arith.constant 3 : index
    %c0_24 = arith.constant 0 : index
    %c0_25 = arith.constant 0 : index
    %53 = vector.load %arg3[%c3, %c0_24, %c0_25] : memref<9x32x6xbf16, #tpu.memory_space<vmem>>, vector<1x32x6xbf16>
    %54 = vector.shape_cast %53 : vector<1x32x6xbf16> to vector<32x6xbf16>
    %55 = arith.truncf %52 : vector<6x512xf32> to vector<6x512xbf16>
    %cst_26 = arith.constant dense<0.000000e+00> : vector<32x512xf32>
    %56 = tpu.matmul %54, %55, %cst_26 {dimension_numbers = #tpu.dot_dimension_numbers<[1], [0], [0], [1], [0, 0, 1, 1], [], []>} : vector<32x6xbf16>, vector<6x512xbf16>, vector<32x512xf32> -> vector<32x512xf32>
    %57 = arith.addf %45, %56 : vector<32x512xf32>
    %c4 = arith.constant 4 : index
    %c0_27 = arith.constant 0 : index
    %c0_28 = arith.constant 0 : index
    %58 = vector.load %arg3[%c4, %c0_27, %c0_28] : memref<9x32x6xbf16, #tpu.memory_space<vmem>>, vector<1x32x6xbf16>
    %59 = vector.shape_cast %58 : vector<1x32x6xbf16> to vector<32x6xbf16>
    %60 = arith.truncf %0 : vector<6x512xf32> to vector<6x512xbf16>
    %cst_29 = arith.constant dense<0.000000e+00> : vector<32x512xf32>
    %61 = tpu.matmul %59, %60, %cst_29 {dimension_numbers = #tpu.dot_dimension_numbers<[1], [0], [0], [1], [0, 0, 1, 1], [], []>} : vector<32x6xbf16>, vector<6x512xbf16>, vector<32x512xf32> -> vector<32x512xf32>
    %62 = arith.addf %57, %61 : vector<32x512xf32>
    %c511_i32 = arith.constant 511 : i32
    %63 = tpu.dynamic_rotate %0 by %c511_i32 dim 1 : vector<6x512xf32>, i32 -> vector<6x512xf32>
    %c14_i32_30 = arith.constant 14 : i32
    %64 = vector.broadcast %c14_i32_30 : i32 to vector<1x512xi32>
    %65 = arith.cmpi sle, %2, %64 : vector<1x512xi32>
    %cst_31 = arith.constant 0.000000e+00 : f32
    %66 = vector.shape_cast %65 : vector<1x512xi1> to vector<1x512xi1>
    %67 = vector.broadcast %66 : vector<1x512xi1> to vector<6x512xi1>
    %68 = vector.broadcast %cst_31 : f32 to vector<6x512xf32>
    %69 = arith.select %67, %63, %68 : vector<6x512xi1>, vector<6x512xf32>
    %c5 = arith.constant 5 : index
    %c0_32 = arith.constant 0 : index
    %c0_33 = arith.constant 0 : index
    %70 = vector.load %arg3[%c5, %c0_32, %c0_33] : memref<9x32x6xbf16, #tpu.memory_space<vmem>>, vector<1x32x6xbf16>
    %71 = vector.shape_cast %70 : vector<1x32x6xbf16> to vector<32x6xbf16>
    %72 = arith.truncf %69 : vector<6x512xf32> to vector<6x512xbf16>
    %cst_34 = arith.constant dense<0.000000e+00> : vector<32x512xf32>
    %73 = tpu.matmul %71, %72, %cst_34 {dimension_numbers = #tpu.dot_dimension_numbers<[1], [0], [0], [1], [0, 0, 1, 1], [], []>} : vector<32x6xbf16>, vector<6x512xbf16>, vector<32x512xf32> -> vector<32x512xf32>
    %74 = arith.addf %62, %73 : vector<32x512xf32>
    %c497_i32 = arith.constant 497 : i32
    %75 = tpu.dynamic_rotate %0 by %c497_i32 dim 1 : vector<6x512xf32>, i32 -> vector<6x512xf32>
    %c14_i32_35 = arith.constant 14 : i32
    %76 = vector.broadcast %c14_i32_35 : i32 to vector<1x512xi32>
    %77 = arith.cmpi sle, %1, %76 : vector<1x512xi32>
    %c1_i32_36 = arith.constant 1 : i32
    %78 = vector.broadcast %c1_i32_36 : i32 to vector<1x512xi32>
    %79 = arith.cmpi sge, %2, %78 : vector<1x512xi32>
    %80 = arith.andi %77, %79 : vector<1x512xi1>
    %cst_37 = arith.constant 0.000000e+00 : f32
    %81 = vector.shape_cast %80 : vector<1x512xi1> to vector<1x512xi1>
    %82 = vector.broadcast %81 : vector<1x512xi1> to vector<6x512xi1>
    %83 = vector.broadcast %cst_37 : f32 to vector<6x512xf32>
    %84 = arith.select %82, %75, %83 : vector<6x512xi1>, vector<6x512xf32>
    %c6 = arith.constant 6 : index
    %c0_38 = arith.constant 0 : index
    %c0_39 = arith.constant 0 : index
    %85 = vector.load %arg3[%c6, %c0_38, %c0_39] : memref<9x32x6xbf16, #tpu.memory_space<vmem>>, vector<1x32x6xbf16>
    %86 = vector.shape_cast %85 : vector<1x32x6xbf16> to vector<32x6xbf16>
    %87 = arith.truncf %84 : vector<6x512xf32> to vector<6x512xbf16>
    %cst_40 = arith.constant dense<0.000000e+00> : vector<32x512xf32>
    %88 = tpu.matmul %86, %87, %cst_40 {dimension_numbers = #tpu.dot_dimension_numbers<[1], [0], [0], [1], [0, 0, 1, 1], [], []>} : vector<32x6xbf16>, vector<6x512xbf16>, vector<32x512xf32> -> vector<32x512xf32>
    %89 = arith.addf %74, %88 : vector<32x512xf32>
    %c496_i32 = arith.constant 496 : i32
    %90 = tpu.dynamic_rotate %0 by %c496_i32 dim 1 : vector<6x512xf32>, i32 -> vector<6x512xf32>
    %c14_i32_41 = arith.constant 14 : i32
    %91 = vector.broadcast %c14_i32_41 : i32 to vector<1x512xi32>
    %92 = arith.cmpi sle, %1, %91 : vector<1x512xi32>
    %cst_42 = arith.constant 0.000000e+00 : f32
    %93 = vector.shape_cast %92 : vector<1x512xi1> to vector<1x512xi1>
    %94 = vector.broadcast %93 : vector<1x512xi1> to vector<6x512xi1>
    %95 = vector.broadcast %cst_42 : f32 to vector<6x512xf32>
    %96 = arith.select %94, %90, %95 : vector<6x512xi1>, vector<6x512xf32>
    %c7 = arith.constant 7 : index
    %c0_43 = arith.constant 0 : index
    %c0_44 = arith.constant 0 : index
    %97 = vector.load %arg3[%c7, %c0_43, %c0_44] : memref<9x32x6xbf16, #tpu.memory_space<vmem>>, vector<1x32x6xbf16>
    %98 = vector.shape_cast %97 : vector<1x32x6xbf16> to vector<32x6xbf16>
    %99 = arith.truncf %96 : vector<6x512xf32> to vector<6x512xbf16>
    %cst_45 = arith.constant dense<0.000000e+00> : vector<32x512xf32>
    %100 = tpu.matmul %98, %99, %cst_45 {dimension_numbers = #tpu.dot_dimension_numbers<[1], [0], [0], [1], [0, 0, 1, 1], [], []>} : vector<32x6xbf16>, vector<6x512xbf16>, vector<32x512xf32> -> vector<32x512xf32>
    %101 = arith.addf %89, %100 : vector<32x512xf32>
    %c495_i32 = arith.constant 495 : i32
    %102 = tpu.dynamic_rotate %0 by %c495_i32 dim 1 : vector<6x512xf32>, i32 -> vector<6x512xf32>
    %c14_i32_46 = arith.constant 14 : i32
    %103 = vector.broadcast %c14_i32_46 : i32 to vector<1x512xi32>
    %104 = arith.cmpi sle, %1, %103 : vector<1x512xi32>
    %c14_i32_47 = arith.constant 14 : i32
    %105 = vector.broadcast %c14_i32_47 : i32 to vector<1x512xi32>
    %106 = arith.cmpi sle, %2, %105 : vector<1x512xi32>
    %107 = arith.andi %104, %106 : vector<1x512xi1>
    %cst_48 = arith.constant 0.000000e+00 : f32
    %108 = vector.shape_cast %107 : vector<1x512xi1> to vector<1x512xi1>
    %109 = vector.broadcast %108 : vector<1x512xi1> to vector<6x512xi1>
    %110 = vector.broadcast %cst_48 : f32 to vector<6x512xf32>
    %111 = arith.select %109, %102, %110 : vector<6x512xi1>, vector<6x512xf32>
    %c8 = arith.constant 8 : index
    %c0_49 = arith.constant 0 : index
    %c0_50 = arith.constant 0 : index
    %112 = vector.load %arg3[%c8, %c0_49, %c0_50] : memref<9x32x6xbf16, #tpu.memory_space<vmem>>, vector<1x32x6xbf16>
    %113 = vector.shape_cast %112 : vector<1x32x6xbf16> to vector<32x6xbf16>
    %114 = arith.truncf %111 : vector<6x512xf32> to vector<6x512xbf16>
    %cst_51 = arith.constant dense<0.000000e+00> : vector<32x512xf32>
    %115 = tpu.matmul %113, %114, %cst_51 {dimension_numbers = #tpu.dot_dimension_numbers<[1], [0], [0], [1], [0, 0, 1, 1], [], []>} : vector<32x6xbf16>, vector<6x512xbf16>, vector<32x512xf32> -> vector<32x512xf32>
    %116 = arith.addf %101, %115 : vector<32x512xf32>
    %c0_52 = arith.constant 0 : index
    %c0_53 = arith.constant 0 : index
    %117 = vector.load %arg4[%c0_52, %c0_53] : memref<32x3xf32, #tpu.memory_space<vmem>>, vector<32x1xf32>
    %118 = vector.broadcast %117 : vector<32x1xf32> to vector<32x512xf32>
    %119 = arith.addf %116, %118 : vector<32x512xf32>
    %c0_54 = arith.constant 0 : index
    %c1_55 = arith.constant 1 : index
    %120 = vector.load %arg4[%c0_54, %c1_55] : memref<32x3xf32, #tpu.memory_space<vmem>>, vector<32x1xf32>
    %c0_56 = arith.constant 0 : index
    %c2_57 = arith.constant 2 : index
    %121 = vector.load %arg4[%c0_56, %c2_57] : memref<32x3xf32, #tpu.memory_space<vmem>>, vector<32x1xf32>
    %122 = vector.extract_strided_slice %119 {offsets = [0, 0], sizes = [32, 256], strides = [1, 1]} : vector<32x512xf32> to vector<32x256xf32>
    %cst_58 = arith.constant dense<0.000000e+00> : vector<32xf32>
    %123 = vector.multi_reduction <add>, %122, %cst_58 [1] : vector<32x256xf32> to vector<32xf32>
    %124 = vector.shape_cast %123 : vector<32xf32> to vector<32x1xf32>
    %125 = arith.mulf %122, %122 : vector<32x256xf32>
    %cst_59 = arith.constant dense<0.000000e+00> : vector<32xf32>
    %126 = vector.multi_reduction <add>, %125, %cst_59 [1] : vector<32x256xf32> to vector<32xf32>
    %127 = vector.shape_cast %126 : vector<32xf32> to vector<32x1xf32>
    %cst_60 = arith.constant 3.906250e-03 : f32
    %128 = vector.broadcast %cst_60 : f32 to vector<32x1xf32>
    %129 = arith.mulf %124, %128 : vector<32x1xf32>
    %cst_61 = arith.constant 3.906250e-03 : f32
    %130 = vector.broadcast %cst_61 : f32 to vector<32x1xf32>
    %131 = arith.mulf %127, %130 : vector<32x1xf32>
    %132 = arith.mulf %129, %129 : vector<32x1xf32>
    %133 = arith.subf %131, %132 : vector<32x1xf32>
    %cst_62 = arith.constant 9.99999974E-6 : f32
    %134 = vector.broadcast %cst_62 : f32 to vector<32x1xf32>
    %135 = arith.addf %133, %134 : vector<32x1xf32>
    %136 = math.rsqrt %135 : vector<32x1xf32>
    %137 = arith.mulf %120, %136 : vector<32x1xf32>
    %138 = arith.mulf %129, %137 : vector<32x1xf32>
    %139 = arith.subf %121, %138 : vector<32x1xf32>
    %140 = vector.broadcast %137 : vector<32x1xf32> to vector<32x256xf32>
    %141 = arith.mulf %122, %140 : vector<32x256xf32>
    %142 = vector.broadcast %139 : vector<32x1xf32> to vector<32x256xf32>
    %143 = arith.addf %141, %142 : vector<32x256xf32>
    %cst_63 = arith.constant 0.000000e+00 : f32
    %144 = vector.broadcast %cst_63 : f32 to vector<32x256xf32>
    %145 = arith.maximumf %143, %144 : vector<32x256xf32>
    %146 = arith.mulf %145, %145 : vector<32x256xf32>
    %cst_64 = arith.constant dense<0.000000e+00> : vector<256xf32>
    %147 = vector.multi_reduction <add>, %146, %cst_64 [0] : vector<32x256xf32> to vector<256xf32>
    %148 = vector.shape_cast %147 : vector<256xf32> to vector<1x256xf32>
    %149 = math.sqrt %148 : vector<1x256xf32>
    %cst_65 = arith.constant 9.99999996E-13 : f32
    %150 = vector.broadcast %cst_65 : f32 to vector<1x256xf32>
    %151 = arith.maximumf %149, %150 : vector<1x256xf32>
    %152 = tpu.reciprocal %151 {approx = true} : vector<1x256xf32> -> vector<1x256xf32>
    %153 = vector.broadcast %152 : vector<1x256xf32> to vector<32x256xf32>
    %154 = arith.mulf %145, %153 : vector<32x256xf32>
    %cst_66 = arith.constant dense<0.000000e+00> : vector<32xf32>
    %155 = vector.multi_reduction <add>, %154, %cst_66 [1] : vector<32x256xf32> to vector<32xf32>
    %156 = vector.shape_cast %155 : vector<32xf32> to vector<32x1xf32>
    %157 = vector.extract_strided_slice %119 {offsets = [0, 256], sizes = [32, 256], strides = [1, 1]} : vector<32x512xf32> to vector<32x256xf32>
    %cst_67 = arith.constant dense<0.000000e+00> : vector<32xf32>
    %158 = vector.multi_reduction <add>, %157, %cst_67 [1] : vector<32x256xf32> to vector<32xf32>
    %159 = vector.shape_cast %158 : vector<32xf32> to vector<32x1xf32>
    %160 = arith.mulf %157, %157 : vector<32x256xf32>
    %cst_68 = arith.constant dense<0.000000e+00> : vector<32xf32>
    %161 = vector.multi_reduction <add>, %160, %cst_68 [1] : vector<32x256xf32> to vector<32xf32>
    %162 = vector.shape_cast %161 : vector<32xf32> to vector<32x1xf32>
    %cst_69 = arith.constant 3.906250e-03 : f32
    %163 = vector.broadcast %cst_69 : f32 to vector<32x1xf32>
    %164 = arith.mulf %159, %163 : vector<32x1xf32>
    %cst_70 = arith.constant 3.906250e-03 : f32
    %165 = vector.broadcast %cst_70 : f32 to vector<32x1xf32>
    %166 = arith.mulf %162, %165 : vector<32x1xf32>
    %167 = arith.mulf %164, %164 : vector<32x1xf32>
    %168 = arith.subf %166, %167 : vector<32x1xf32>
    %cst_71 = arith.constant 9.99999974E-6 : f32
    %169 = vector.broadcast %cst_71 : f32 to vector<32x1xf32>
    %170 = arith.addf %168, %169 : vector<32x1xf32>
    %171 = math.rsqrt %170 : vector<32x1xf32>
    %172 = arith.mulf %120, %171 : vector<32x1xf32>
    %173 = arith.mulf %164, %172 : vector<32x1xf32>
    %174 = arith.subf %121, %173 : vector<32x1xf32>
    %175 = vector.broadcast %172 : vector<32x1xf32> to vector<32x256xf32>
    %176 = arith.mulf %157, %175 : vector<32x256xf32>
    %177 = vector.broadcast %174 : vector<32x1xf32> to vector<32x256xf32>
    %178 = arith.addf %176, %177 : vector<32x256xf32>
    %cst_72 = arith.constant 0.000000e+00 : f32
    %179 = vector.broadcast %cst_72 : f32 to vector<32x256xf32>
    %180 = arith.maximumf %178, %179 : vector<32x256xf32>
    %181 = arith.mulf %180, %180 : vector<32x256xf32>
    %cst_73 = arith.constant dense<0.000000e+00> : vector<256xf32>
    %182 = vector.multi_reduction <add>, %181, %cst_73 [0] : vector<32x256xf32> to vector<256xf32>
    %183 = vector.shape_cast %182 : vector<256xf32> to vector<1x256xf32>
    %184 = math.sqrt %183 : vector<1x256xf32>
    %cst_74 = arith.constant 9.99999996E-13 : f32
    %185 = vector.broadcast %cst_74 : f32 to vector<1x256xf32>
    %186 = arith.maximumf %184, %185 : vector<1x256xf32>
    %187 = tpu.reciprocal %186 {approx = true} : vector<1x256xf32> -> vector<1x256xf32>
    %188 = vector.broadcast %187 : vector<1x256xf32> to vector<32x256xf32>
    %189 = arith.mulf %180, %188 : vector<32x256xf32>
    %cst_75 = arith.constant dense<0.000000e+00> : vector<32xf32>
    %190 = vector.multi_reduction <add>, %189, %cst_75 [1] : vector<32x256xf32> to vector<32xf32>
    %191 = vector.shape_cast %190 : vector<32xf32> to vector<32x1xf32>
    %c0_76 = arith.constant 0 : index
    %c0_77 = arith.constant 0 : index
    %192 = vector.load %arg5[%c0_76, %c0_77] : memref<16x32xf32, #tpu.memory_space<vmem>>, vector<16x32xf32>
    %c0_78 = arith.constant 0 : index
    %c0_79 = arith.constant 0 : index
    %193 = vector.load %arg6[%c0_78, %c0_79] : memref<32x128xf32, #tpu.memory_space<vmem>>, vector<32x128xf32>
    %cst_80 = arith.constant dense<0.000000e+00> : vector<16x128xf32>
    %194 = tpu.matmul %192, %193, %cst_80 {dimension_numbers = #tpu.dot_dimension_numbers<[1], [0], [0], [1], [0, 0, 1, 1], [], []>} : vector<16x32xf32>, vector<32x128xf32>, vector<16x128xf32> -> vector<16x128xf32>
    %c0_81 = arith.constant 0 : index
    %c0_82 = arith.constant 0 : index
    %195 = vector.load %arg9[%c0_81, %c0_82] : memref<1x128xf32, #tpu.memory_space<vmem>>, vector<1x128xf32>
    %196 = vector.broadcast %195 : vector<1x128xf32> to vector<16x128xf32>
    %197 = arith.addf %194, %196 : vector<16x128xf32>
    %c0_83 = arith.constant 0 : index
    %c0_84 = arith.constant 0 : index
    %198 = vector.load %arg7[%c0_83, %c0_84] : memref<32x128xf32, #tpu.memory_space<vmem>>, vector<32x128xf32>
    %cst_85 = arith.constant dense<0.000000e+00> : vector<16x128xf32>
    %199 = tpu.matmul %192, %198, %cst_85 {dimension_numbers = #tpu.dot_dimension_numbers<[1], [0], [0], [1], [0, 0, 1, 1], [], []>} : vector<16x32xf32>, vector<32x128xf32>, vector<16x128xf32> -> vector<16x128xf32>
    %c0_86 = arith.constant 0 : index
    %c0_87 = arith.constant 0 : index
    %200 = vector.load %arg8[%c0_86, %c0_87] : memref<32x128xf32, #tpu.memory_space<vmem>>, vector<32x128xf32>
    %cst_88 = arith.constant 0.000000e+00 : f32
    %201 = vector.broadcast %cst_88 : f32 to vector<2x32xf32>
    %cst_89 = arith.constant 0.000000e+00 : f32
    %202 = vector.broadcast %cst_89 : f32 to vector<2x32xf32>
    %203 = vector.extract_strided_slice %197 {offsets = [0, 0], sizes = [1, 128], strides = [1, 1]} : vector<16x128xf32> to vector<1x128xf32>
    %204 = vector.extract_strided_slice %199 {offsets = [7, 0], sizes = [1, 128], strides = [1, 1]} : vector<16x128xf32> to vector<1x128xf32>
    %205 = arith.addf %203, %204 : vector<1x128xf32>
    %206 = vector.extract_strided_slice %197 {offsets = [8, 0], sizes = [1, 128], strides = [1, 1]} : vector<16x128xf32> to vector<1x128xf32>
    %207 = vector.extract_strided_slice %199 {offsets = [15, 0], sizes = [1, 128], strides = [1, 1]} : vector<16x128xf32> to vector<1x128xf32>
    %208 = arith.addf %206, %207 : vector<1x128xf32>
    %209 = tpu.concatenate %205, %208 in 0 : vector<1x128xf32>, vector<1x128xf32> -> vector<2x128xf32>
    %cst_90 = arith.constant dense<0.000000e+00> : vector<2x128xf32>
    %210 = tpu.matmul %201, %200, %cst_90 {dimension_numbers = #tpu.dot_dimension_numbers<[1], [0], [0], [1], [0, 0, 1, 1], [], []>} : vector<2x32xf32>, vector<32x128xf32>, vector<2x128xf32> -> vector<2x128xf32>
    %211 = arith.addf %209, %210 : vector<2x128xf32>
    %212 = vector.extract_strided_slice %211 {offsets = [0, 0], sizes = [2, 96], strides = [1, 1]} : vector<2x128xf32> to vector<2x96xf32>
    %213 = arith.negf %212 : vector<2x96xf32>
    %214 = math.exp %213 : vector<2x96xf32>
    %cst_91 = arith.constant 1.000000e+00 : f32
    %215 = vector.broadcast %cst_91 : f32 to vector<2x96xf32>
    %216 = arith.addf %215, %214 : vector<2x96xf32>
    %217 = arith.divf %215, %216 : vector<2x96xf32>
    %218 = vector.extract_strided_slice %211 {offsets = [0, 96], sizes = [2, 32], strides = [1, 1]} : vector<2x128xf32> to vector<2x32xf32>
    %219 = math.tanh %218 : vector<2x32xf32>
    %220 = vector.extract_strided_slice %217 {offsets = [0, 0], sizes = [2, 32], strides = [1, 1]} : vector<2x96xf32> to vector<2x32xf32>
    %221 = vector.extract_strided_slice %217 {offsets = [0, 32], sizes = [2, 32], strides = [1, 1]} : vector<2x96xf32> to vector<2x32xf32>
    %222 = vector.extract_strided_slice %217 {offsets = [0, 64], sizes = [2, 32], strides = [1, 1]} : vector<2x96xf32> to vector<2x32xf32>
    %223 = arith.mulf %221, %202 : vector<2x32xf32>
    %224 = arith.mulf %220, %219 : vector<2x32xf32>
    %225 = arith.addf %223, %224 : vector<2x32xf32>
    %226 = math.tanh %225 : vector<2x32xf32>
    %227 = arith.mulf %222, %226 : vector<2x32xf32>
    %228 = vector.extract_strided_slice %197 {offsets = [1, 0], sizes = [1, 128], strides = [1, 1]} : vector<16x128xf32> to vector<1x128xf32>
    %229 = vector.extract_strided_slice %199 {offsets = [6, 0], sizes = [1, 128], strides = [1, 1]} : vector<16x128xf32> to vector<1x128xf32>
    %230 = arith.addf %228, %229 : vector<1x128xf32>
    %231 = vector.extract_strided_slice %197 {offsets = [9, 0], sizes = [1, 128], strides = [1, 1]} : vector<16x128xf32> to vector<1x128xf32>
    %232 = vector.extract_strided_slice %199 {offsets = [14, 0], sizes = [1, 128], strides = [1, 1]} : vector<16x128xf32> to vector<1x128xf32>
    %233 = arith.addf %231, %232 : vector<1x128xf32>
    %234 = tpu.concatenate %230, %233 in 0 : vector<1x128xf32>, vector<1x128xf32> -> vector<2x128xf32>
    %cst_92 = arith.constant dense<0.000000e+00> : vector<2x128xf32>
    %235 = tpu.matmul %227, %200, %cst_92 {dimension_numbers = #tpu.dot_dimension_numbers<[1], [0], [0], [1], [0, 0, 1, 1], [], []>} : vector<2x32xf32>, vector<32x128xf32>, vector<2x128xf32> -> vector<2x128xf32>
    %236 = arith.addf %234, %235 : vector<2x128xf32>
    %237 = vector.extract_strided_slice %236 {offsets = [0, 0], sizes = [2, 96], strides = [1, 1]} : vector<2x128xf32> to vector<2x96xf32>
    %238 = arith.negf %237 : vector<2x96xf32>
    %239 = math.exp %238 : vector<2x96xf32>
    %cst_93 = arith.constant 1.000000e+00 : f32
    %240 = vector.broadcast %cst_93 : f32 to vector<2x96xf32>
    %241 = arith.addf %240, %239 : vector<2x96xf32>
    %242 = arith.divf %240, %241 : vector<2x96xf32>
    %243 = vector.extract_strided_slice %236 {offsets = [0, 96], sizes = [2, 32], strides = [1, 1]} : vector<2x128xf32> to vector<2x32xf32>
    %244 = math.tanh %243 : vector<2x32xf32>
    %245 = vector.extract_strided_slice %242 {offsets = [0, 0], sizes = [2, 32], strides = [1, 1]} : vector<2x96xf32> to vector<2x32xf32>
    %246 = vector.extract_strided_slice %242 {offsets = [0, 32], sizes = [2, 32], strides = [1, 1]} : vector<2x96xf32> to vector<2x32xf32>
    %247 = vector.extract_strided_slice %242 {offsets = [0, 64], sizes = [2, 32], strides = [1, 1]} : vector<2x96xf32> to vector<2x32xf32>
    %248 = arith.mulf %246, %225 : vector<2x32xf32>
    %249 = arith.mulf %245, %244 : vector<2x32xf32>
    %250 = arith.addf %248, %249 : vector<2x32xf32>
    %251 = math.tanh %250 : vector<2x32xf32>
    %252 = arith.mulf %247, %251 : vector<2x32xf32>
    %253 = vector.extract_strided_slice %197 {offsets = [2, 0], sizes = [1, 128], strides = [1, 1]} : vector<16x128xf32> to vector<1x128xf32>
    %254 = vector.extract_strided_slice %199 {offsets = [5, 0], sizes = [1, 128], strides = [1, 1]} : vector<16x128xf32> to vector<1x128xf32>
    %255 = arith.addf %253, %254 : vector<1x128xf32>
    %256 = vector.extract_strided_slice %197 {offsets = [10, 0], sizes = [1, 128], strides = [1, 1]} : vector<16x128xf32> to vector<1x128xf32>
    %257 = vector.extract_strided_slice %199 {offsets = [13, 0], sizes = [1, 128], strides = [1, 1]} : vector<16x128xf32> to vector<1x128xf32>
    %258 = arith.addf %256, %257 : vector<1x128xf32>
    %259 = tpu.concatenate %255, %258 in 0 : vector<1x128xf32>, vector<1x128xf32> -> vector<2x128xf32>
    %cst_94 = arith.constant dense<0.000000e+00> : vector<2x128xf32>
    %260 = tpu.matmul %252, %200, %cst_94 {dimension_numbers = #tpu.dot_dimension_numbers<[1], [0], [0], [1], [0, 0, 1, 1], [], []>} : vector<2x32xf32>, vector<32x128xf32>, vector<2x128xf32> -> vector<2x128xf32>
    %261 = arith.addf %259, %260 : vector<2x128xf32>
    %262 = vector.extract_strided_slice %261 {offsets = [0, 0], sizes = [2, 96], strides = [1, 1]} : vector<2x128xf32> to vector<2x96xf32>
    %263 = arith.negf %262 : vector<2x96xf32>
    %264 = math.exp %263 : vector<2x96xf32>
    %cst_95 = arith.constant 1.000000e+00 : f32
    %265 = vector.broadcast %cst_95 : f32 to vector<2x96xf32>
    %266 = arith.addf %265, %264 : vector<2x96xf32>
    %267 = arith.divf %265, %266 : vector<2x96xf32>
    %268 = vector.extract_strided_slice %261 {offsets = [0, 96], sizes = [2, 32], strides = [1, 1]} : vector<2x128xf32> to vector<2x32xf32>
    %269 = math.tanh %268 : vector<2x32xf32>
    %270 = vector.extract_strided_slice %267 {offsets = [0, 0], sizes = [2, 32], strides = [1, 1]} : vector<2x96xf32> to vector<2x32xf32>
    %271 = vector.extract_strided_slice %267 {offsets = [0, 32], sizes = [2, 32], strides = [1, 1]} : vector<2x96xf32> to vector<2x32xf32>
    %272 = vector.extract_strided_slice %267 {offsets = [0, 64], sizes = [2, 32], strides = [1, 1]} : vector<2x96xf32> to vector<2x32xf32>
    %273 = arith.mulf %271, %250 : vector<2x32xf32>
    %274 = arith.mulf %270, %269 : vector<2x32xf32>
    %275 = arith.addf %273, %274 : vector<2x32xf32>
    %276 = math.tanh %275 : vector<2x32xf32>
    %277 = arith.mulf %272, %276 : vector<2x32xf32>
    %278 = vector.extract_strided_slice %197 {offsets = [3, 0], sizes = [1, 128], strides = [1, 1]} : vector<16x128xf32> to vector<1x128xf32>
    %279 = vector.extract_strided_slice %199 {offsets = [4, 0], sizes = [1, 128], strides = [1, 1]} : vector<16x128xf32> to vector<1x128xf32>
    %280 = arith.addf %278, %279 : vector<1x128xf32>
    %281 = vector.extract_strided_slice %197 {offsets = [11, 0], sizes = [1, 128], strides = [1, 1]} : vector<16x128xf32> to vector<1x128xf32>
    %282 = vector.extract_strided_slice %199 {offsets = [12, 0], sizes = [1, 128], strides = [1, 1]} : vector<16x128xf32> to vector<1x128xf32>
    %283 = arith.addf %281, %282 : vector<1x128xf32>
    %284 = tpu.concatenate %280, %283 in 0 : vector<1x128xf32>, vector<1x128xf32> -> vector<2x128xf32>
    %cst_96 = arith.constant dense<0.000000e+00> : vector<2x128xf32>
    %285 = tpu.matmul %277, %200, %cst_96 {dimension_numbers = #tpu.dot_dimension_numbers<[1], [0], [0], [1], [0, 0, 1, 1], [], []>} : vector<2x32xf32>, vector<32x128xf32>, vector<2x128xf32> -> vector<2x128xf32>
    %286 = arith.addf %284, %285 : vector<2x128xf32>
    %287 = vector.extract_strided_slice %286 {offsets = [0, 0], sizes = [2, 96], strides = [1, 1]} : vector<2x128xf32> to vector<2x96xf32>
    %288 = arith.negf %287 : vector<2x96xf32>
    %289 = math.exp %288 : vector<2x96xf32>
    %cst_97 = arith.constant 1.000000e+00 : f32
    %290 = vector.broadcast %cst_97 : f32 to vector<2x96xf32>
    %291 = arith.addf %290, %289 : vector<2x96xf32>
    %292 = arith.divf %290, %291 : vector<2x96xf32>
    %293 = vector.extract_strided_slice %286 {offsets = [0, 96], sizes = [2, 32], strides = [1, 1]} : vector<2x128xf32> to vector<2x32xf32>
    %294 = math.tanh %293 : vector<2x32xf32>
    %295 = vector.extract_strided_slice %292 {offsets = [0, 0], sizes = [2, 32], strides = [1, 1]} : vector<2x96xf32> to vector<2x32xf32>
    %296 = vector.extract_strided_slice %292 {offsets = [0, 32], sizes = [2, 32], strides = [1, 1]} : vector<2x96xf32> to vector<2x32xf32>
    %297 = vector.extract_strided_slice %292 {offsets = [0, 64], sizes = [2, 32], strides = [1, 1]} : vector<2x96xf32> to vector<2x32xf32>
    %298 = arith.mulf %296, %275 : vector<2x32xf32>
    %299 = arith.mulf %295, %294 : vector<2x32xf32>
    %300 = arith.addf %298, %299 : vector<2x32xf32>
    %301 = math.tanh %300 : vector<2x32xf32>
    %302 = arith.mulf %297, %301 : vector<2x32xf32>
    %303 = vector.extract_strided_slice %197 {offsets = [4, 0], sizes = [1, 128], strides = [1, 1]} : vector<16x128xf32> to vector<1x128xf32>
    %304 = vector.extract_strided_slice %199 {offsets = [3, 0], sizes = [1, 128], strides = [1, 1]} : vector<16x128xf32> to vector<1x128xf32>
    %305 = arith.addf %303, %304 : vector<1x128xf32>
    %306 = vector.extract_strided_slice %197 {offsets = [12, 0], sizes = [1, 128], strides = [1, 1]} : vector<16x128xf32> to vector<1x128xf32>
    %307 = vector.extract_strided_slice %199 {offsets = [11, 0], sizes = [1, 128], strides = [1, 1]} : vector<16x128xf32> to vector<1x128xf32>
    %308 = arith.addf %306, %307 : vector<1x128xf32>
    %309 = tpu.concatenate %305, %308 in 0 : vector<1x128xf32>, vector<1x128xf32> -> vector<2x128xf32>
    %cst_98 = arith.constant dense<0.000000e+00> : vector<2x128xf32>
    %310 = tpu.matmul %302, %200, %cst_98 {dimension_numbers = #tpu.dot_dimension_numbers<[1], [0], [0], [1], [0, 0, 1, 1], [], []>} : vector<2x32xf32>, vector<32x128xf32>, vector<2x128xf32> -> vector<2x128xf32>
    %311 = arith.addf %309, %310 : vector<2x128xf32>
    %312 = vector.extract_strided_slice %311 {offsets = [0, 0], sizes = [2, 96], strides = [1, 1]} : vector<2x128xf32> to vector<2x96xf32>
    %313 = arith.negf %312 : vector<2x96xf32>
    %314 = math.exp %313 : vector<2x96xf32>
    %cst_99 = arith.constant 1.000000e+00 : f32
    %315 = vector.broadcast %cst_99 : f32 to vector<2x96xf32>
    %316 = arith.addf %315, %314 : vector<2x96xf32>
    %317 = arith.divf %315, %316 : vector<2x96xf32>
    %318 = vector.extract_strided_slice %311 {offsets = [0, 96], sizes = [2, 32], strides = [1, 1]} : vector<2x128xf32> to vector<2x32xf32>
    %319 = math.tanh %318 : vector<2x32xf32>
    %320 = vector.extract_strided_slice %317 {offsets = [0, 0], sizes = [2, 32], strides = [1, 1]} : vector<2x96xf32> to vector<2x32xf32>
    %321 = vector.extract_strided_slice %317 {offsets = [0, 32], sizes = [2, 32], strides = [1, 1]} : vector<2x96xf32> to vector<2x32xf32>
    %322 = vector.extract_strided_slice %317 {offsets = [0, 64], sizes = [2, 32], strides = [1, 1]} : vector<2x96xf32> to vector<2x32xf32>
    %323 = arith.mulf %321, %300 : vector<2x32xf32>
    %324 = arith.mulf %320, %319 : vector<2x32xf32>
    %325 = arith.addf %323, %324 : vector<2x32xf32>
    %326 = math.tanh %325 : vector<2x32xf32>
    %327 = arith.mulf %322, %326 : vector<2x32xf32>
    %328 = vector.extract_strided_slice %197 {offsets = [5, 0], sizes = [1, 128], strides = [1, 1]} : vector<16x128xf32> to vector<1x128xf32>
    %329 = vector.extract_strided_slice %199 {offsets = [2, 0], sizes = [1, 128], strides = [1, 1]} : vector<16x128xf32> to vector<1x128xf32>
    %330 = arith.addf %328, %329 : vector<1x128xf32>
    %331 = vector.extract_strided_slice %197 {offsets = [13, 0], sizes = [1, 128], strides = [1, 1]} : vector<16x128xf32> to vector<1x128xf32>
    %332 = vector.extract_strided_slice %199 {offsets = [10, 0], sizes = [1, 128], strides = [1, 1]} : vector<16x128xf32> to vector<1x128xf32>
    %333 = arith.addf %331, %332 : vector<1x128xf32>
    %334 = tpu.concatenate %330, %333 in 0 : vector<1x128xf32>, vector<1x128xf32> -> vector<2x128xf32>
    %cst_100 = arith.constant dense<0.000000e+00> : vector<2x128xf32>
    %335 = tpu.matmul %327, %200, %cst_100 {dimension_numbers = #tpu.dot_dimension_numbers<[1], [0], [0], [1], [0, 0, 1, 1], [], []>} : vector<2x32xf32>, vector<32x128xf32>, vector<2x128xf32> -> vector<2x128xf32>
    %336 = arith.addf %334, %335 : vector<2x128xf32>
    %337 = vector.extract_strided_slice %336 {offsets = [0, 0], sizes = [2, 96], strides = [1, 1]} : vector<2x128xf32> to vector<2x96xf32>
    %338 = arith.negf %337 : vector<2x96xf32>
    %339 = math.exp %338 : vector<2x96xf32>
    %cst_101 = arith.constant 1.000000e+00 : f32
    %340 = vector.broadcast %cst_101 : f32 to vector<2x96xf32>
    %341 = arith.addf %340, %339 : vector<2x96xf32>
    %342 = arith.divf %340, %341 : vector<2x96xf32>
    %343 = vector.extract_strided_slice %336 {offsets = [0, 96], sizes = [2, 32], strides = [1, 1]} : vector<2x128xf32> to vector<2x32xf32>
    %344 = math.tanh %343 : vector<2x32xf32>
    %345 = vector.extract_strided_slice %342 {offsets = [0, 0], sizes = [2, 32], strides = [1, 1]} : vector<2x96xf32> to vector<2x32xf32>
    %346 = vector.extract_strided_slice %342 {offsets = [0, 32], sizes = [2, 32], strides = [1, 1]} : vector<2x96xf32> to vector<2x32xf32>
    %347 = vector.extract_strided_slice %342 {offsets = [0, 64], sizes = [2, 32], strides = [1, 1]} : vector<2x96xf32> to vector<2x32xf32>
    %348 = arith.mulf %346, %325 : vector<2x32xf32>
    %349 = arith.mulf %345, %344 : vector<2x32xf32>
    %350 = arith.addf %348, %349 : vector<2x32xf32>
    %351 = math.tanh %350 : vector<2x32xf32>
    %352 = arith.mulf %347, %351 : vector<2x32xf32>
    %353 = vector.extract_strided_slice %197 {offsets = [6, 0], sizes = [1, 128], strides = [1, 1]} : vector<16x128xf32> to vector<1x128xf32>
    %354 = vector.extract_strided_slice %199 {offsets = [1, 0], sizes = [1, 128], strides = [1, 1]} : vector<16x128xf32> to vector<1x128xf32>
    %355 = arith.addf %353, %354 : vector<1x128xf32>
    %356 = vector.extract_strided_slice %197 {offsets = [14, 0], sizes = [1, 128], strides = [1, 1]} : vector<16x128xf32> to vector<1x128xf32>
    %357 = vector.extract_strided_slice %199 {offsets = [9, 0], sizes = [1, 128], strides = [1, 1]} : vector<16x128xf32> to vector<1x128xf32>
    %358 = arith.addf %356, %357 : vector<1x128xf32>
    %359 = tpu.concatenate %355, %358 in 0 : vector<1x128xf32>, vector<1x128xf32> -> vector<2x128xf32>
    %cst_102 = arith.constant dense<0.000000e+00> : vector<2x128xf32>
    %360 = tpu.matmul %352, %200, %cst_102 {dimension_numbers = #tpu.dot_dimension_numbers<[1], [0], [0], [1], [0, 0, 1, 1], [], []>} : vector<2x32xf32>, vector<32x128xf32>, vector<2x128xf32> -> vector<2x128xf32>
    %361 = arith.addf %359, %360 : vector<2x128xf32>
    %362 = vector.extract_strided_slice %361 {offsets = [0, 0], sizes = [2, 96], strides = [1, 1]} : vector<2x128xf32> to vector<2x96xf32>
    %363 = arith.negf %362 : vector<2x96xf32>
    %364 = math.exp %363 : vector<2x96xf32>
    %cst_103 = arith.constant 1.000000e+00 : f32
    %365 = vector.broadcast %cst_103 : f32 to vector<2x96xf32>
    %366 = arith.addf %365, %364 : vector<2x96xf32>
    %367 = arith.divf %365, %366 : vector<2x96xf32>
    %368 = vector.extract_strided_slice %361 {offsets = [0, 96], sizes = [2, 32], strides = [1, 1]} : vector<2x128xf32> to vector<2x32xf32>
    %369 = math.tanh %368 : vector<2x32xf32>
    %370 = vector.extract_strided_slice %367 {offsets = [0, 0], sizes = [2, 32], strides = [1, 1]} : vector<2x96xf32> to vector<2x32xf32>
    %371 = vector.extract_strided_slice %367 {offsets = [0, 32], sizes = [2, 32], strides = [1, 1]} : vector<2x96xf32> to vector<2x32xf32>
    %372 = vector.extract_strided_slice %367 {offsets = [0, 64], sizes = [2, 32], strides = [1, 1]} : vector<2x96xf32> to vector<2x32xf32>
    %373 = arith.mulf %371, %350 : vector<2x32xf32>
    %374 = arith.mulf %370, %369 : vector<2x32xf32>
    %375 = arith.addf %373, %374 : vector<2x32xf32>
    %376 = math.tanh %375 : vector<2x32xf32>
    %377 = arith.mulf %372, %376 : vector<2x32xf32>
    %378 = vector.extract_strided_slice %197 {offsets = [7, 0], sizes = [1, 128], strides = [1, 1]} : vector<16x128xf32> to vector<1x128xf32>
    %379 = vector.extract_strided_slice %199 {offsets = [0, 0], sizes = [1, 128], strides = [1, 1]} : vector<16x128xf32> to vector<1x128xf32>
    %380 = arith.addf %378, %379 : vector<1x128xf32>
    %381 = vector.extract_strided_slice %197 {offsets = [15, 0], sizes = [1, 128], strides = [1, 1]} : vector<16x128xf32> to vector<1x128xf32>
    %382 = vector.extract_strided_slice %199 {offsets = [8, 0], sizes = [1, 128], strides = [1, 1]} : vector<16x128xf32> to vector<1x128xf32>
    %383 = arith.addf %381, %382 : vector<1x128xf32>
    %384 = tpu.concatenate %380, %383 in 0 : vector<1x128xf32>, vector<1x128xf32> -> vector<2x128xf32>
    %cst_104 = arith.constant dense<0.000000e+00> : vector<2x128xf32>
    %385 = tpu.matmul %377, %200, %cst_104 {dimension_numbers = #tpu.dot_dimension_numbers<[1], [0], [0], [1], [0, 0, 1, 1], [], []>} : vector<2x32xf32>, vector<32x128xf32>, vector<2x128xf32> -> vector<2x128xf32>
    %386 = arith.addf %384, %385 : vector<2x128xf32>
    %387 = vector.extract_strided_slice %386 {offsets = [0, 0], sizes = [2, 96], strides = [1, 1]} : vector<2x128xf32> to vector<2x96xf32>
    %388 = arith.negf %387 : vector<2x96xf32>
    %389 = math.exp %388 : vector<2x96xf32>
    %cst_105 = arith.constant 1.000000e+00 : f32
    %390 = vector.broadcast %cst_105 : f32 to vector<2x96xf32>
    %391 = arith.addf %390, %389 : vector<2x96xf32>
    %392 = arith.divf %390, %391 : vector<2x96xf32>
    %393 = vector.extract_strided_slice %386 {offsets = [0, 96], sizes = [2, 32], strides = [1, 1]} : vector<2x128xf32> to vector<2x32xf32>
    %394 = math.tanh %393 : vector<2x32xf32>
    %395 = vector.extract_strided_slice %392 {offsets = [0, 0], sizes = [2, 32], strides = [1, 1]} : vector<2x96xf32> to vector<2x32xf32>
    %396 = vector.extract_strided_slice %392 {offsets = [0, 32], sizes = [2, 32], strides = [1, 1]} : vector<2x96xf32> to vector<2x32xf32>
    %397 = vector.extract_strided_slice %392 {offsets = [0, 64], sizes = [2, 32], strides = [1, 1]} : vector<2x96xf32> to vector<2x32xf32>
    %398 = arith.mulf %396, %375 : vector<2x32xf32>
    %399 = arith.mulf %395, %394 : vector<2x32xf32>
    %400 = arith.addf %398, %399 : vector<2x32xf32>
    %401 = math.tanh %400 : vector<2x32xf32>
    %402 = arith.mulf %397, %401 : vector<2x32xf32>
    %403 = tpu.iota {dimensions = array<i32: 1>} : vector<1x32xi32>
    %c0_106 = arith.constant 0 : index
    %c0_107 = arith.constant 0 : index
    %404 = vector.load %arg10[%c0_106, %c0_107] : memref<33x4xf32, #tpu.memory_space<vmem>>, vector<33x4xf32>
    %405 = vector.extract_strided_slice %404 {offsets = [0, 0], sizes = [32, 4], strides = [1, 1]} : vector<33x4xf32> to vector<32x4xf32>
    %406 = vector.extract_strided_slice %404 {offsets = [32, 0], sizes = [1, 4], strides = [1, 1]} : vector<33x4xf32> to vector<1x4xf32>
    %407 = tpu.iota {dimensions = array<i32: 0>} : vector<4x4xi32>
    %408 = tpu.iota {dimensions = array<i32: 1>} : vector<4x4xi32>
    %409 = arith.cmpi eq, %407, %408 : vector<4x4xi32>
    %c16_i32_108 = arith.constant 16 : i32
    %410 = vector.broadcast %c16_i32_108 : i32 to vector<1x32xi32>
    %411 = arith.cmpi slt, %403, %410 : vector<1x32xi32>
    %412 = vector.extract_strided_slice %227 {offsets = [0, 0], sizes = [1, 32], strides = [1, 1]} : vector<2x32xf32> to vector<1x32xf32>
    %413 = vector.extract_strided_slice %402 {offsets = [0, 0], sizes = [1, 32], strides = [1, 1]} : vector<2x32xf32> to vector<1x32xf32>
    %414 = arith.select %411, %412, %413 : vector<1x32xi1>, vector<1x32xf32>
    %c16_i32_109 = arith.constant 16 : i32
    %415 = vector.broadcast %c16_i32_109 : i32 to vector<1x32xi32>
    %416 = arith.cmpi slt, %403, %415 : vector<1x32xi32>
    %417 = vector.extract_strided_slice %252 {offsets = [0, 0], sizes = [1, 32], strides = [1, 1]} : vector<2x32xf32> to vector<1x32xf32>
    %418 = vector.extract_strided_slice %377 {offsets = [0, 0], sizes = [1, 32], strides = [1, 1]} : vector<2x32xf32> to vector<1x32xf32>
    %419 = arith.select %416, %417, %418 : vector<1x32xi1>, vector<1x32xf32>
    %c16_i32_110 = arith.constant 16 : i32
    %420 = vector.broadcast %c16_i32_110 : i32 to vector<1x32xi32>
    %421 = arith.cmpi slt, %403, %420 : vector<1x32xi32>
    %422 = vector.extract_strided_slice %277 {offsets = [0, 0], sizes = [1, 32], strides = [1, 1]} : vector<2x32xf32> to vector<1x32xf32>
    %423 = vector.extract_strided_slice %352 {offsets = [0, 0], sizes = [1, 32], strides = [1, 1]} : vector<2x32xf32> to vector<1x32xf32>
    %424 = arith.select %421, %422, %423 : vector<1x32xi1>, vector<1x32xf32>
    %c16_i32_111 = arith.constant 16 : i32
    %425 = vector.broadcast %c16_i32_111 : i32 to vector<1x32xi32>
    %426 = arith.cmpi slt, %403, %425 : vector<1x32xi32>
    %427 = vector.extract_strided_slice %302 {offsets = [0, 0], sizes = [1, 32], strides = [1, 1]} : vector<2x32xf32> to vector<1x32xf32>
    %428 = vector.extract_strided_slice %327 {offsets = [0, 0], sizes = [1, 32], strides = [1, 1]} : vector<2x32xf32> to vector<1x32xf32>
    %429 = arith.select %426, %427, %428 : vector<1x32xi1>, vector<1x32xf32>
    %c16_i32_112 = arith.constant 16 : i32
    %430 = vector.broadcast %c16_i32_112 : i32 to vector<1x32xi32>
    %431 = arith.cmpi slt, %403, %430 : vector<1x32xi32>
    %432 = vector.extract_strided_slice %327 {offsets = [0, 0], sizes = [1, 32], strides = [1, 1]} : vector<2x32xf32> to vector<1x32xf32>
    %433 = vector.extract_strided_slice %302 {offsets = [0, 0], sizes = [1, 32], strides = [1, 1]} : vector<2x32xf32> to vector<1x32xf32>
    %434 = arith.select %431, %432, %433 : vector<1x32xi1>, vector<1x32xf32>
    %c16_i32_113 = arith.constant 16 : i32
    %435 = vector.broadcast %c16_i32_113 : i32 to vector<1x32xi32>
    %436 = arith.cmpi slt, %403, %435 : vector<1x32xi32>
    %437 = vector.extract_strided_slice %352 {offsets = [0, 0], sizes = [1, 32], strides = [1, 1]} : vector<2x32xf32> to vector<1x32xf32>
    %438 = vector.extract_strided_slice %277 {offsets = [0, 0], sizes = [1, 32], strides = [1, 1]} : vector<2x32xf32> to vector<1x32xf32>
    %439 = arith.select %436, %437, %438 : vector<1x32xi1>, vector<1x32xf32>
    %c16_i32_114 = arith.constant 16 : i32
    %440 = vector.broadcast %c16_i32_114 : i32 to vector<1x32xi32>
    %441 = arith.cmpi slt, %403, %440 : vector<1x32xi32>
    %442 = vector.extract_strided_slice %377 {offsets = [0, 0], sizes = [1, 32], strides = [1, 1]} : vector<2x32xf32> to vector<1x32xf32>
    %443 = vector.extract_strided_slice %252 {offsets = [0, 0], sizes = [1, 32], strides = [1, 1]} : vector<2x32xf32> to vector<1x32xf32>
    %444 = arith.select %441, %442, %443 : vector<1x32xi1>, vector<1x32xf32>
    %c16_i32_115 = arith.constant 16 : i32
    %445 = vector.broadcast %c16_i32_115 : i32 to vector<1x32xi32>
    %446 = arith.cmpi slt, %403, %445 : vector<1x32xi32>
    %447 = vector.extract_strided_slice %402 {offsets = [0, 0], sizes = [1, 32], strides = [1, 1]} : vector<2x32xf32> to vector<1x32xf32>
    %448 = vector.extract_strided_slice %227 {offsets = [0, 0], sizes = [1, 32], strides = [1, 1]} : vector<2x32xf32> to vector<1x32xf32>
    %449 = arith.select %446, %447, %448 : vector<1x32xi1>, vector<1x32xf32>
    %450 = tpu.concatenate %414, %419, %424, %429, %434, %439, %444, %449 in 0 : vector<1x32xf32>, vector<1x32xf32>, vector<1x32xf32>, vector<1x32xf32>, vector<1x32xf32>, vector<1x32xf32>, vector<1x32xf32>, vector<1x32xf32> -> vector<8x32xf32>
    %451 = arith.mulf %450, %450 : vector<8x32xf32>
    %cst_116 = arith.constant dense<0.000000e+00> : vector<8xf32>
    %452 = vector.multi_reduction <add>, %451, %cst_116 [1] : vector<8x32xf32> to vector<8xf32>
    %453 = vector.shape_cast %452 : vector<8xf32> to vector<8x1xf32>
    %454 = math.sqrt %453 : vector<8x1xf32>
    %cst_117 = arith.constant 9.99999996E-13 : f32
    %455 = vector.broadcast %cst_117 : f32 to vector<8x1xf32>
    %456 = arith.maximumf %454, %455 : vector<8x1xf32>
    %457 = tpu.reciprocal %456 {approx = true} : vector<8x1xf32> -> vector<8x1xf32>
    %458 = vector.broadcast %457 : vector<8x1xf32> to vector<8x32xf32>
    %459 = arith.mulf %450, %458 : vector<8x32xf32>
    %cst_118 = arith.constant dense<0.000000e+00> : vector<8x1xf32>
    %460 = tpu.matmul %459, %156, %cst_118 {dimension_numbers = #tpu.dot_dimension_numbers<[1], [0], [0], [1], [0, 0, 1, 1], [], []>} : vector<8x32xf32>, vector<32x1xf32>, vector<8x1xf32> -> vector<8x1xf32>
    %cst_119 = arith.constant dense<0xFF800000> : vector<1xf32>
    %461 = vector.multi_reduction <maximumf>, %460, %cst_119 [0] : vector<8x1xf32> to vector<1xf32>
    %462 = vector.shape_cast %461 : vector<1xf32> to vector<1x1xf32>
    %463 = vector.broadcast %462 : vector<1x1xf32> to vector<8x1xf32>
    %464 = arith.subf %460, %463 : vector<8x1xf32>
    %465 = math.exp %464 : vector<8x1xf32>
    %cst_120 = arith.constant dense<0.000000e+00> : vector<1xf32>
    %466 = vector.multi_reduction <add>, %465, %cst_120 [0] : vector<8x1xf32> to vector<1xf32>
    %467 = vector.shape_cast %466 : vector<1xf32> to vector<1x1xf32>
    %468 = tpu.reciprocal %467 {approx = true} : vector<1x1xf32> -> vector<1x1xf32>
    %469 = vector.broadcast %468 : vector<1x1xf32> to vector<8x1xf32>
    %470 = arith.mulf %465, %469 : vector<8x1xf32>
    %471 = vector.extract_strided_slice %192 {offsets = [0, 0], sizes = [8, 32], strides = [1, 1]} : vector<16x32xf32> to vector<8x32xf32>
    %472 = vector.broadcast %470 : vector<8x1xf32> to vector<8x32xf32>
    %473 = arith.mulf %472, %471 : vector<8x32xf32>
    %cst_121 = arith.constant dense<0.000000e+00> : vector<32xf32>
    %474 = vector.multi_reduction <add>, %473, %cst_121 [0] : vector<8x32xf32> to vector<32xf32>
    %475 = vector.shape_cast %474 : vector<32xf32> to vector<1x32xf32>
    %cst_122 = arith.constant dense<0.000000e+00> : vector<1x4xf32>
    %476 = tpu.matmul %475, %405, %cst_122 {dimension_numbers = #tpu.dot_dimension_numbers<[1], [0], [0], [1], [0, 0, 1, 1], [], []>} : vector<1x32xf32>, vector<32x4xf32>, vector<1x4xf32> -> vector<1x4xf32>
    %477 = arith.addf %476, %406 : vector<1x4xf32>
    %478 = arith.negf %477 : vector<1x4xf32>
    %479 = math.exp %478 : vector<1x4xf32>
    %cst_123 = arith.constant 1.000000e+00 : f32
    %480 = vector.broadcast %cst_123 : f32 to vector<1x4xf32>
    %481 = arith.addf %480, %479 : vector<1x4xf32>
    %482 = arith.divf %480, %481 : vector<1x4xf32>
    %cst_124 = arith.constant 0.000000e+00 : f32
    %483 = vector.shape_cast %482 : vector<1x4xf32> to vector<1x4xf32>
    %484 = vector.broadcast %483 : vector<1x4xf32> to vector<4x4xf32>
    %485 = vector.broadcast %cst_124 : f32 to vector<4x4xf32>
    %486 = arith.select %409, %484, %485 : vector<4x4xi1>, vector<4x4xf32>
    %cst_125 = arith.constant dense<0.000000e+00> : vector<4xf32>
    %487 = vector.multi_reduction <add>, %486, %cst_125 [1] : vector<4x4xf32> to vector<4xf32>
    %488 = vector.shape_cast %487 : vector<4xf32> to vector<4x1xf32>
    %cst_126 = arith.constant 1.000000e+00 : f32
    %489 = vector.broadcast %cst_126 : f32 to vector<4x1xf32>
    %490 = arith.addf %489, %488 : vector<4x1xf32>
    %c16_i32_127 = arith.constant 16 : i32
    %491 = vector.broadcast %c16_i32_127 : i32 to vector<1x32xi32>
    %492 = arith.cmpi slt, %403, %491 : vector<1x32xi32>
    %493 = vector.extract_strided_slice %227 {offsets = [1, 0], sizes = [1, 32], strides = [1, 1]} : vector<2x32xf32> to vector<1x32xf32>
    %494 = vector.extract_strided_slice %402 {offsets = [1, 0], sizes = [1, 32], strides = [1, 1]} : vector<2x32xf32> to vector<1x32xf32>
    %495 = arith.select %492, %493, %494 : vector<1x32xi1>, vector<1x32xf32>
    %c16_i32_128 = arith.constant 16 : i32
    %496 = vector.broadcast %c16_i32_128 : i32 to vector<1x32xi32>
    %497 = arith.cmpi slt, %403, %496 : vector<1x32xi32>
    %498 = vector.extract_strided_slice %252 {offsets = [1, 0], sizes = [1, 32], strides = [1, 1]} : vector<2x32xf32> to vector<1x32xf32>
    %499 = vector.extract_strided_slice %377 {offsets = [1, 0], sizes = [1, 32], strides = [1, 1]} : vector<2x32xf32> to vector<1x32xf32>
    %500 = arith.select %497, %498, %499 : vector<1x32xi1>, vector<1x32xf32>
    %c16_i32_129 = arith.constant 16 : i32
    %501 = vector.broadcast %c16_i32_129 : i32 to vector<1x32xi32>
    %502 = arith.cmpi slt, %403, %501 : vector<1x32xi32>
    %503 = vector.extract_strided_slice %277 {offsets = [1, 0], sizes = [1, 32], strides = [1, 1]} : vector<2x32xf32> to vector<1x32xf32>
    %504 = vector.extract_strided_slice %352 {offsets = [1, 0], sizes = [1, 32], strides = [1, 1]} : vector<2x32xf32> to vector<1x32xf32>
    %505 = arith.select %502, %503, %504 : vector<1x32xi1>, vector<1x32xf32>
    %c16_i32_130 = arith.constant 16 : i32
    %506 = vector.broadcast %c16_i32_130 : i32 to vector<1x32xi32>
    %507 = arith.cmpi slt, %403, %506 : vector<1x32xi32>
    %508 = vector.extract_strided_slice %302 {offsets = [1, 0], sizes = [1, 32], strides = [1, 1]} : vector<2x32xf32> to vector<1x32xf32>
    %509 = vector.extract_strided_slice %327 {offsets = [1, 0], sizes = [1, 32], strides = [1, 1]} : vector<2x32xf32> to vector<1x32xf32>
    %510 = arith.select %507, %508, %509 : vector<1x32xi1>, vector<1x32xf32>
    %c16_i32_131 = arith.constant 16 : i32
    %511 = vector.broadcast %c16_i32_131 : i32 to vector<1x32xi32>
    %512 = arith.cmpi slt, %403, %511 : vector<1x32xi32>
    %513 = vector.extract_strided_slice %327 {offsets = [1, 0], sizes = [1, 32], strides = [1, 1]} : vector<2x32xf32> to vector<1x32xf32>
    %514 = vector.extract_strided_slice %302 {offsets = [1, 0], sizes = [1, 32], strides = [1, 1]} : vector<2x32xf32> to vector<1x32xf32>
    %515 = arith.select %512, %513, %514 : vector<1x32xi1>, vector<1x32xf32>
    %c16_i32_132 = arith.constant 16 : i32
    %516 = vector.broadcast %c16_i32_132 : i32 to vector<1x32xi32>
    %517 = arith.cmpi slt, %403, %516 : vector<1x32xi32>
    %518 = vector.extract_strided_slice %352 {offsets = [1, 0], sizes = [1, 32], strides = [1, 1]} : vector<2x32xf32> to vector<1x32xf32>
    %519 = vector.extract_strided_slice %277 {offsets = [1, 0], sizes = [1, 32], strides = [1, 1]} : vector<2x32xf32> to vector<1x32xf32>
    %520 = arith.select %517, %518, %519 : vector<1x32xi1>, vector<1x32xf32>
    %c16_i32_133 = arith.constant 16 : i32
    %521 = vector.broadcast %c16_i32_133 : i32 to vector<1x32xi32>
    %522 = arith.cmpi slt, %403, %521 : vector<1x32xi32>
    %523 = vector.extract_strided_slice %377 {offsets = [1, 0], sizes = [1, 32], strides = [1, 1]} : vector<2x32xf32> to vector<1x32xf32>
    %524 = vector.extract_strided_slice %252 {offsets = [1, 0], sizes = [1, 32], strides = [1, 1]} : vector<2x32xf32> to vector<1x32xf32>
    %525 = arith.select %522, %523, %524 : vector<1x32xi1>, vector<1x32xf32>
    %c16_i32_134 = arith.constant 16 : i32
    %526 = vector.broadcast %c16_i32_134 : i32 to vector<1x32xi32>
    %527 = arith.cmpi slt, %403, %526 : vector<1x32xi32>
    %528 = vector.extract_strided_slice %402 {offsets = [1, 0], sizes = [1, 32], strides = [1, 1]} : vector<2x32xf32> to vector<1x32xf32>
    %529 = vector.extract_strided_slice %227 {offsets = [1, 0], sizes = [1, 32], strides = [1, 1]} : vector<2x32xf32> to vector<1x32xf32>
    %530 = arith.select %527, %528, %529 : vector<1x32xi1>, vector<1x32xf32>
    %531 = tpu.concatenate %495, %500, %505, %510, %515, %520, %525, %530 in 0 : vector<1x32xf32>, vector<1x32xf32>, vector<1x32xf32>, vector<1x32xf32>, vector<1x32xf32>, vector<1x32xf32>, vector<1x32xf32>, vector<1x32xf32> -> vector<8x32xf32>
    %532 = arith.mulf %531, %531 : vector<8x32xf32>
    %cst_135 = arith.constant dense<0.000000e+00> : vector<8xf32>
    %533 = vector.multi_reduction <add>, %532, %cst_135 [1] : vector<8x32xf32> to vector<8xf32>
    %534 = vector.shape_cast %533 : vector<8xf32> to vector<8x1xf32>
    %535 = math.sqrt %534 : vector<8x1xf32>
    %cst_136 = arith.constant 9.99999996E-13 : f32
    %536 = vector.broadcast %cst_136 : f32 to vector<8x1xf32>
    %537 = arith.maximumf %535, %536 : vector<8x1xf32>
    %538 = tpu.reciprocal %537 {approx = true} : vector<8x1xf32> -> vector<8x1xf32>
    %539 = vector.broadcast %538 : vector<8x1xf32> to vector<8x32xf32>
    %540 = arith.mulf %531, %539 : vector<8x32xf32>
    %cst_137 = arith.constant dense<0.000000e+00> : vector<8x1xf32>
    %541 = tpu.matmul %540, %191, %cst_137 {dimension_numbers = #tpu.dot_dimension_numbers<[1], [0], [0], [1], [0, 0, 1, 1], [], []>} : vector<8x32xf32>, vector<32x1xf32>, vector<8x1xf32> -> vector<8x1xf32>
    %cst_138 = arith.constant dense<0xFF800000> : vector<1xf32>
    %542 = vector.multi_reduction <maximumf>, %541, %cst_138 [0] : vector<8x1xf32> to vector<1xf32>
    %543 = vector.shape_cast %542 : vector<1xf32> to vector<1x1xf32>
    %544 = vector.broadcast %543 : vector<1x1xf32> to vector<8x1xf32>
    %545 = arith.subf %541, %544 : vector<8x1xf32>
    %546 = math.exp %545 : vector<8x1xf32>
    %cst_139 = arith.constant dense<0.000000e+00> : vector<1xf32>
    %547 = vector.multi_reduction <add>, %546, %cst_139 [0] : vector<8x1xf32> to vector<1xf32>
    %548 = vector.shape_cast %547 : vector<1xf32> to vector<1x1xf32>
    %549 = tpu.reciprocal %548 {approx = true} : vector<1x1xf32> -> vector<1x1xf32>
    %550 = vector.broadcast %549 : vector<1x1xf32> to vector<8x1xf32>
    %551 = arith.mulf %546, %550 : vector<8x1xf32>
    %552 = vector.extract_strided_slice %192 {offsets = [8, 0], sizes = [8, 32], strides = [1, 1]} : vector<16x32xf32> to vector<8x32xf32>
    %553 = vector.broadcast %551 : vector<8x1xf32> to vector<8x32xf32>
    %554 = arith.mulf %553, %552 : vector<8x32xf32>
    %cst_140 = arith.constant dense<0.000000e+00> : vector<32xf32>
    %555 = vector.multi_reduction <add>, %554, %cst_140 [0] : vector<8x32xf32> to vector<32xf32>
    %556 = vector.shape_cast %555 : vector<32xf32> to vector<1x32xf32>
    %cst_141 = arith.constant dense<0.000000e+00> : vector<1x4xf32>
    %557 = tpu.matmul %556, %405, %cst_141 {dimension_numbers = #tpu.dot_dimension_numbers<[1], [0], [0], [1], [0, 0, 1, 1], [], []>} : vector<1x32xf32>, vector<32x4xf32>, vector<1x4xf32> -> vector<1x4xf32>
    %558 = arith.addf %557, %406 : vector<1x4xf32>
    %559 = arith.negf %558 : vector<1x4xf32>
    %560 = math.exp %559 : vector<1x4xf32>
    %cst_142 = arith.constant 1.000000e+00 : f32
    %561 = vector.broadcast %cst_142 : f32 to vector<1x4xf32>
    %562 = arith.addf %561, %560 : vector<1x4xf32>
    %563 = arith.divf %561, %562 : vector<1x4xf32>
    %cst_143 = arith.constant 0.000000e+00 : f32
    %564 = vector.shape_cast %563 : vector<1x4xf32> to vector<1x4xf32>
    %565 = vector.broadcast %564 : vector<1x4xf32> to vector<4x4xf32>
    %566 = vector.broadcast %cst_143 : f32 to vector<4x4xf32>
    %567 = arith.select %409, %565, %566 : vector<4x4xi1>, vector<4x4xf32>
    %cst_144 = arith.constant dense<0.000000e+00> : vector<4xf32>
    %568 = vector.multi_reduction <add>, %567, %cst_144 [1] : vector<4x4xf32> to vector<4xf32>
    %569 = vector.shape_cast %568 : vector<4xf32> to vector<4x1xf32>
    %cst_145 = arith.constant 1.000000e+00 : f32
    %570 = vector.broadcast %cst_145 : f32 to vector<4x1xf32>
    %571 = arith.addf %570, %569 : vector<4x1xf32>
    %572 = tpu.concatenate %490, %571 in 0 : vector<4x1xf32>, vector<4x1xf32> -> vector<8x1xf32>
    %c0_146 = arith.constant 0 : index
    %c0_147 = arith.constant 0 : index
    %573 = vector.load %arg11[%c0_146, %c0_147] : memref<8x256xf32, #tpu.memory_space<vmem>>, vector<8x256xf32>
    %574 = vector.broadcast %572 : vector<8x1xf32> to vector<8x256xf32>
    %575 = arith.mulf %573, %574 : vector<8x256xf32>
    %c0_148 = arith.constant 0 : index
    %c0_149 = arith.constant 0 : index
    %576 = vector.load %arg12[%c0_148, %c0_149] : memref<8x256xf32, #tpu.memory_space<vmem>>, vector<8x256xf32>
    tpu.vector_store %arg12[%c0_148, %c0_149], %575 {strides = array<i32>} : memref<8x256xf32, #tpu.memory_space<vmem>>, vector<8x256xf32>,
    return
  }
  func.func @transform_0(%arg0: i32) -> (i32, i32) {
    %c0_i32 = arith.constant 0 : i32
    %c0_i32_0 = arith.constant 0 : i32
    %c0_i32_1 = arith.constant 0 : i32
    return %c0_i32, %c0_i32_0 : i32, i32
  }
  func.func @transform_1(%arg0: i32) -> (i32, i32) {
    %c0_i32 = arith.constant 0 : i32
    %c0_i32_0 = arith.constant 0 : i32
    %c0_i32_1 = arith.constant 0 : i32
    return %c0_i32, %c0_i32_0 : i32, i32
  }
  func.func @transform_2(%arg0: i32) -> (i32, i32, i32) {
    %c0_i32 = arith.constant 0 : i32
    %c0_i32_0 = arith.constant 0 : i32
    %c0_i32_1 = arith.constant 0 : i32
    %c0_i32_2 = arith.constant 0 : i32
    return %c0_i32, %c0_i32_0, %c0_i32_1 : i32, i32, i32
  }
  func.func @transform_3(%arg0: i32) -> (i32, i32) {
    %c0_i32 = arith.constant 0 : i32
    %c0_i32_0 = arith.constant 0 : i32
    %c0_i32_1 = arith.constant 0 : i32
    return %c0_i32, %c0_i32_0 : i32, i32
  }
  func.func @transform_4(%arg0: i32) -> (i32, i32) {
    %c0_i32 = arith.constant 0 : i32
    %c0_i32_0 = arith.constant 0 : i32
    %c0_i32_1 = arith.constant 0 : i32
    return %c0_i32, %c0_i32_0 : i32, i32
  }
  func.func @transform_5(%arg0: i32) -> (i32, i32) {
    %c0_i32 = arith.constant 0 : i32
    %c0_i32_0 = arith.constant 0 : i32
    %c0_i32_1 = arith.constant 0 : i32
    return %c0_i32, %c0_i32_0 : i32, i32
  }
  func.func @transform_6(%arg0: i32) -> (i32, i32) {
    %c0_i32 = arith.constant 0 : i32
    %c0_i32_0 = arith.constant 0 : i32
    %c0_i32_1 = arith.constant 0 : i32
    return %c0_i32, %c0_i32_0 : i32, i32
  }
  func.func @transform_7(%arg0: i32) -> (i32, i32) {
    %c0_i32 = arith.constant 0 : i32
    %c0_i32_0 = arith.constant 0 : i32
    %c0_i32_1 = arith.constant 0 : i32
    return %c0_i32, %c0_i32_0 : i32, i32
  }
  func.func @transform_8(%arg0: i32) -> (i32, i32) {
    %c0_i32 = arith.constant 0 : i32
    %c0_i32_0 = arith.constant 0 : i32
    %c0_i32_1 = arith.constant 0 : i32
    return %c0_i32, %c0_i32_0 : i32, i32
  }
  func.func @transform_9(%arg0: i32) -> (i32, i32) {
    %c0_i32 = arith.constant 0 : i32
    %c0_i32_0 = arith.constant 0 : i32
    %c0_i32_1 = arith.constant 0 : i32
    return %c0_i32, %c0_i32_0 : i32, i32
  }
  func.func @transform_10(%arg0: i32) -> (i32, i32) {
    %c0_i32 = arith.constant 0 : i32
    %c0_i32_0 = arith.constant 0 : i32
    %c0_i32_1 = arith.constant 0 : i32
    return %c0_i32, %c0_i32_0 : i32, i32
  }
  func.func @transform_11(%arg0: i32) -> (i32, i32) {
    %c0_i32 = arith.constant 0 : i32
    %c0_i32_0 = arith.constant 0 : i32
    %c0_i32_1 = arith.constant 0 : i32
    return %c0_i32, %c0_i32_0 : i32, i32
  }
}

</mosaic_0001>

<bundles_post_ra>
// kernel: tpu_custom_call.1
= control target key start
LH: loop header
LB: loop body
LE: loop exit
PB: predicated region body
PF: predicated region fallthrough
CT: control target
= control target key end

     0   :  { %s4693_s25 = smov 17   ;;  %s4694_s26 = smov 16   ;;  %v5921_v8 = vmov 0   ;;  %s5904_s0 = inlined_call_operand.vmem [shape: f32[6,512], index: 0, kind: input, shape index: {}]   ;;  %s5905_s1 = inlined_call_operand.vmem [shape: s32[2,512], index: 1, kind: input, shape index: {}]   ;;  %s5906_s2 = inlined_call_operand.vmem [shape: bf16[9,32,6], index: 2, kind: input, shape index: {}]   ;;  %s5907_s3 = inlined_call_operand.vmem [shape: f32[32,3], index: 3, kind: input, shape index: {}]   ;;  %s5908_s4 = inlined_call_operand.vmem [shape: f32[16,32], index: 4, kind: input, shape index: {}]   ;;  %s5909_s5 = inlined_call_operand.vmem [shape: f32[32,128], index: 5, kind: input, shape index: {}]   ;;  %s5910_s6 = inlined_call_operand.vmem [shape: f32[32,128], index: 6, kind: input, shape index: {}]   ;;  %s5911_s7 = inlined_call_operand.vmem [shape: f32[32,128], index: 7, kind: input, shape index: {}]   ;;  %s5912_s8 = inlined_call_operand.vmem [shape: f32[1,128], index: 8, kind: input, shape index: {}]   ;;  %s5913_s9 = inlined_call_operand.vmem [shape: f32[33,4], index: 9, kind: input, shape index: {}]   ;;  %s5914_s10 = inlined_call_operand.vmem [shape: f32[8,256], index: 10, kind: input, shape index: {}]   ;;  %s5915_s11 = inlined_call_operand.hbm [shape: f32[8,256], index: 11, kind: output, shape index: {}]  }
   0x1   :  { %v4773_v0 = vld [vmem:[%s5904_s0] sm:$0x3f]  ;;  %v4778_v1 = vld [vmem:[%s5904_s0 + $0x8] sm:$0x3f]  ;;  %v4785_v3 = vld [vmem:[%s5904_s0 + $0x10] sm:$0x3f]  ;;  %207 = vmatprep.mubr.bf16.mxu0 %v5921_v8  ;;  %260 = vmatprep.mubr.bf16.mxu1 %v5921_v8 }
   0x2   :  { %v4445_v2 = vpack.i.bf16 %v4778_v1, %v4773_v0  ;;  %v4790_v4 = vld [vmem:[%s5904_s0 + $0x18] sm:$0x3f]  ;;  %v4797_v6 = vld [vmem:[%s5905_s1 + $0x1] ss:$2 sm:$0xf]  ;;  %4515 = vset.pattern.permute.xlu0 %v5921_v8  ;;  %4516 = vset.pattern.permute.xlu1 %v5921_v8  ;;  %s4696_s0 = smov 15  }
   0x3   :  { %v4450_v5 = vpack.i.bf16 %v4790_v4, %v4785_v3  ;;  %v4802_v7 = vld [vmem:[%s5905_s1] ss:$2 sm:$0xf]  ;;  %vm63_vm1 = vcmp.ge.s32.totalorder %v4797_v6, 1  ;;  %s4697_s1 = smov 1   ;;  %s4698_s12 = smov 127  }
   0x4   :  { %4446 = vrot.lane.b32.xlu1 %v4445_v2, %s4693_s25  ;;  %4436 = vrot.lane.b32.xlu0 %v4445_v2, %s4694_s26  ;;  %vm5916_vm0 = vcmp.le.s32.totalorder %v4802_v7, 14 }
   0x5   :  { %vm4812_vm2 = vmand %vm5916_vm0, %vm63_vm1 }
   0x8   :  { %4451 = vrot.lane.b32.xlu1 %v4450_v5, %s4693_s25  ;;  %4441 = vrot.lane.b32.xlu0 %v4450_v5, %s4694_s26 }
   0xc   :  { %4461 = vrot.lane.b32.xlu1 %v4450_v5, %s4696_s0  ;;  %4456 = vrot.lane.b32.xlu0 %v4445_v2, %s4696_s0 }
  0x10   :  { %4471 = vrot.lane.b32.xlu1 %v4450_v5, %s4697_s1  ;;  %4466 = vrot.lane.b32.xlu0 %v4445_v2, %s4697_s1 }
  0x14   :  { %4481 = vrot.lane.b32.xlu1 %v4450_v5, %s4698_s12  ;;  %4476 = vrot.lane.b32.xlu0 %v4445_v2, %s4698_s12 }
  0x15   :  { %16 = vsyncpa [#allocation3], 0  ;;  %s4699_s13 = smov 113   ;;  %s4700_s14 = smov 112   ;;  %v55_v10 = vlaneseq  ;;  %vm62_vm3 = vcmp.ge.s32.totalorder %v4802_v7, 1  ;;  %vm428_vm5 = vcmp.le.s32.totalorder %v4797_v6, 14 }
  0x16   :  { %s4701_s15 = smov 111   ;;  %vm64_vm4 = vmand %vm62_vm3, %vm63_vm1  ;;  %v111_v14 = vsel %vm62_vm3, 1, %v5921_v8  ;;  %vm162_vm10 = vcmask 1042432   ;;  %s4706_s18 = smov 64  }
  0x17   :  { %v4820_v11 = vshrl.u32 %v55_v10, 7  ;;  %v65_v13 = vsel %vm64_vm4, 1, %v5921_v8  ;;  %v4840_v18 = vand.u32 127, %v55_v10  ;;  %vm429_vm6 = vmand %vm62_vm3, %vm428_vm5  ;;  %vm155_vm4 = vcmask 48128   ;;  %s4709_s17 = smov [#allocation2]  }
  0x18   :  { %4491 = vrot.lane.b32.xlu1 %v4450_v5, %s4699_s13  ;;  %4486 = vrot.lane.b32.xlu0 %v4445_v2, %s4699_s13  ;;  %v4852_v24 = vsel %vm429_vm6, 1, %v5921_v8 }
  0x19   :  { %5936 = vst [vmem:[#allocation5_spill] sm:$0xff] %v4820_v11  ;;  %v4826_v12 = vsub.s32 1, %v4820_v11  ;;  %v4832_v15 = vsub.s32 3, %v4820_v11  ;;  %v4835_v16 = vsub.s32 0, %v4820_v11  ;;  %v4838_v17 = vsub.s32 2, %v4820_v11 }
  0x1a   :  { %vm57_vm7 = vcmp.lt.s32.totalorder %v4840_v18, 17  ;;  %vm106_vm8 = vcmp.lt.s32.totalorder %v4840_v18, 16  ;;  %vm423_vm0 = vcmp.lt.s32.totalorder %v4840_v18, 15 }
  0x1b   :  { %5937 = vst [vmem:[#allocation6_spill] sm:$0xff] %v4835_v16  ;;  %v119_v19 = vrot.slane %v111_v14, %v4826_v12  ;;  %v73_v20 = vrot.slane %v65_v13, %v4826_v12  ;;  %v127_v21 = vrot.slane %v111_v14, %v4832_v15  ;;  %v115_v22 = vrot.slane %v111_v14, %v4835_v16 }
  0x1c   :  { %4501 = vrot.lane.b32.xlu1 %v4450_v5, %s4700_s14  ;;  %4496 = vrot.lane.b32.xlu0 %v4445_v2, %s4700_s14  ;;  %v123_v23 = vrot.slane %v111_v14, %v4838_v17  ;;  %v81_v25 = vrot.slane %v65_v13, %v4832_v15  ;;  %v69_v26 = vrot.slane %v65_v13, %v4835_v16 }
  0x1d   :  { %vm4856_vm9 = vcmp.eq.s32.totalorder %v119_v19, 1  ;;  %vm4860_vm11 = vcmp.eq.s32.totalorder %v73_v20, 1  ;;  %v77_v31 = vrot.slane %v65_v13, %v4838_v17  ;;  %vm4865_vm12 = vcmp.eq.s32.totalorder %v127_v21, 1 }
  0x1e   :  { %vm4869_vm13 = vcmp.eq.s32.totalorder %v115_v22, 1  ;;  %vm4873_vm14 = vcmp.eq.s32.totalorder %v123_v23, 1  ;;  %v446_v39 = vrot.slane %v4852_v24, %v4832_v15  ;;  %vm4883_vm15 = vcmp.eq.s32.totalorder %v81_v25, 1 }
  0x1f   :  { %vm4887_vm3 = vcmp.eq.s32.totalorder %v69_v26, 1  ;;  %vm4895_vm6 = vcmp.eq.s32.totalorder %v77_v31, 1  ;;  %v438_v55 = vrot.slane %v4852_v24, %v4826_v12  ;;  %v434_v37 = vrot.slane %v4852_v24, %v4835_v16 }
  0x20   :  { %4511 = vrot.lane.b32.xlu1 %v4450_v5, %s4701_s15  ;;  %4506 = vrot.lane.b32.xlu0 %v4445_v2, %s4701_s15 }
  0x76   :  { %v4447_v27 = vpop.permute.xlu1 %4446  ;;  %v4437_v28 = vpop.permute.xlu0 %4436 }
  0x77   :  { %v4449_v32 = vunpack.i.h.bf16 %v4447_v27  ;;  %v4448_v33 = vunpack.i.l.bf16 %v4447_v27  ;;  %v4439_v34 = vunpack.i.h.bf16 %v4437_v28  ;;  %v4438_v35 = vunpack.i.l.bf16 %v4437_v28  ;;  %v4529_v28 = vld [vmem:[%s5906_s2 + $0x10] sm:$0xff]  }
  0x79   :  { %v60_v40 = vsel %vm57_vm7, %v4448_v33, %v4449_v32  ;;  %v109_v41 = vsel %vm106_vm8, %v4438_v35, %v4439_v34 }
  0x7a   :  { %v4452_v44 = vpop.permute.xlu1 %4451  ;;  %v4442_v45 = vpop.permute.xlu0 %4441  ;;  %v133_v46 = vsel %vm4856_vm9, %v109_v41, 0.0  ;;  %v87_v47 = vsel %vm4860_vm11, %v60_v40, 0.0  ;;  %vm4902_vm9 = vcmp.eq.s32.totalorder %v446_v39, 1  ;;  %v442_v41 = vrot.slane %v4852_v24, %v4838_v17 }
  0x7b   :  { %v4454_v49 = vunpack.i.h.bf16 %v4452_v44  ;;  %v4453_v50 = vunpack.i.l.bf16 %v4452_v44  ;;  %v4444_v51 = vunpack.i.h.bf16 %v4442_v45  ;;  %v4443_v52 = vunpack.i.l.bf16 %v4442_v45 }
  0x7c   :  { %v142_v53 = vpack.c.bf16 %v133_v46, %v133_v46  ;;  %v95_v54 = vpack.c.bf16 %v87_v47, %v87_v47  ;;  %v627_v44 = vsel %vm63_vm1, 1, %v5921_v8  ;;  %vm447_vm11 = vcmp.eq.s32.totalorder %v434_v37, 1  ;;  %v4530_v47 = vld [vmem:[%s5906_s2 + $0x18] sm:$0xff]  }
  0x7d   :  { %v58_v57 = vsel %vm57_vm7, %v4453_v50, %v4454_v49  ;;  %v107_v58 = vsel %vm106_vm8, %v4443_v52, %v4444_v51  ;;  %v110_v59 = vsel %vm106_vm8, %v4444_v51, %v4438_v35  ;;  %v108_v60 = vsel %vm106_vm8, %v4439_v34, %v4443_v52 }
  0x7e   :  { %3852 = vmatprep.subr.msk.bf16.mxu0 %vm162_vm10, %v142_v53  ;;  %v135_v61 = vsel %vm4865_vm12, %v107_v58, 0.0  ;;  %v132_v62 = vsel %vm4869_vm13, %v110_v59, 0.0  ;;  %v134_v63 = vsel %vm4873_vm14, %v108_v60, 0.0  ;;  %v89_v2 = vsel %vm4883_vm15, %v58_v57, 0.0  ;;  %v4462_v5 = vpop.permute.xlu1 %4461  ;;  %v4457_v20 = vpop.permute.xlu0 %4456 }
  0x7f   :  { %v144_v10 = vpack.c.bf16 %v135_v61, %v135_v61  ;;  %v141_v13 = vpack.c.bf16 %v132_v62, %v132_v62  ;;  %v143_v14 = vpack.c.bf16 %v134_v63, %v134_v63  ;;  %v97_v19 = vpack.c.bf16 %v89_v2, %v89_v2  ;;  %v4531_v62 = vld [vmem:[%s5906_s2] sm:$0xff]  }
  0x80   :  { %v61_v21 = vsel %vm57_vm7, %v4454_v49, %v4448_v33  ;;  %v59_v22 = vsel %vm57_vm7, %v4449_v32, %v4453_v50  ;;  %v4464_v23 = vunpack.i.h.bf16 %v4462_v5  ;;  %v4463_v25 = vunpack.i.l.bf16 %v4462_v5 }
  0x81   :  { %3855 = vmatprep.subr.msk.bf16.mxu1 %vm162_vm10, %v144_v10  ;;  %v164_v26 = vsel %vm162_vm10, %v141_v13, 0  ;;  %v170_v27 = vsel %vm162_vm10, %v143_v14, 0  ;;  %v86_v29 = vsel %vm4887_vm3, %v61_v21, 0.0  ;;  %v88_v30 = vsel %vm4895_vm6, %v59_v22, 0.0  ;;  %v4532_v21 = vld [vmem:[%s5906_s2 + $0x8] sm:$0xff]  }
  0x82   :  { %176 = vmatpush1.bf16.msra.mxu0 %v164_v26  ;;  %229 = vmatpush1.bf16.msra.mxu1 %v170_v27  ;;  %v94_v31 = vpack.c.bf16 %v86_v29, %v86_v29  ;;  %v96_v32 = vpack.c.bf16 %v88_v30, %v88_v30  ;;  %v424_v33 = vsel %vm423_vm0, %v4463_v25, %v4464_v23  ;;  %v4459_v34 = vunpack.i.h.bf16 %v4457_v20  ;;  %v4472_v24 = vpop.permute.xlu1 %4471  ;;  %v4467_v46 = vpop.permute.xlu0 %4466  ;;  %v4533_v29 = vld [vmem:[%s5906_s2 + $0x20] sm:$0xff]  }
  0x83   :  { %3860 = vmatprep.subr.msk.bf16.mxu0 %vm162_vm10, %v95_v54  ;;  %3863 = vmatprep.subr.msk.bf16.mxu1 %vm162_vm10, %v97_v19  ;;  %v4458_v35 = vunpack.i.l.bf16 %v4457_v20  ;;  %vm448_vm7 = vcmp.eq.s32.totalorder %v438_v55, 1  ;;  %v454_v36 = vsel %vm4902_vm9, %v424_v33, 0.0  ;;  %vm449_vm12 = vcmp.eq.s32.totalorder %v442_v41, 1 }
  0x84   :  { %v298_v38 = vsel %vm162_vm10, %v94_v31, 0  ;;  %v304_v39 = vsel %vm162_vm10, %v96_v32, 0  ;;  %v463_v40 = vpack.c.bf16 %v454_v36, %v454_v36  ;;  %v425_v49 = vsel %vm423_vm0, %v4459_v34, %v4463_v25 }
  0x85   :  { %3853 = vmatmul.mubr.msk.bf16.vlgmr.msra.gmra.mrb[0].mxu0 %vm155_vm4, %v4529_v28  ;;  %3856 = vmatmul.mubr.msk.bf16.vlgmr.msra.gmra.mrb[0].mxu1 %vm155_vm4, %v4529_v28  ;;  %v426_v42 = vsel %vm423_vm0, %v4458_v35, %v4459_v34  ;;  %v427_v48 = vsel %vm423_vm0, %v4464_v23, %v4458_v35  ;;  %v635_v50 = vrot.slane %v627_v44, %v4826_v12  ;;  %v4474_v52 = vunpack.i.h.bf16 %v4472_v24 }
  0x86   :  { %310 = vmatpush1.bf16.msra.mxu0 %v298_v38  ;;  %363 = vmatpush1.bf16.msra.mxu1 %v304_v39  ;;  %v452_v43 = vsel %vm448_vm7, %v426_v42, 0.0  ;;  %v643_v51 = vrot.slane %v627_v44, %v4832_v15  ;;  %v4473_v53 = vunpack.i.l.bf16 %v4472_v24  ;;  %v4469_v54 = vunpack.i.h.bf16 %v4467_v46  ;;  %v4482_v35 = vpop.permute.xlu1 %4481  ;;  %v4477_v36 = vpop.permute.xlu0 %4476  ;;  %v4535_v24 = vld [vmem:[%s5906_s2 + $0x30] sm:$0xff]  }
  0x87   :  { %217 = vmatprep.mubr.bf16.mxu0 %v5921_v8  ;;  %270 = vmatprep.mubr.bf16.mxu1 %v5921_v8  ;;  %v461_v45 = vpack.c.bf16 %v452_v43, %v452_v43  ;;  %v4468_v55 = vunpack.i.l.bf16 %v4467_v46  ;;  %vm622_vm1 = vcmp.lt.s32.totalorder %v4840_v18, 1  ;;  %v451_v56 = vsel %vm447_vm11, %v427_v48, 0.0 }
  0x88   :  { %3875 = vmatprep.subr.msk.bf16.mxu1 %vm162_vm10, %v463_v40  ;;  %v453_v57 = vsel %vm449_vm12, %v425_v49, 0.0  ;;  %v623_v58 = vsel %vm622_vm1, %v4473_v53, %v4474_v52  ;;  %vm645_vm0 = vcmp.eq.s32.totalorder %v635_v50, 1  ;;  %vm647_vm13 = vcmp.eq.s32.totalorder %v643_v51, 1 }
  0x89   :  { %3872 = vmatprep.subr.msk.bf16.mxu0 %vm162_vm10, %v461_v45  ;;  %v625_v59 = vsel %vm622_vm1, %v4468_v55, %v4469_v54  ;;  %v460_v60 = vpack.c.bf16 %v451_v56, %v451_v56  ;;  %v462_v61 = vpack.c.bf16 %v453_v57, %v453_v57  ;;  %v651_v2 = vsel %vm647_vm13, %v623_v58, 0.0 }
  0x8a   :  { %v649_v63 = vsel %vm645_vm0, %v625_v59, 0.0  ;;  %v660_v14 = vpack.c.bf16 %v651_v2, %v651_v2  ;;  %v631_v19 = vrot.slane %v627_v44, %v4835_v16  ;;  %v639_v20 = vrot.slane %v627_v44, %v4838_v17 }
  0x8b   :  { %v481_v5 = vsel %vm162_vm10, %v460_v60, 0  ;;  %v487_v10 = vsel %vm162_vm10, %v462_v61, 0  ;;  %v658_v13 = vpack.c.bf16 %v649_v63, %v649_v63  ;;  %v626_v22 = vsel %vm622_vm1, %v4474_v52, %v4468_v55  ;;  %v4536_v55 = vld [vmem:[%s5906_s2 + $0x38] sm:$0xff]  }
  0x8c   :  { %vm644_vm14 = vcmp.eq.s32.totalorder %v631_v19, 1  ;;  %v624_v23 = vsel %vm622_vm1, %v4469_v54, %v4473_v53  ;;  %vm646_vm15 = vcmp.eq.s32.totalorder %v639_v20, 1  ;;  %v817_v32 = vpack.c.bf16 %v4778_v1, %v4778_v1  ;;  %v4534_v1 = vld [vmem:[%s5906_s2 + $0x28] sm:$0xff]   ;;  %v4487_v54 = vpop.permute.xlu0 %4486  ;;  %v4537_v19 = vld [vmem:[%s5906_s2 + $0x40] sm:$0xff]  }
  0x8d   :  { %3854 = vmatmul.mubr.msk.bf16.gmra.mrb[4].mxu0 %vm155_vm4, %v4530_v47  ;;  %3857 = vmatmul.mubr.msk.bf16.gmra.mrb[4].mxu1 %vm155_vm4, %v4530_v47  ;;  %v648_v25 = vsel %vm644_vm14, %v626_v22, 0.0  ;;  %v650_v26 = vsel %vm646_vm15, %v624_v23, 0.0  ;;  %v819_v33 = vpack.c.bf16 %v4790_v4, %v4790_v4  ;;  %v983_v34 = vsel %vm428_vm5, 1, %v5921_v8 }
  0x8e   :  { %341 = vmatprep.mubr.bf16.mxu0 %v5921_v8  ;;  %394 = vmatprep.mubr.bf16.mxu1 %v5921_v8  ;;  %v657_v27 = vpack.c.bf16 %v648_v25, %v648_v25  ;;  %v659_v28 = vpack.c.bf16 %v650_v26, %v650_v26  ;;  %v991_v4 = vrot.slane %v983_v34, %v4826_v12  ;;  %v4484_v38 = vunpack.i.h.bf16 %v4482_v35 }
  0x8f   :  { %v999_v37 = vrot.slane %v983_v34, %v4832_v15  ;;  %v4483_v39 = vunpack.i.l.bf16 %v4482_v35  ;;  %v4479_v40 = vunpack.i.h.bf16 %v4477_v36  ;;  %v4478_v41 = vunpack.i.l.bf16 %v4477_v36 }
  0x90   :  { %v678_v30 = vsel %vm162_vm10, %v657_v27, 0  ;;  %v684_v31 = vsel %vm162_vm10, %v659_v28, 0  ;;  %vm978_vm3 = vcmp.lt.s32.totalorder %v4840_v18, 127  ;;  %vm1001_vm6 = vcmp.eq.s32.totalorder %v991_v4, 1 }
  0x91   :  { %v980_v42 = vsel %vm978_vm3, %v4479_v40, %v4483_v39  ;;  %v982_v43 = vsel %vm978_vm3, %v4484_v38, %v4478_v41  ;;  %vm1003_vm9 = vcmp.eq.s32.totalorder %v999_v37, 1  ;;  %v816_v44 = vpack.c.bf16 %v4773_v0, %v4773_v0 }
  0x92   :  { %v818_v45 = vpack.c.bf16 %v4785_v3, %v4785_v3  ;;  %v1005_v46 = vsel %vm1001_vm6, %v980_v42, 0.0  ;;  %v1007_v47 = vsel %vm1003_vm9, %v982_v43, 0.0  ;;  %v987_v52 = vrot.slane %v983_v34, %v4835_v16  ;;  %v4492_v3 = vpop.permute.xlu1 %4491 }
  0x93   :  { %v837_v48 = vsel %vm162_vm10, %v816_v44, 0  ;;  %v1014_v50 = vpack.c.bf16 %v1005_v46, %v1005_v46  ;;  %v1016_v51 = vpack.c.bf16 %v1007_v47, %v1007_v47  ;;  %v995_v53 = vrot.slane %v983_v34, %v4838_v17 }
  0x94   :  { %v843_v49 = vsel %vm162_vm10, %v818_v45, 0  ;;  %v1182_v0 = vsel %vm4812_vm2, 1, %v5921_v8  ;;  %vm1000_vm7 = vcmp.eq.s32.totalorder %v987_v52, 1  ;;  %v981_v9 = vsel %vm978_vm3, %v4478_v41, %v4479_v40  ;;  %v4539_v45 = vld [vmem:[%s5906_s2 + $0x50] sm:$0xff]  }
  0x95   :  { %3861 = vmatmul.mubr.msk.bf16.vlgmr.msra.gmra.mrb[0].mxu0 %vm155_vm4, %v4531_v62  ;;  %3864 = vmatmul.mubr.msk.bf16.vlgmr.msra.gmra.mrb[0].mxu1 %vm155_vm4, %v4531_v62  ;;  %vm1002_vm11 = vcmp.eq.s32.totalorder %v995_v53, 1  ;;  %v979_v56 = vsel %vm978_vm3, %v4483_v39, %v4484_v38  ;;  %v1190_v57 = vrot.slane %v1182_v0, %v4826_v12  ;;  %v1198_v58 = vrot.slane %v1182_v0, %v4832_v15 }
  0x96   :  { %493 = vmatpush1.bf16.msra.mxu0 %v481_v5  ;;  %546 = vmatpush1.bf16.msra.mxu1 %v487_v10  ;;  %v4494_v59 = vunpack.i.h.bf16 %v4492_v3  ;;  %v4493_v60 = vunpack.i.l.bf16 %v4492_v3  ;;  %v4489_v61 = vunpack.i.h.bf16 %v4487_v54  ;;  %v4488_v62 = vunpack.i.l.bf16 %v4487_v54 }
  0x97   :  { %351 = vmatprep.mubr.bf16.mxu0 %v5921_v8  ;;  %404 = vmatprep.mubr.bf16.mxu1 %v5921_v8  ;;  %vm1175_vm2 = vcmp.lt.s32.totalorder %v4840_v18, 113  ;;  %v1004_v63 = vsel %vm1000_vm7, %v981_v9, 0.0  ;;  %v1006_v2 = vsel %vm1002_vm11, %v979_v56, 0.0  ;;  %vm1200_vm12 = vcmp.eq.s32.totalorder %v1190_v57, 1 }
  0x98   :  { %3884 = vmatprep.subr.msk.bf16.mxu0 %vm162_vm10, %v658_v13  ;;  %3887 = vmatprep.subr.msk.bf16.mxu1 %vm162_vm10, %v660_v14  ;;  %v1177_v5 = vsel %vm1175_vm2, %v4489_v61, %v4493_v60  ;;  %v1179_v10 = vsel %vm1175_vm2, %v4494_v59, %v4488_v62  ;;  %vm1202_vm1 = vcmp.eq.s32.totalorder %v1198_v58, 1  ;;  %v1013_v13 = vpack.c.bf16 %v1004_v63, %v1004_v63 }
  0x99   :  { %v1015_v14 = vpack.c.bf16 %v1006_v2, %v1006_v2  ;;  %v1204_v20 = vsel %vm1200_vm12, %v1177_v5, 0.0  ;;  %v1186_v27 = vrot.slane %v1182_v0, %v4835_v16  ;;  %v1194_v28 = vrot.slane %v1182_v0, %v4838_v17  ;;  %v4540_v0 = vld [vmem:[%s5906_s2 + $0x58] sm:$0xff]   ;;  %v4541_v2 = vld [vmem:[%s5906_s2 + $0x60] sm:$0xff]  }
  0x9a   :  { %v1034_v22 = vsel %vm162_vm10, %v1013_v13, 0  ;;  %v1213_v25 = vpack.c.bf16 %v1204_v20, %v1204_v20  ;;  %vm5956_vm0 = vcmp.le.s32.totalorder %v4802_v7, 14  ;;  %v1176_v34 = vsel %vm1175_vm2, %v4493_v60, %v4494_v59 }
  0x9b   :  { %v1040_v23 = vsel %vm162_vm10, %v1015_v14, 0  ;;  %vm1199_vm13 = vcmp.eq.s32.totalorder %v1186_v27, 1  ;;  %vm1201_vm14 = vcmp.eq.s32.totalorder %v1194_v28, 1  ;;  %vm1374_vm15 = vcmp.lt.s32.totalorder %v4840_v18, 112  ;;  %vm5957_vm9 = vmmov %vm5956_vm0 }
  0x9c   :  { %v1205_v40 = vsel %vm1201_vm14, %v1176_v34, 0.0  ;;  %vm1576_vm7 = vmand %vm5957_vm9, %vm428_vm5  ;;  %v2321_v34 = vld [vmem:[%s5910_s6 + $0x8] sm:$0xff]  ;;  %vm2238_vm14 = vcmask 261120  }
  0x9d   :  { %3862 = vmatmul.mubr.msk.bf16.gmra.mrb[4].mxu0 %vm155_vm4, %v4532_v21  ;;  %3865 = vmatmul.mubr.msk.bf16.gmra.mrb[4].mxu1 %vm155_vm4, %v4532_v21  ;;  %v1206_v21 = vsel %vm1202_vm1, %v1179_v10, 0.0  ;;  %v1214_v44 = vpack.c.bf16 %v1205_v40, %v1205_v40  ;;  %v1577_v53 = vsel %vm1576_vm7, 1, %v5921_v8  ;;  %v2230_v40 = vld [vmem:[%s5909_s5 + $0x18] sm:$0xff] }
  0x9e   :  { %524 = vmatprep.mubr.bf16.mxu0 %v5921_v8  ;;  %577 = vmatprep.mubr.bf16.mxu1 %v5921_v8  ;;  %v1215_v26 = vpack.c.bf16 %v1206_v21, %v1206_v21  ;;  %v1593_v9 = vrot.slane %v1577_v53, %v4832_v15  ;;  %v1581_v21 = vrot.slane %v1577_v53, %v4835_v16 }
  0xa0   :  { %vm1597_vm1 = vcmp.eq.s32.totalorder %v1593_v9, 1 }
  0xa5   :  { %3873 = vmatmul.mubr.msk.bf16.vlgmr.msra.gmra.mrb[0].mxu0 %vm155_vm4, %v4533_v29  ;;  %3876 = vmatmul.mubr.msk.bf16.vlgmr.msra.gmra.mrb[0].mxu1 %vm155_vm4, %v4533_v29  ;;  %v1379_v29 = vsel %vm5956_vm0, 1, %v5921_v8  ;;  %vm1594_vm0 = vcmp.eq.s32.totalorder %v1581_v21, 1 }
  0xa6   :  { %690 = vmatpush1.bf16.msra.mxu0 %v678_v30  ;;  %743 = vmatpush1.bf16.msra.mxu1 %v684_v31  ;;  %v4502_v30 = vpop.permute.xlu1 %4501  ;;  %v4497_v31 = vpop.permute.xlu0 %4496  ;;  %v1387_v35 = vrot.slane %v1379_v29, %v4826_v12  ;;  %v1395_v36 = vrot.slane %v1379_v29, %v4832_v15  ;;  %v1391_v52 = vrot.slane %v1379_v29, %v4838_v17 }
  0xa7   :  { %534 = vmatprep.mubr.bf16.mxu0 %v5921_v8  ;;  %587 = vmatprep.mubr.bf16.mxu1 %v5921_v8  ;;  %v4503_v4 = vunpack.i.l.bf16 %v4502_v30  ;;  %v4499_v37 = vunpack.i.h.bf16 %v4497_v31  ;;  %v4498_v38 = vunpack.i.l.bf16 %v4497_v31  ;;  %v2227_v31 = vld [vmem:[%s5909_s5] sm:$0xff] }
  0xa8   :  { %3896 = vmatprep.subr.msk.bf16.mxu0 %vm162_vm10, %v817_v32  ;;  %3899 = vmatprep.subr.msk.bf16.mxu1 %vm162_vm10, %v819_v33  ;;  %v4538_v32 = vld [vmem:[%s5906_s2 + $0x48] sm:$0xff]   ;;  %v1178_v33 = vsel %vm1175_vm2, %v4488_v62, %v4489_v61  ;;  %vm1397_vm3 = vcmp.eq.s32.totalorder %v1387_v35, 1  ;;  %vm1399_vm6 = vcmp.eq.s32.totalorder %v1395_v36, 1  ;;  %vm1398_vm11 = vcmp.eq.s32.totalorder %v1391_v52, 1  ;;  %v2402_v52 = vld [vmem:[%s5911_s7 + $0x18] sm:$0xff] }
  0xa9   :  { %v1203_v39 = vsel %vm1199_vm13, %v1178_v33, 0.0  ;;  %v1376_v41 = vsel %vm1374_vm15, %v4499_v37, %v4503_v4  ;;  %v1377_v3 = vsel %vm1374_vm15, %v4498_v38, %v4499_v37  ;;  %vm1571_vm2 = vcmp.lt.s32.totalorder %v4840_v18, 111  ;;  %v2320_v33 = vld [vmem:[%s5910_s6] sm:$0xff]  ;;  %v4544_v37 = vld [vmem:[%s5906_s2 + $0x78] sm:$0xff]  }
  0xaa   :  { %v1212_v43 = vpack.c.bf16 %v1203_v39, %v1203_v39  ;;  %v4512_v6 = vpop.permute.xlu1 %4511  ;;  %v4507_v7 = vpop.permute.xlu0 %4506  ;;  %v2229_v39 = vld [vmem:[%s5909_s5 + $0x10] sm:$0xff] }
  0xab   :  { %v4514_v56 = vunpack.i.h.bf16 %v4512_v6  ;;  %v4513_v57 = vunpack.i.l.bf16 %v4512_v6  ;;  %v4509_v58 = vunpack.i.h.bf16 %v4507_v7  ;;  %v4508_v59 = vunpack.i.l.bf16 %v4507_v7 }
  0xac   :  { %v1233_v47 = vsel %vm162_vm10, %v1212_v43, 0  ;;  %v4206_v43 = vpack.c.bf16 %v2230_v40, %v2229_v39  ;;  %v5917_v6 = vmov 0.0  }
  0xad   :  { %3874 = vmatmul.mubr.msk.bf16.gmra.mrb[4].mxu0 %vm155_vm4, %v4534_v1  ;;  %3877 = vmatmul.mubr.msk.bf16.gmra.mrb[4].mxu1 %vm155_vm4, %v4534_v1  ;;  %v4504_v1 = vunpack.i.h.bf16 %v4502_v30  ;;  %v1575_v15 = vsel %vm1571_vm2, %v4514_v56, %v4508_v59  ;;  %v4543_v30 = vld [vmem:[%s5906_s2 + $0x70] sm:$0xff]  }
  0xae   :  { %721 = vmatprep.mubr.bf16.mxu0 %v5921_v8  ;;  %774 = vmatprep.mubr.bf16.mxu1 %v5921_v8  ;;  %v1601_v10 = vsel %vm1597_vm1, %v1575_v15, 0.0 }
  0xaf   :  { %v1378_v42 = vsel %vm1374_vm15, %v4504_v1, %v4498_v38  ;;  %v1375_v54 = vsel %vm1374_vm15, %v4503_v4, %v4504_v1  ;;  %v1610_v20 = vpack.c.bf16 %v1601_v10, %v1601_v10  ;;  %v4210_v4 = vpack.c.bf16 %v2321_v34, %v2320_v33  ;;  %v4545_v38 = vld [vmem:[%s5906_s2 + $0x80] sm:$0xff]  }
  0xb0   :  { %v1403_v46 = vsel %vm1399_vm6, %v1378_v42, 0.0  ;;  %v1402_v61 = vsel %vm1398_vm11, %v1375_v54, 0.0  ;;  %v2323_v42 = vld [vmem:[%s5910_s6 + $0x18] sm:$0xff]  ;;  %vm2414_vm15 = vcmask 1040384   ;;  %vm3324_vm11 = vcmask 1043456  }
  0xb1   :  { %v1411_v63 = vpack.c.bf16 %v1402_v61, %v1402_v61 }
  0xb3   :  { %v1436_v14 = vsel %vm162_vm10, %v1411_v63, 0 }
  0xb5   :  { %3885 = vmatmul.mubr.msk.bf16.vlgmr.msra.gmra.mrb[0].mxu0 %vm155_vm4, %v4535_v24  ;;  %3888 = vmatmul.mubr.msk.bf16.vlgmr.msra.gmra.mrb[0].mxu1 %vm155_vm4, %v4535_v24  ;;  %v1401_v24 = vsel %vm1397_vm3, %v1376_v41, 0.0  ;;  %v2322_v41 = vld [vmem:[%s5910_s6 + $0x10] sm:$0xff] }
  0xb6   :  { %849 = vmatpush1.bf16.msra.mxu0 %v837_v48  ;;  %902 = vmatpush1.bf16.msra.mxu1 %v843_v49  ;;  %v1239_v48 = vsel %vm162_vm10, %v1214_v44, 0  ;;  %v1410_v49 = vpack.c.bf16 %v1401_v24, %v1401_v24  ;;  %v4214_v44 = vpack.c.bf16 %v2323_v42, %v2322_v41  ;;  %v2225_v24 = vld [vmem:[%s5908_s4] sm:$0xff] }
  0xb7   :  { %731 = vmatprep.mubr.bf16.mxu0 %v5921_v8  ;;  %784 = vmatprep.mubr.bf16.mxu1 %v5921_v8 }
  0xb8   :  { %3908 = vmatprep.subr.msk.bf16.mxu0 %vm162_vm10, %v1014_v50  ;;  %3911 = vmatprep.subr.msk.bf16.mxu1 %vm162_vm10, %v1016_v51  ;;  %v1412_v50 = vpack.c.bf16 %v1403_v46, %v1403_v46  ;;  %v1383_v51 = vrot.slane %v1379_v29, %v4835_v16  ;;  %v5919_v46 = vmov 0.0|0.0  }
  0xba   :  { %vm1396_vm5 = vcmp.eq.s32.totalorder %v1383_v51, 1  ;;  %v2401_v51 = vld [vmem:[%s5911_s7 + $0x10] sm:$0xff] }
  0xbb   :  { %v1400_v60 = vsel %vm1396_vm5, %v1377_v3, 0.0  ;;  %vm3321_vm5 = vcmask 1041408  }
  0xbc   :  { %v1409_v62 = vpack.c.bf16 %v1400_v60, %v1400_v60 }
  0xbd   :  { %3886 = vmatmul.mubr.msk.bf16.gmra.mrb[4].mxu0 %vm155_vm4, %v4536_v55  ;;  %3889 = vmatmul.mubr.msk.bf16.gmra.mrb[4].mxu1 %vm155_vm4, %v4536_v55  ;;  %v1585_v55 = vrot.slane %v1577_v53, %v4826_v12  ;;  %v1573_v12 = vsel %vm1571_vm2, %v4509_v58, %v4513_v57 }
  0xbe   :  { %880 = vmatprep.mubr.bf16.mxu0 %v5921_v8  ;;  %933 = vmatprep.mubr.bf16.mxu1 %v5921_v8  ;;  %v1430_v13 = vsel %vm162_vm10, %v1409_v62, 0 }
  0xbf   :  { %vm1595_vm12 = vcmp.eq.s32.totalorder %v1585_v55, 1 }
  0xc0   :  { %v1599_v5 = vsel %vm1595_vm12, %v1573_v12, 0.0  ;;  %vm3328_vm12 = vcmask 1045504  }
  0xc5   :  { %3897 = vmatmul.mubr.msk.bf16.vlgmr.msra.gmra.mrb[0].mxu0 %vm155_vm4, %v4537_v19  ;;  %3900 = vmatmul.mubr.msk.bf16.vlgmr.msra.gmra.mrb[0].mxu1 %vm155_vm4, %v4537_v19  ;;  %v1608_v19 = vpack.c.bf16 %v1599_v5, %v1599_v5 }
  0xc6   :  { %1046 = vmatpush1.bf16.msra.mxu0 %v1034_v22  ;;  %1099 = vmatpush1.bf16.msra.mxu1 %v1040_v23  ;;  %v1589_v22 = vrot.slane %v1577_v53, %v4838_v17  ;;  %v4542_v23 = vld [vmem:[%s5906_s2 + $0x68] sm:$0xff]   ;;  %v1572_v17 = vsel %vm1571_vm2, %v4513_v57, %v4514_v56  ;;  %v5245_v53 = vpack.c.bf16 %v2402_v52, %v2401_v51 }
  0xc7   :  { %890 = vmatprep.mubr.bf16.mxu0 %v5921_v8  ;;  %943 = vmatprep.mubr.bf16.mxu1 %v5921_v8 }
  0xc8   :  { %3920 = vmatprep.subr.msk.bf16.mxu0 %vm162_vm10, %v1213_v25  ;;  %3923 = vmatprep.subr.msk.bf16.mxu1 %vm162_vm10, %v1215_v26  ;;  %v1574_v25 = vsel %vm1571_vm2, %v4508_v59, %v4509_v58  ;;  %vm1596_vm13 = vcmp.eq.s32.totalorder %v1589_v22, 1  ;;  %vm3326_vm2 = vcmask 1044480  }
  0xc9   :  { %v1598_v26 = vsel %vm1594_vm0, %v1574_v25, 0.0  ;;  %v1600_v27 = vsel %vm1596_vm13, %v1572_v17, 0.0 }
  0xca   :  { %v1607_v28 = vpack.c.bf16 %v1598_v26, %v1598_v26  ;;  %v1609_v29 = vpack.c.bf16 %v1600_v27, %v1600_v27 }
  0xcc   :  { %v1628_v35 = vsel %vm162_vm10, %v1607_v28, 0  ;;  %v1634_v36 = vsel %vm162_vm10, %v1609_v29, 0 }
  0xcd   :  { %3898 = vmatmul.mubr.msk.bf16.gmra.mrb[4].mxu0 %vm155_vm4, %v4538_v32  ;;  %3901 = vmatmul.mubr.msk.bf16.gmra.mrb[4].mxu1 %vm155_vm4, %v4538_v32  ;;  %v2228_v32 = vld [vmem:[%s5909_s5 + $0x8] sm:$0xff] }
  0xce   :  { %1077 = vmatprep.mubr.bf16.mxu0 %v5921_v8  ;;  %1130 = vmatprep.mubr.bf16.mxu1 %v5921_v8  ;;  %v4202_v1 = vpack.c.bf16 %v2228_v32, %v2227_v31 }
  0xd5   :  { %3909 = vmatmul.mubr.msk.bf16.vlgmr.msra.gmra.mrb[0].mxu0 %vm155_vm4, %v4539_v45  ;;  %3912 = vmatmul.mubr.msk.bf16.vlgmr.msra.gmra.mrb[0].mxu1 %vm155_vm4, %v4539_v45  ;;  %v4546_v45 = vld [vmem:[%s5906_s2 + $0x88] sm:$0xff]  }
  0xd6   :  { %1245 = vmatpush1.bf16.msra.mxu0 %v1233_v47  ;;  %1298 = vmatpush1.bf16.msra.mxu1 %v1239_v48  ;;  %v2399_v47 = vld [vmem:[%s5911_s7] sm:$0xff]  ;;  %v2400_v48 = vld [vmem:[%s5911_s7 + $0x8] sm:$0xff] }
  0xd7   :  { %1087 = vmatprep.mubr.bf16.mxu0 %v5921_v8  ;;  %1140 = vmatprep.mubr.bf16.mxu1 %v5921_v8 }
  0xd8   :  { %3932 = vmatprep.subr.msk.bf16.mxu0 %vm162_vm10, %v1410_v49  ;;  %3935 = vmatprep.subr.msk.bf16.mxu1 %vm162_vm10, %v1412_v50  ;;  %v2226_v49 = vld [vmem:[%s5908_s4 + $0x8] sm:$0xff]  ;;  %v5234_v50 = vpack.c.bf16 %v2400_v48, %v2399_v47 }
  0xdd   :  { %3910 = vmatmul.mubr.msk.bf16.gmra.mrb[4].mxu0 %vm155_vm4, %v4540_v0  ;;  %3913 = vmatmul.mubr.msk.bf16.gmra.mrb[4].mxu1 %vm155_vm4, %v4540_v0 }
  0xde   :  { %1276 = vmatprep.mubr.bf16.mxu0 %v5921_v8  ;;  %1329 = vmatprep.mubr.bf16.mxu1 %v5921_v8 }
  0xe5   :  { %3921 = vmatmul.mubr.msk.bf16.vlgmr.msra.gmra.mrb[0].mxu0 %vm155_vm4, %v4541_v2  ;;  %3924 = vmatmul.mubr.msk.bf16.vlgmr.msra.gmra.mrb[0].mxu1 %vm155_vm4, %v4541_v2  ;;  %v3950_v2 = vld [vmem:[%s5912_s8] ss:$0 sm:$0xff]  ;;  %s4705_s8 = smov 32  }
  0xe6   :  { %1442 = vmatpush1.bf16.msra.mxu0 %v1430_v13  ;;  %1495 = vmatpush1.bf16.msra.mxu1 %v1436_v14 }
  0xe7   :  { %1286 = vmatprep.mubr.bf16.mxu0 %v5921_v8  ;;  %1339 = vmatprep.mubr.bf16.mxu1 %v5921_v8 }
  0xe8   :  { %3944 = vmatprep.subr.msk.bf16.mxu0 %vm162_vm10, %v1608_v19  ;;  %3947 = vmatprep.subr.msk.bf16.mxu1 %vm162_vm10, %v1610_v20 }
  0xed   :  { %3922 = vmatmul.mubr.msk.bf16.gmra.mrb[4].mxu0 %vm155_vm4, %v4542_v23  ;;  %3925 = vmatmul.mubr.msk.bf16.gmra.mrb[4].mxu1 %vm155_vm4, %v4542_v23 }
  0xee   :  { %1473 = vmatprep.mubr.bf16.mxu0 %v5921_v8  ;;  %1526 = vmatprep.mubr.bf16.mxu1 %v5921_v8 }
  0xf5   :  { %3933 = vmatmul.mubr.msk.bf16.vlgmr.msra.gmra.mrb[0].mxu0 %vm155_vm4, %v4543_v30  ;;  %3936 = vmatmul.mubr.msk.bf16.vlgmr.msra.gmra.mrb[0].mxu1 %vm155_vm4, %v4543_v30 }
  0xf6   :  { %1640 = vmatpush1.bf16.msra.mxu0 %v1628_v35  ;;  %1693 = vmatpush1.bf16.msra.mxu1 %v1634_v36 }
  0xf7   :  { %1483 = vmatprep.mubr.bf16.mxu0 %v5921_v8  ;;  %1536 = vmatprep.mubr.bf16.mxu1 %v5921_v8 }
  0xf8   :  { %4203 = vmatprep.subr.bf16.mxu0 %v4202_v1  ;;  %4211 = vmatprep.subr.bf16.mxu1 %v4210_v4 }
  0xfd   :  { %3934 = vmatmul.mubr.msk.bf16.gmra.mrb[4].mxu0 %vm155_vm4, %v4544_v37  ;;  %3937 = vmatmul.mubr.msk.bf16.gmra.mrb[4].mxu1 %vm155_vm4, %v4544_v37 }
  0xfe   :  { %1671 = vmatprep.mubr.bf16.mxu0 %v5921_v8  ;;  %1724 = vmatprep.mubr.bf16.mxu1 %v5921_v8 }
 0x105   :  { %3945 = vmatmul.mubr.msk.bf16.vlgmr.msra.gmra.mrb[0].mxu0 %vm155_vm4, %v4545_v38  ;;  %3948 = vmatmul.mubr.msk.bf16.vlgmr.msra.gmra.mrb[0].mxu1 %vm155_vm4, %v4545_v38 }
 0x106   :  { %4205 = vmatpush3.bf16.msra.mxu0 %v4202_v1  ;;  %4213 = vmatpush3.bf16.msra.mxu1 %v4210_v4 }
 0x107   :  { %1681 = vmatprep.mubr.bf16.mxu0 %v5921_v8  ;;  %1734 = vmatprep.mubr.bf16.mxu1 %v5921_v8 }
 0x108   :  { %4207 = vmatprep.subr.bf16.mxu0 %v4206_v43  ;;  %4215 = vmatprep.subr.bf16.mxu1 %v4214_v44 }
 0x10a   :  { %4209 = vmatpush3.bf16.msra.mxu0 %v4206_v43  ;;  %4217 = vmatpush3.bf16.msra.mxu1 %v4214_v44 }
 0x10b   :  { %4218 = vmatprep.subr.bf16.mxu0 %v5919_v46  ;;  %4224 = vmatprep.subr.bf16.mxu1 %v5919_v46 }
 0x10d   :  { %3946 = vmatmul.mubr.msk.bf16.gmra.mrb[4].mxu0 %vm155_vm4, %v4546_v45  ;;  %3949 = vmatmul.mubr.msk.bf16.gmra.mrb[4].mxu1 %vm155_vm4, %v4546_v45  ;;  %vm4703_vm4 = vmmov 0  }
 0x10e   :  { %4056 = vmatprep.mubr.msk.f32.mxu0 %vm2238_vm14, %v2225_v24  ;;  %4067 = vmatprep.mubr.msk.f32.mxu1 %vm2238_vm14, %v2225_v24 }
 0x115   :  { %4057 = vmatmul.mubr.msk.f32.vlgmr.msra.gmra.mrb[8].mxu0 %vm2238_vm14, %v2226_v49  ;;  %4068 = vmatmul.mubr.msk.f32.vlgmr.msra.gmra.mrb[8].mxu1 %vm2238_vm14, %v2226_v49 }
 0x116   :  { %4220 = vmatpush3.bf16.msra.mxu0 %v5234_v50  ;;  %4078 = vmatprep.mubr.msk.f32.mxu0 %vm4703_vm4, %v5917_v6 }
 0x117   :  { %4221 = vmatprep.subr.bf16.mxu0 %v5919_v46  ;;  %4226 = vmatpush3.bf16.msra.mxu1 %v5234_v50 }
 0x118   :  { %4227 = vmatprep.subr.bf16.mxu1 %v5919_v46  ;;  %4089 = vmatprep.mubr.msk.f32.mxu1 %vm4703_vm4, %v5917_v6 }
 0x11a   :  { %4223 = vmatpush3.bf16.msra.mxu0 %v5245_v53 }
 0x11b   :  { %4229 = vmatpush3.bf16.msra.mxu1 %v5245_v53  ;;  %4230 = vmatprep.subr.bf16.mxu0 %v5919_v46 }
 0x11c   :  { %4236 = vmatprep.subr.bf16.mxu1 %v5919_v46 }
 0x11d   :  { %4079 = vmatmul.mubr.f32.vlgmr.msra.gmra.mrb[10].mxu0 %v5917_v6 }
 0x11e   :  { %4232 = vmatpush3.bf16.msra.mxu0 %v5234_v50  ;;  %4100 = vmatprep.mubr.msk.f32.mxu0 %vm4703_vm4, %v5917_v6 }
 0x11f   :  { %4233 = vmatprep.subr.bf16.mxu0 %v5919_v46 }
 0x122   :  { %4235 = vmatpush3.bf16.msra.mxu0 %v5245_v53 }
 0x123   :  { %4242 = vmatprep.subr.bf16.mxu0 %v5919_v46 }
 0x1d8   :  { %v5265_v7 = vpop.f32.mrb[0].mxu0  ;;  %v5267_v0 = vpop.f32.mrb[0].mxu1 }
 0x1d9   :  { %v5269_v3 = vpop.f32.mrb[1].mxu0  ;;  %v5271_v54 = vpop.f32.mrb[1].mxu1 }
 0x1da   :  { %v5273_v55 = vpop.f32.mrb[2].mxu0  ;;  %v5275_v9 = vpop.f32.mrb[2].mxu1 }
 0x1db   :  { %v5277_v56 = vpop.f32.mrb[3].mxu0  ;;  %v5279_v57 = vpop.f32.mrb[3].mxu1 }
 0x1e0   :  { %v5281_v58 = vpop.f32.mrb[4].mxu0  ;;  %v5283_v59 = vpop.f32.mrb[4].mxu1 }
 0x1e1   :  { %v5285_v60 = vpop.f32.mrb[5].mxu0  ;;  %v5287_v61 = vpop.f32.mrb[5].mxu1 }
 0x1e2   :  { %v5289_v12 = vpop.f32.mrb[6].mxu0  ;;  %v5291_v15 = vpop.f32.mrb[6].mxu1 }
 0x1e3   :  { %v5293_v62 = vpop.f32.mrb[7].mxu0  ;;  %v5295_v63 = vpop.f32.mrb[7].mxu1 }
 0x1e8   :  { %v4058_v5 = vpop.f32.mrb[8].mxu0  ;;  %v4069_v10 = vpop.f32.mrb[8].mxu1 }
 0x1e9   :  { %v2317_v13 = vadd.f32 %v4058_v5, %v3950_v2  ;;  %v2408_v14 = vrot.slane %v4069_v10, 7  ;;  %v2517_v19 = vrot.slane %v4069_v10, 5  ;;  %v2627_v20 = vrot.slane %v4069_v10, 3  ;;  %v2311_v21 = vpop.f32.mrb[9].mxu0  ;;  %v2390_v22 = vpop.f32.mrb[9].mxu1 }
 0x1ea   :  { %v2740_v23 = vrot.slane %v4069_v10, 1  ;;  %v2312_v25 = vadd.f32 %v3950_v2, %v2311_v21  ;;  %v2404_v17 = vrot.slane %v2390_v22, 7  ;;  %v2514_v26 = vrot.slane %v2390_v22, 5 }
 0x1eb   :  { %v2410_v27 = vadd.f32 %v2408_v14, %v2317_v13  ;;  %v2629_v28 = vadd.f32 %v2627_v20, %v2317_v13  ;;  %v2624_v29 = vrot.slane %v2390_v22, 3  ;;  %v2737_v30 = vrot.slane %v2390_v22, 1 }
 0x1ec   :  { %v2742_v31 = vadd.f32 %v2740_v23, %v2317_v13  ;;  %v2516_v32 = vadd.f32 %v2514_v26, %v2312_v25  ;;  %v2406_v33 = vadd.f32 %v2404_v17, %v2312_v25  ;;  %v2519_v34 = vadd.f32 %v2517_v19, %v2317_v13 }
 0x1ed   :  { %v2626_v35 = vadd.f32 %v2624_v29, %v2312_v25  ;;  %v2739_v36 = vadd.f32 %v2737_v30, %v2312_v25  ;;  %v2412_v1 = vrot.slane %v2410_v27, 7  ;;  %v2634_v4 = vrot.slane %v2629_v28, 1 }
 0x1ee   :  { %v2521_v37 = vrot.slane %v2516_v32, 1  ;;  %v2747_v38 = vrot.slane %v2742_v31, 2  ;;  %v2851_v39 = vrot.slane %v2406_v33, 4  ;;  %v2853_v40 = vrot.slane %v2410_v27, 3 }
 0x1ef   :  { %v2415_v41 = vsel %vm2414_vm15, %v2406_v33, %v2412_v1  ;;  %v2631_v42 = vrot.slane %v2626_v35, 2  ;;  %v2744_v43 = vrot.slane %v2739_v36, 3  ;;  %v2956_v44 = vrot.slane %v2516_v32, 5 }
 0x1f0   :  { %v2485_v45 = vpop.f32.mrb[10].mxu0  ;;  %v2523_v24 = vsel %vm2414_vm15, %v2521_v37, %v2519_v34  ;;  %v5303_v47 = vsel %vm2414_vm15, %v2851_v39, %v2853_v40  ;;  %v2959_v48 = vrot.slane %v2519_v34, 4  ;;  %v3062_v49 = vrot.slane %v2626_v35, 6 }
 0x1f1   :  { %v2489_v51 = vadd.f32 %v2485_v45, %v2415_v41  ;;  %v4080_v52 = vpop.f32.mrb[11].mxu0  ;;  %v5306_v2 = vsel %vm2414_vm15, %v2631_v42, %v2634_v4  ;;  %v5309_v5 = vsel %vm2414_vm15, %v2744_v43, %v2747_v38  ;;  %v3064_v10 = vrot.slane %v2629_v28, 5 }
 0x1f2   :  { %v5312_v13 = vsel %vm2414_vm15, %v2956_v44, %v2959_v48  ;;  %v3167_v14 = vrot.slane %v2739_v36, 7  ;;  %v3169_v19 = vrot.slane %v2742_v31, 6 }
 0x1f3   :  { %4547 = vtanh.f32 %v2489_v51  ;;  %v5315_v20 = vsel %vm2414_vm15, %v3062_v49, %v3064_v10  ;;  %v3955_v23 = vmul.f32 -1.442695, %v2489_v51 }
 0x1f4   :  { %v5318_v21 = vsel %vm2414_vm15, %v3167_v14, %v3169_v19 }
 0x1f5   :  { %4549 = vpow2.f32 %v3955_v23 }
 0x1fd   :  { %v4548_v22 = vpop.eup %4547 }
 0x1fe   :  { %2499 = vrot.lane.b32.xlu0 %v4548_v22, %s4705_s8 }
 0x1ff   :  { %v4550_v25 = vpop.eup %4549 }
 0x200   :  { %v2493_v17 = vadd.f32 1.0, %v4550_v25 }
 0x202   :  { %4551 = vrcp.f32 %v2493_v17 }
 0x20c   :  { %v4552_v26 = vpop.eup %4551 }
 0x20d   :  { %v2497_v29 = vmul.f32 0.0, %v4552_v26 }
 0x270   :  { %v2500_v27 = vpop.permute.xlu0 %2499 }
 0x271   :  { %v2502_v28 = vmul.f32 %v4552_v26, %v2500_v27 }
 0x273   :  { %2504 = vrot.lane.b32.xlu1 %v2502_v28, %s4705_s8 }
 0x2e5   :  { %v2505_v30 = vpop.permute.xlu1 %2504 }
 0x2e6   :  { %v2507_v31 = vadd.f32 %v2505_v30, %v2497_v29 }
 0x2e8   :  { %4553 = vtanh.f32 %v2507_v31 }
 0x2f2   :  { %v4554_v32 = vpop.eup %4553 }
 0x2f3   :  { %2510 = vrot.lane.b32.xlu0 %v4554_v32, %s4705_s8 }
 0x365   :  { %v2511_v33 = vpop.permute.xlu0 %2510 }
 0x366   :  { %v5323_v34 = vmul.f32 %v4552_v26, %v2511_v33 }
 0x368   :  { %2525 = vrot.lane.b32.xlu1 %v5323_v34, %s4706_s18 }
 0x3da   :  { %v5327_v35 = vpop.permute.xlu1 %2525 }
 0x3db   :  { %5958 = vst [vmem:[#allocation7_spill] sm:$0xff] %v5327_v35  ;;  %4090 = vmatmul.mubr.msk.f32.vlgmr.msra.gmra.mrb[10].mxu1 %vm2238_vm14, %v5327_v35 }
 0x3dc   :  { %4238 = vmatpush3.bf16.msra.mxu1 %v5234_v50  ;;  %4111 = vmatprep.mubr.msk.f32.mxu1 %vm4703_vm4, %v5917_v6 }
 0x3dd   :  { %4239 = vmatprep.subr.bf16.mxu1 %v5919_v46 }
 0x3e0   :  { %4241 = vmatpush3.bf16.msra.mxu1 %v5245_v53 }
 0x3e1   :  { %4248 = vmatprep.subr.bf16.mxu1 %v5919_v46 }
 0x4ae   :  { %v2595_v36 = vpop.f32.mrb[10].mxu1 }
 0x4af   :  { %v2599_v1 = vadd.f32 %v2595_v36, %v2523_v24  ;;  %v4091_v4 = vpop.f32.mrb[11].mxu1 }
 0x4b1   :  { %4555 = vtanh.f32 %v2599_v1  ;;  %v3957_v38 = vmul.f32 -1.442695, %v2599_v1 }
 0x4b3   :  { %4557 = vpow2.f32 %v3957_v38 }
 0x4bb   :  { %v4556_v37 = vpop.eup %4555 }
 0x4bc   :  { %2609 = vrot.lane.b32.xlu0 %v4556_v37, %s4705_s8 }
 0x4bd   :  { %v4558_v39 = vpop.eup %4557 }
 0x4be   :  { %v2603_v40 = vadd.f32 1.0, %v4558_v39 }
 0x4c0   :  { %4559 = vrcp.f32 %v2603_v40 }
 0x4ca   :  { %v4560_v41 = vpop.eup %4559 }
 0x4cb   :  { %v2607_v44 = vmul.f32 %v4560_v41, %v2507_v31 }
 0x52e   :  { %v2610_v42 = vpop.permute.xlu0 %2609 }
 0x52f   :  { %v2612_v43 = vmul.f32 %v4560_v41, %v2610_v42 }
 0x531   :  { %2614 = vrot.lane.b32.xlu1 %v2612_v43, %s4705_s8 }
 0x5a3   :  { %v2615_v45 = vpop.permute.xlu1 %2614 }
 0x5a4   :  { %v2617_v48 = vadd.f32 %v2615_v45, %v2607_v44 }
 0x5a6   :  { %4561 = vtanh.f32 %v2617_v48 }
 0x5b0   :  { %v4562_v24 = vpop.eup %4561 }
 0x5b1   :  { %2620 = vrot.lane.b32.xlu0 %v4562_v24, %s4705_s8 }
 0x623   :  { %v2621_v49 = vpop.permute.xlu0 %2620 }
 0x624   :  { %v5340_v51 = vmul.f32 %v4560_v41, %v2621_v49 }
 0x626   :  { %2638 = vrot.lane.b32.xlu1 %v5340_v51, %s4706_s18 }
 0x698   :  { %v5344_v52 = vpop.permute.xlu1 %2638 }
 0x699   :  { %5959 = vst [vmem:[#allocation8_spill] sm:$0xff] %v5344_v52  ;;  %4101 = vmatmul.mubr.msk.f32.vlgmr.msra.gmra.mrb[12].mxu0 %vm2238_vm14, %v5344_v52 }
 0x69a   :  { %4244 = vmatpush3.bf16.msra.mxu0 %v5234_v50  ;;  %4122 = vmatprep.mubr.msk.f32.mxu0 %vm4703_vm4, %v5917_v6 }
 0x69b   :  { %4245 = vmatprep.subr.bf16.mxu0 %v5919_v46 }
 0x69e   :  { %4247 = vmatpush3.bf16.msra.mxu0 %v5245_v53 }
 0x69f   :  { %4254 = vmatprep.subr.bf16.mxu0 %v5919_v46 }
 0x76c   :  { %v2708_v10 = vpop.f32.mrb[12].mxu0 }
 0x76d   :  { %v2712_v14 = vadd.f32 %v2708_v10, %v5306_v2  ;;  %v4102_v19 = vpop.f32.mrb[13].mxu0 }
 0x76f   :  { %4563 = vtanh.f32 %v2712_v14  ;;  %v3959_v23 = vmul.f32 -1.442695, %v2712_v14 }
 0x771   :  { %4565 = vpow2.f32 %v3959_v23 }
 0x779   :  { %v4564_v22 = vpop.eup %4563 }
 0x77a   :  { %2722 = vrot.lane.b32.xlu0 %v4564_v22, %s4705_s8 }
 0x77b   :  { %v4566_v25 = vpop.eup %4565 }
 0x77c   :  { %v2716_v17 = vadd.f32 1.0, %v4566_v25 }
 0x77e   :  { %4567 = vrcp.f32 %v2716_v17 }
 0x788   :  { %v4568_v26 = vpop.eup %4567 }
 0x789   :  { %v2720_v29 = vmul.f32 %v4568_v26, %v2617_v48 }
 0x7ec   :  { %v2723_v27 = vpop.permute.xlu0 %2722 }
 0x7ed   :  { %v2725_v28 = vmul.f32 %v4568_v26, %v2723_v27 }
 0x7ef   :  { %2727 = vrot.lane.b32.xlu1 %v2725_v28, %s4705_s8 }
 0x861   :  { %v2728_v30 = vpop.permute.xlu1 %2727 }
 0x862   :  { %v2730_v31 = vadd.f32 %v2728_v30, %v2720_v29 }
 0x864   :  { %4569 = vtanh.f32 %v2730_v31 }
 0x86e   :  { %v4570_v2 = vpop.eup %4569 }
 0x86f   :  { %2733 = vrot.lane.b32.xlu0 %v4570_v2, %s4705_s8 }
 0x8e1   :  { %v2734_v32 = vpop.permute.xlu0 %2733 }
 0x8e2   :  { %v5358_v33 = vmul.f32 %v4568_v26, %v2734_v32 }
 0x8e4   :  { %2751 = vrot.lane.b32.xlu1 %v5358_v33, %s4706_s18 }
 0x956   :  { %v5362_v36 = vpop.permute.xlu1 %2751 }
 0x957   :  { %4112 = vmatmul.mubr.msk.f32.vlgmr.msra.gmra.mrb[12].mxu1 %vm2238_vm14, %v5362_v36 }
 0x958   :  { %4250 = vmatpush3.bf16.msra.mxu1 %v5234_v50  ;;  %4133 = vmatprep.mubr.msk.f32.mxu1 %vm4703_vm4, %v5917_v6 }
 0x959   :  { %4251 = vmatprep.subr.bf16.mxu1 %v5919_v46 }
 0x95c   :  { %4253 = vmatpush3.bf16.msra.mxu1 %v5245_v53 }
 0x95d   :  { %4260 = vmatprep.subr.bf16.mxu1 %v5919_v46 }
 0xa2a   :  { %v2821_v1 = vpop.f32.mrb[12].mxu1 }
 0xa2b   :  { %v2825_v4 = vadd.f32 %v2821_v1, %v5309_v5  ;;  %v4113_v37 = vpop.f32.mrb[13].mxu1 }
 0xa2d   :  { %4571 = vtanh.f32 %v2825_v4  ;;  %v3961_v39 = vmul.f32 -1.442695, %v2825_v4 }
 0xa2f   :  { %4573 = vpow2.f32 %v3961_v39 }
 0xa37   :  { %v4572_v38 = vpop.eup %4571 }
 0xa38   :  { %2835 = vrot.lane.b32.xlu0 %v4572_v38, %s4705_s8 }
 0xa39   :  { %v4574_v40 = vpop.eup %4573 }
 0xa3a   :  { %v2829_v41 = vadd.f32 1.0, %v4574_v40 }
 0xa3c   :  { %4575 = vrcp.f32 %v2829_v41 }
 0xa46   :  { %v4576_v42 = vpop.eup %4575 }
 0xa47   :  { %v2833_v45 = vmul.f32 %v4576_v42, %v2730_v31 }
 0xaaa   :  { %v2836_v43 = vpop.permute.xlu0 %2835 }
 0xaab   :  { %v2838_v44 = vmul.f32 %v4576_v42, %v2836_v43 }
 0xaad   :  { %2840 = vrot.lane.b32.xlu1 %v2838_v44, %s4705_s8 }
 0xb1f   :  { %v2841_v48 = vpop.permute.xlu1 %2840 }
 0xb20   :  { %v2843_v24 = vadd.f32 %v2841_v48, %v2833_v45 }
 0xb22   :  { %4577 = vtanh.f32 %v2843_v24 }
 0xb2c   :  { %v4578_v5 = vpop.eup %4577 }
 0xb2d   :  { %2846 = vrot.lane.b32.xlu0 %v4578_v5, %s4705_s8 }
 0xb9f   :  { %v2847_v49 = vpop.permute.xlu0 %2846 }
 0xba0   :  { %v5376_v10 = vmul.f32 %v4576_v42, %v2847_v49 }
 0xba2   :  { %2857 = vrot.lane.b32.xlu1 %v5376_v10, %s4706_s18 }
 0xc14   :  { %v5380_v14 = vpop.permute.xlu1 %2857 }
 0xc15   :  { %4123 = vmatmul.mubr.msk.f32.vlgmr.msra.gmra.mrb[14].mxu0 %vm2238_vm14, %v5380_v14 }
 0xc16   :  { %4256 = vmatpush3.bf16.msra.mxu0 %v5234_v50  ;;  %4144 = vmatprep.mubr.msk.f32.mxu0 %vm4703_vm4, %v5917_v6 }
 0xc17   :  { %4257 = vmatprep.subr.bf16.mxu0 %v5919_v46 }
 0xc1a   :  { %4259 = vmatpush3.bf16.msra.mxu0 %v5245_v53 }
 0xc1b   :  { %4266 = vmatprep.subr.bf16.mxu0 %v5919_v46 }
 0xce8   :  { %v2927_v19 = vpop.f32.mrb[14].mxu0 }
 0xce9   :  { %v2931_v22 = vadd.f32 %v2927_v19, %v5303_v47  ;;  %v4124_v23 = vpop.f32.mrb[15].mxu0 }
 0xceb   :  { %4579 = vtanh.f32 %v2931_v22  ;;  %v3963_v17 = vmul.f32 -1.442695, %v2931_v22 }
 0xced   :  { %4581 = vpow2.f32 %v3963_v17 }
 0xcf5   :  { %v4580_v25 = vpop.eup %4579 }
 0xcf6   :  { %2941 = vrot.lane.b32.xlu0 %v4580_v25, %s4705_s8 }
 0xcf7   :  { %v4582_v26 = vpop.eup %4581 }
 0xcf8   :  { %v2935_v27 = vadd.f32 1.0, %v4582_v26 }
 0xcfa   :  { %4583 = vrcp.f32 %v2935_v27 }
 0xd04   :  { %v4584_v28 = vpop.eup %4583 }
 0xd05   :  { %v2939_v31 = vmul.f32 %v4584_v28, %v2843_v24 }
 0xd68   :  { %v2942_v29 = vpop.permute.xlu0 %2941 }
 0xd69   :  { %v2944_v30 = vmul.f32 %v4584_v28, %v2942_v29 }
 0xd6b   :  { %2946 = vrot.lane.b32.xlu1 %v2944_v30, %s4705_s8 }
 0xddd   :  { %v2947_v2 = vpop.permute.xlu1 %2946 }
 0xdde   :  { %v2949_v32 = vadd.f32 %v2947_v2, %v2939_v31 }
 0xde0   :  { %4585 = vtanh.f32 %v2949_v32 }
 0xdea   :  { %v4586_v47 = vpop.eup %4585 }
 0xdeb   :  { %2952 = vrot.lane.b32.xlu0 %v4586_v47, %s4705_s8 }
 0xe5d   :  { %v2953_v1 = vpop.permute.xlu0 %2952 }
 0xe5e   :  { %v5394_v4 = vmul.f32 %v4584_v28, %v2953_v1 }
 0xe60   :  { %2963 = vrot.lane.b32.xlu1 %v5394_v4, %s4706_s18 }
 0xed2   :  { %v5398_v37 = vpop.permute.xlu1 %2963 }
 0xed3   :  { %4134 = vmatmul.mubr.msk.f32.vlgmr.msra.gmra.mrb[14].mxu1 %vm2238_vm14, %v5398_v37 }
 0xed4   :  { %4262 = vmatpush3.bf16.msra.mxu1 %v5234_v50  ;;  %4155 = vmatprep.mubr.msk.f32.mxu1 %vm4703_vm4, %v5917_v6 }
 0xed5   :  { %4263 = vmatprep.subr.bf16.mxu1 %v5919_v46 }
 0xed8   :  { %4265 = vmatpush3.bf16.msra.mxu1 %v5245_v53 }
 0xed9   :  { %4272 = vmatprep.subr.bf16.mxu1 %v5919_v46 }
 0xfa6   :  { %v3033_v38 = vpop.f32.mrb[14].mxu1 }
 0xfa7   :  { %v3037_v39 = vadd.f32 %v3033_v38, %v5312_v13  ;;  %v4135_v40 = vpop.f32.mrb[15].mxu1  ;;  %v5432_v38 = vld [vmem:[%s5907_s3] sm:$0xff] }
 0xfa9   :  { %4587 = vtanh.f32 %v3037_v39  ;;  %v3965_v42 = vmul.f32 -1.442695, %v3037_v39  ;;  %v5438_v39 = vld [vmem:[%s5907_s3 + $0x18] sm:$0xff] }
 0xfab   :  { %4589 = vpow2.f32 %v3965_v42  ;;  %v5448_v42 = vld [vmem:[%s5907_s3 + $0x8] sm:$0xff] }
 0xfb3   :  { %v4588_v41 = vpop.eup %4587 }
 0xfb4   :  { %3047 = vrot.lane.b32.xlu0 %v4588_v41, %s4705_s8 }
 0xfb5   :  { %v4590_v50 = vpop.eup %4589 }
 0xfb6   :  { %v3041_v43 = vadd.f32 1.0, %v4590_v50  ;;  %v5454_v50 = vld [vmem:[%s5907_s3 + $0x10] sm:$0xff] }
 0xfb8   :  { %4591 = vrcp.f32 %v3041_v43 }
 0xfc2   :  { %v4592_v44 = vpop.eup %4591 }
 0xfc3   :  { %v3045_v53 = vmul.f32 %v4592_v44, %v2949_v32 }
0x1026   :  { %v3048_v45 = vpop.permute.xlu0 %3047 }
0x1027   :  { %v3050_v48 = vmul.f32 %v4592_v44, %v3048_v45 }
0x1029   :  { %3052 = vrot.lane.b32.xlu1 %v3050_v48, %s4705_s8 }
0x109b   :  { %v3053_v24 = vpop.permute.xlu1 %3052 }
0x109c   :  { %v3055_v5 = vadd.f32 %v3053_v24, %v3045_v53 }
0x109e   :  { %4593 = vtanh.f32 %v3055_v5 }
0x10a8   :  { %v4594_v13 = vpop.eup %4593 }
0x10a9   :  { %3058 = vrot.lane.b32.xlu0 %v4594_v13, %s4705_s8 }
0x111b   :  { %v3059_v49 = vpop.permute.xlu0 %3058 }
0x111c   :  { %v5412_v19 = vmul.f32 %v4592_v44, %v3059_v49 }
0x111e   :  { %3068 = vrot.lane.b32.xlu1 %v5412_v19, %s4706_s18 }
0x1190   :  { %v5416_v22 = vpop.permute.xlu1 %3068 }
0x1191   :  { %4145 = vmatmul.mubr.msk.f32.vlgmr.msra.gmra.mrb[16].mxu0 %vm2238_vm14, %v5416_v22 }
0x1192   :  { %4166 = vmatprep.mubr.msk.f32.mxu0 %vm4703_vm4, %v5917_v6 }
0x1264   :  { %v3138_v23 = vpop.f32.mrb[16].mxu0 }
0x1265   :  { %v3142_v25 = vadd.f32 %v3138_v23, %v5315_v20  ;;  %v4146_v17 = vpop.f32.mrb[17].mxu0 }
0x1267   :  { %4595 = vtanh.f32 %v3142_v25  ;;  %v3967_v27 = vmul.f32 -1.442695, %v3142_v25 }
0x1269   :  { %4597 = vpow2.f32 %v3967_v27 }
0x1271   :  { %v4596_v26 = vpop.eup %4595 }
0x1272   :  { %3152 = vrot.lane.b32.xlu0 %v4596_v26, %s4705_s8 }
0x1273   :  { %v4598_v28 = vpop.eup %4597 }
0x1274   :  { %v3146_v29 = vadd.f32 1.0, %v4598_v28 }
0x1276   :  { %4599 = vrcp.f32 %v3146_v29 }
0x1280   :  { %v4600_v30 = vpop.eup %4599 }
0x1281   :  { %v3150_v32 = vmul.f32 %v4600_v30, %v3055_v5 }
0x12e4   :  { %v3153_v31 = vpop.permute.xlu0 %3152 }
0x12e5   :  { %v3155_v2 = vmul.f32 %v4600_v30, %v3153_v31 }
0x12e7   :  { %3157 = vrot.lane.b32.xlu1 %v3155_v2, %s4705_s8 }
0x1359   :  { %v3158_v47 = vpop.permute.xlu1 %3157 }
0x135a   :  { %v5425_v1 = vadd.f32 %v3158_v47, %v3150_v32 }
0x135c   :  { %4601 = vtanh.f32 %v5425_v1 }
0x1366   :  { %v4602_v20 = vpop.eup %4601 }
0x1367   :  { %3163 = vrot.lane.b32.xlu0 %v4602_v20, %s4705_s8 }
0x136b   :  { %1767 = vperm.xlu0 %4515, %v5432_v38  }
0x136f   :  { %1782 = vperm.xlu0 %4515, %v5438_v39  }
0x13d9   :  { %v3164_v40 = vpop.permute.xlu0 %3163 }
0x13da   :  { %v5441_v41 = vmul.f32 %v4600_v30, %v3164_v40 }
0x13dc   :  { %3173 = vrot.lane.b32.xlu1 %v5441_v41, %s4706_s18 }
0x13e0   :  { %1772 = vperm.xlu1 %4516, %v5448_v42  }
0x13e4   :  { %1777 = vperm.xlu1 %4516, %v5454_v50  }
0x13ea   :  { %v1768_v43 = vpop.permute.xlu0 %1767 }
0x13eb   :  { %v5458_v44 = vadd.f32 %v1768_v43, %v5265_v7  ;;  %v5461_v45 = vadd.f32 %v1768_v43, %v5269_v3  ;;  %v5464_v48 = vadd.f32 %v1768_v43, %v5267_v0  ;;  %v5467_v53 = vadd.f32 %v1768_v43, %v5271_v54 }
0x13ed   :  { %v1801_v24 = vadd.f32 %v5461_v45, %v5458_v44  ;;  %v2013_v32 = vadd.f32 %v5467_v53, %v5464_v48 }
0x13ee   :  { %v1783_v26 = vpop.permute.xlu0 %1782 }
0x13ef   :  { %1802 = vadd.xlane.f32.xlu0 %v1801_v24  ;;  %v5509_v30 = vadd.f32 %v1783_v26, %v5293_v62 }
0x144e   :  { %v5471_v5 = vpop.permute.xlu1 %3173 }
0x144f   :  { %5960 = vst [vmem:[#allocation9_spill] sm:$0xff] %v5471_v5  ;;  %4156 = vmatmul.mubr.msk.f32.vlgmr.msra.gmra.mrb[16].mxu1 %vm2238_vm14, %v5471_v5 }
0x1450   :  { %4177 = vmatprep.mubr.msk.f32.mxu1 %vm4703_vm4, %v5917_v6 }
0x145f   :  { %v1773_v7 = vpop.permute.xlu1 %1772 }
0x1460   :  { %v5478_v3 = vadd.f32 %v1773_v7, %v5273_v55  ;;  %v5481_v0 = vadd.f32 %v1773_v7, %v5277_v56  ;;  %v1813_v55 = vmul.f32 %v5458_v44, %v5458_v44  ;;  %v1814_v56 = vmul.f32 %v5461_v45, %v5461_v45 }
0x1461   :  { %v5520_v40 = vadd.f32 %v1773_v7, %v5275_v9  ;;  %v5523_v62 = vadd.f32 %v1773_v7, %v5279_v57  ;;  %v2026_v7 = vmul.f32 %v5467_v53, %v5467_v53 }
0x1462   :  { %v1804_v54 = vadd.f32 %v5481_v0, %v5478_v3  ;;  %v1815_v13 = vmul.f32 %v5478_v3, %v5478_v3  ;;  %v1816_v49 = vmul.f32 %v5481_v0, %v5481_v0  ;;  %v1821_v2 = vadd.f32 %v1814_v56, %v1813_v55 }
0x1463   :  { %v1778_v23 = vpop.permute.xlu1 %1777  ;;  %v2028_v9 = vmul.f32 %v5523_v62, %v5523_v62  ;;  %v5547_v55 = vadd.f32 %v1783_v26, %v5295_v63 }
0x1464   :  { %v5490_v25 = vadd.f32 %v1778_v23, %v5281_v58  ;;  %v5493_v17 = vadd.f32 %v1778_v23, %v5285_v60  ;;  %1805 = vadd.xlane.f32.xlu1 %v1804_v54  ;;  %v1824_v27 = vadd.f32 %v1816_v49, %v1815_v13  ;;  %v5506_v60 = vadd.f32 %v1783_v26, %v5289_v12 }
0x1465   :  { %v1820_v12 = vmul.f32 %v5509_v30, %v5509_v30  ;;  %v5526_v43 = vadd.f32 %v1778_v23, %v5283_v59  ;;  %v5529_v24 = vadd.f32 %v1778_v23, %v5287_v61  ;;  %v2027_v49 = vmul.f32 %v5520_v40, %v5520_v40 }
0x1466   :  { %v1807_v28 = vadd.f32 %v5493_v17, %v5490_v25  ;;  %v1817_v29 = vmul.f32 %v5490_v25, %v5490_v25  ;;  %v1818_v58 = vmul.f32 %v5493_v17, %v5493_v17  ;;  %v1810_v47 = vadd.f32 %v5509_v30, %v5506_v60 }
0x1467   :  { %v1819_v20 = vmul.f32 %v5506_v60, %v5506_v60  ;;  %v2019_v54 = vadd.f32 %v5529_v24, %v5526_v43  ;;  %v2036_v57 = vadd.f32 %v2028_v9, %v2027_v49  ;;  %v2016_v59 = vadd.f32 %v5523_v62, %v5520_v40 }
0x1468   :  { %1825 = vadd.xlane.f32.xlu1 %v1824_v27  ;;  %1808 = vadd.xlane.f32.xlu0 %v1807_v28  ;;  %v1827_v31 = vadd.f32 %v1818_v58, %v1817_v29  ;;  %v2025_v61 = vmul.f32 %v5464_v48, %v5464_v48  ;;  %v5544_v23 = vadd.f32 %v1783_v26, %v5291_v15 }
0x1469   :  { %v1830_v13 = vadd.f32 %v1820_v12, %v1819_v20  ;;  %v2032_v29 = vmul.f32 %v5547_v55, %v5547_v55 }
0x146a   :  { %v2033_v56 = vadd.f32 %v2026_v7, %v2025_v61  ;;  %v2022_v27 = vadd.f32 %v5547_v55, %v5544_v23  ;;  %v2031_v28 = vmul.f32 %v5544_v23, %v5544_v23 }
0x146c   :  { %1828 = vadd.xlane.f32.xlu1 %v1827_v31  ;;  %1822 = vadd.xlane.f32.xlu0 %v1821_v2  ;;  %v2042_v58 = vadd.f32 %v2032_v29, %v2031_v28  ;;  %v5923_v31 = vmov 1  }
0x146d   :  { %4517 = vset.pattern.permute.xlu0 %v5923_v31  ;;  %4518 = vset.pattern.permute.xlu1 %v5923_v31 }
0x1470   :  { %2014 = vadd.xlane.f32.xlu1 %v2013_v32  ;;  %1811 = vadd.xlane.f32.xlu0 %v1810_v47 }
0x1474   :  { %2020 = vadd.xlane.f32.xlu1 %v2019_v54  ;;  %1831 = vadd.xlane.f32.xlu0 %v1830_v13 }
0x1478   :  { %2037 = vadd.xlane.f32.xlu1 %v2036_v57  ;;  %2017 = vadd.xlane.f32.xlu0 %v2016_v59 }
0x147c   :  { %2034 = vadd.xlane.f32.xlu0 %v2033_v56  ;;  %v1803_v15 = vpop.xlane.xlu0 %1802 }
0x147d   :  { %v1833_v47 = vmul.f32 0.00390625, %v1803_v15 }
0x147f   :  { %v1841_v57 = vmul.f32 %v1833_v47, %v1833_v47 }
0x1480   :  { %2023 = vadd.xlane.f32.xlu0 %v2022_v27 }
0x1484   :  { %2043 = vadd.xlane.f32.xlu0 %v2042_v58 }
0x14f1   :  { %v1806_v63 = vpop.xlane.xlu1 %1805 }
0x14f2   :  { %v5557_v26 = vmul.f32 0.00390625, %v1806_v63 }
0x14f4   :  { %v5561_v20 = vmul.f32 %v5557_v26, %v5557_v26 }
0x14f5   :  { %v1826_v2 = vpop.xlane.xlu1 %1825  ;;  %v1809_v32 = vpop.xlane.xlu0 %1808 }
0x14f6   :  { %v5563_v12 = vmul.f32 0.00390625, %v1826_v2  ;;  %v5565_v54 = vmul.f32 0.00390625, %v1809_v32 }
0x14f8   :  { %v5571_v59 = vmul.f32 %v5565_v54, %v5565_v54 }
0x14f9   :  { %v1829_v49 = vpop.xlane.xlu1 %1828  ;;  %v1823_v9 = vpop.xlane.xlu0 %1822 }
0x14fa   :  { %v5573_v61 = vmul.f32 0.00390625, %v1829_v49  ;;  %v1837_v7 = vmul.f32 0.00390625, %v1823_v9 }
0x14fc   :  { %v1845_v27 = vsub.f32 %v1837_v7, %v1841_v57 }
0x14fd   :  { %v2015_v28 = vpop.xlane.xlu1 %2014  ;;  %v1812_v29 = vpop.xlane.xlu0 %1811 }
0x14fe   :  { %v1849_v58 = vadd.f32 1e-05, %v1845_v27  ;;  %v1836_v15 = vmul.f32 0.00390625, %v1812_v29  ;;  %v2045_v49 = vmul.f32 0.00390625, %v2015_v28 }
0x1500   :  { %4603 = vrsqrt.f32 %v1849_v58  ;;  %v1844_v32 = vmul.f32 %v1836_v15, %v1836_v15  ;;  %v2053_v7 = vmul.f32 %v2045_v49, %v2045_v49 }
0x1501   :  { %v5577_v63 = vpop.xlane.xlu1 %2020  ;;  %v1832_v2 = vpop.xlane.xlu0 %1831 }
0x1502   :  { %v1840_v6 = vmul.f32 0.00390625, %v1832_v2 }
0x1504   :  { %v1848_v46 = vsub.f32 %v1840_v6, %v1844_v32 }
0x1505   :  { %v2038_v8 = vpop.xlane.xlu1 %2037  ;;  %v2018_v31 = vpop.xlane.xlu0 %2017 }
0x1506   :  { %v1852_v13 = vadd.f32 1e-05, %v1848_v46  ;;  %v2046_v9 = vmul.f32 0.00390625, %v2018_v31  ;;  %v2050_v16 = vmul.f32 0.00390625, %v2038_v8 }
0x1508   :  { %4605 = vrsqrt.f32 %v1852_v13  ;;  %v2054_v56 = vmul.f32 %v2046_v9, %v2046_v9 }
0x1509   :  { %v2035_v57 = vpop.xlane.xlu0 %2034 }
0x150a   :  { %v2058_v11 = vsub.f32 %v2050_v16, %v2054_v56  ;;  %v2049_v27 = vmul.f32 0.00390625, %v2035_v57  ;;  %v4604_v29 = vpop.eup %4603 }
0x150b   :  { %v1857_v52 = vmul.f32 %v4604_v29, %v5432_v38 }
0x150c   :  { %v2062_v58 = vadd.f32 1e-05, %v2058_v11  ;;  %v2057_v35 = vsub.f32 %v2049_v27, %v2053_v7 }
0x150d   :  { %v2024_v5 = vpop.xlane.xlu0 %2023  ;;  %v1861_v32 = vmul.f32 %v1857_v52, %v1833_v47 }
0x150e   :  { %4607 = vrsqrt.f32 %v2062_v58  ;;  %v2061_v6 = vadd.f32 1e-05, %v2057_v35  ;;  %v2048_v2 = vmul.f32 0.00390625, %v2024_v5 }
0x150f   :  { %1869 = vrot.lane.b32.xlu0 %v1861_v32, %s4697_s1 }
0x1510   :  { %4609 = vrsqrt.f32 %v2061_v6  ;;  %v2056_v31 = vmul.f32 %v2048_v2, %v2048_v2 }
0x1511   :  { %v2044_v46 = vpop.xlane.xlu0 %2043 }
0x1512   :  { %v4606_v8 = vpop.eup %4605  ;;  %v2052_v13 = vmul.f32 0.00390625, %v2044_v46 }
0x1513   :  { %v5582_v16 = vmul.f32 %v4606_v8, %v5438_v39  ;;  %v4708_v8 = vmov 2  }
0x1514   :  { %v2060_v56 = vsub.f32 %v2052_v13, %v2056_v31 }
0x1515   :  { %v1864_v11 = vmul.f32 %v5582_v16, %v1836_v15 }
0x1516   :  { %v2064_v28 = vadd.f32 1e-05, %v2060_v56 }
0x1517   :  { %1875 = vrot.lane.b32.xlu0 %v1864_v11, %s4697_s1  ;;  %v5961_v11 = vsub.f32 %v5563_v12, %v5561_v20 }
0x1518   :  { %v4608_v57 = vpop.eup %4607  ;;  %4611 = vrsqrt.f32 %v2064_v28 }
0x1519   :  { %v5587_v35 = vmul.f32 %v4608_v57, %v5448_v42  ;;  %v1850_v28 = vadd.f32 1e-05, %v5961_v11 }
0x151a   :  { %v4610_v5 = vpop.eup %4609 }
0x151b   :  { %v2074_v47 = vmul.f32 %v5587_v35, %v2046_v9  ;;  %v2069_v7 = vmul.f32 %v4610_v5, %v5432_v38  ;;  %v5962_v5 = vsub.f32 %v5573_v61, %v5571_v59  ;;  %v2047_v61 = vmul.f32 0.00390625, %v5577_v63 }
0x151d   :  { %2083 = vrot.lane.b32.xlu0 %v2074_v47, %s4697_s1  ;;  %v2073_v27 = vmul.f32 %v2069_v7, %v2045_v49  ;;  %v2030_v49 = vmul.f32 %v5529_v24, %v5529_v24  ;;  %v1851_v47 = vadd.f32 1e-05, %v5962_v5 }
0x1522   :  { %v4612_v29 = vpop.eup %4611  ;;  %v3243_v58 = vpop.f32.mrb[16].mxu1 }
0x1523   :  { %v3247_v15 = vadd.f32 %v3243_v58, %v5318_v21  ;;  %v4157_v6 = vpop.f32.mrb[17].mxu1  ;;  %v5594_v32 = vmul.f32 %v4612_v29, %v5438_v39  ;;  %v2029_v21 = vmul.f32 %v5526_v43, %v5526_v43 }
0x1525   :  { %4613 = vtanh.f32 %v3247_v15  ;;  %v2076_v46 = vmul.f32 %v5594_v32, %v2048_v2  ;;  %v2039_v31 = vadd.f32 %v2030_v49, %v2029_v21  ;;  %v3969_v2 = vmul.f32 -1.442695, %v3247_v15 }
0x1526   :  { %v2055_v21 = vmul.f32 %v2047_v61, %v2047_v61 }
0x1527   :  { %2087 = vrot.lane.b32.xlu0 %v2076_v46, %s4697_s1  ;;  %4615 = vpow2.f32 %v3969_v2 }
0x1528   :  { %4617 = vrsqrt.f32 %v1850_v28 }
0x152b   :  { %1887 = vperm.xlu0 %4517, %v1857_v52  }
0x152f   :  { %v4614_v9 = vpop.eup %4613  ;;  %2099 = vperm.xlu0 %4517, %v2069_v7  }
0x1530   :  { %3257 = vrot.lane.b32.xlu1 %v4614_v9, %s4705_s8 }
0x1531   :  { %v4616_v52 = vpop.eup %4615 }
0x1532   :  { %v3251_v57 = vadd.f32 1.0, %v4616_v52  ;;  %v4618_v7 = vpop.eup %4617 }
0x1533   :  { %4522 = vset.pattern.permute.xlu0 %v4708_v8  ;;  %v1858_v6 = vmul.f32 %v4618_v7, %v5448_v42 }
0x1534   :  { %4619 = vrcp.f32 %v3251_v57 }
0x1535   :  { %4621 = vrsqrt.f32 %v1851_v47  ;;  %v1862_v20 = vmul.f32 %v1858_v6, %v5557_v26 }
0x153e   :  { %v5611_v29 = vpop.eup %4619 }
0x153f   :  { %v4622_v46 = vpop.eup %4621 }
0x1540   :  { %v1859_v12 = vmul.f32 %v4622_v46, %v5454_v50 }
0x1542   :  { %v1863_v59 = vmul.f32 %v1859_v12, %v5565_v54  ;;  %v3255_v54 = vmul.f32 %v5611_v29, %v5425_v1  ;;  %v5963_v1 = vmov 1  }
0x1554   :  { %2040 = vadd.xlane.f32.xlu1 %v2039_v31 }
0x1581   :  { %v1870_v13 = vpop.permute.xlu0 %1869 }
0x1582   :  { %v1881_v56 = vsub.f32 %v5432_v38, %v1870_v13 }
0x1584   :  { %1915 = vperm.xlu0 %4522, %v1881_v56  }
0x15a2   :  { %v3258_v58 = vpop.permute.xlu1 %3257 }
0x15a3   :  { %v3260_v15 = vmul.f32 %v5611_v29, %v3258_v58  ;;  %v1876_v58 = vpop.permute.xlu0 %1875 }
0x15a5   :  { %3262 = vrot.lane.b32.xlu1 %v3260_v15, %s4705_s8  ;;  %v1884_v15 = vsub.f32 %v5438_v39, %v1876_v58 }
0x15a9   :  { %1871 = vrot.lane.b32.xlu1 %v1862_v20, %s4697_s1  ;;  %v3550_v20 = vrot.slane %v5340_v51, 1  ;;  %v3554_v51 = vrot.slane %v5441_v41, 1 }
0x15ad   :  { %1873 = vrot.lane.b32.xlu1 %v1863_v59, %s4697_s1 }
0x15b1   :  { %2081 = vrot.lane.b32.xlu1 %v2073_v27, %s4697_s1 }
0x15e1   :  { %v2041_v9 = vpop.xlane.xlu1 %2040 }
0x15e2   :  { %v2051_v49 = vmul.f32 0.00390625, %v2041_v9 }
0x15e4   :  { %v2059_v31 = vsub.f32 %v2051_v49, %v2055_v21 }
0x15e6   :  { %v2063_v13 = vadd.f32 1e-05, %v2059_v31 }
0x15e8   :  { %4623 = vrsqrt.f32 %v2063_v13 }
0x15f2   :  { %v4624_v2 = vpop.eup %4623 }
0x15f3   :  { %v2071_v26 = vmul.f32 %v4624_v2, %v5454_v50 }
0x15f5   :  { %v2075_v56 = vmul.f32 %v2071_v26, %v2047_v61 }
0x15f7   :  { %2085 = vrot.lane.b32.xlu1 %v2075_v56, %s4697_s1 }
0x1617   :  { %v3263_v52 = vpop.permute.xlu1 %3262 }
0x1618   :  { %v3265_v11 = vadd.f32 %v3263_v52, %v3255_v54 }
0x161a   :  { %4625 = vtanh.f32 %v3265_v11 }
0x161b   :  { %v1872_v27 = vpop.permute.xlu1 %1871 }
0x161c   :  { %v1882_v7 = vsub.f32 %v5448_v42, %v1872_v27 }
0x161f   :  { %v1874_v63 = vpop.permute.xlu1 %1873 }
0x1620   :  { %v1883_v28 = vsub.f32 %v5454_v50, %v1874_v63 }
0x1622   :  { %1925 = vperm.xlu0 %4522, %v1883_v28  }
0x1623   :  { %v2082_v57 = vpop.permute.xlu1 %2081 }
0x1624   :  { %v4626_v5 = vpop.eup %4625  ;;  %v2093_v47 = vsub.f32 %v5432_v38, %v2082_v57  ;;  %v2084_v38 = vpop.permute.xlu0 %2083 }
0x1625   :  { %3268 = vrot.lane.b32.xlu1 %v4626_v5, %s4705_s8  ;;  %s3837_s8 = sshll.u32 %s4709_s17, 4  ;;  %s3838_s8 = int_to_ptr.vmem [resolvable:$true] %s3837_s8 }
0x1626   :  { %2127 = vperm.xlu0 %4522, %v2093_v47   ;;  %p4674_p1 = scmp.lt.s32.totalorder %s3838_s8, %s3838_s8 }
0x1628   :  { %v2088_v46 = vpop.permute.xlu0 %2087 }
0x1629   :  { %1892 = vperm.xlu1 %4518, %v1858_v6   ;;  %v2094_v6 = vsub.f32 %v5448_v42, %v2084_v38  ;;  %v3559_v42 = vrot.slane %v5358_v33, 1  ;;  %v3563_v33 = vrot.slane %v5412_v19, 1 }
0x162c   :  { %v1888_v9 = vpop.permute.xlu0 %1887 }
0x162d   :  { %1897 = vperm.xlu1 %4518, %v1859_v12   ;;  %v3541_v12 = vrot.slane %v5323_v34, 1  ;;  %v1906_v54 = vmul.f32 %v1888_v9, %v5461_v45 }
0x1630   :  { %v2100_v49 = vpop.permute.xlu0 %2099 }
0x1631   :  { %4519 = vset.pattern.permute.xlu1 %v4708_v8 }
0x1632   :  { %1920 = vperm.xlu1 %4519, %v1882_v7  }
0x1634   :  { %v1916_v31 = vpop.permute.xlu0 %1915 }
0x1635   :  { %v1934_v27 = vadd.f32 %v1916_v31, %v1906_v54  ;;  %v2118_v54 = vmul.f32 %v2100_v49, %v5467_v53 }
0x1636   :  { %4520 = vset.pattern.permute.xlu1 %v5963_v1 }
0x1637   :  { %1902 = vperm.xlu1 %4520, %v5582_v16   ;;  %v2096_v16 = vsub.f32 %v5438_v39, %v2088_v46  ;;  %v5678_v7 = vmax.f32 %v1934_v27, 0.0 }
0x163b   :  { %4521 = vset.pattern.permute.xlu1 %v4708_v8 }
0x163c   :  { %1930 = vperm.xlu1 %4521, %v1884_v15  }
0x1640   :  { %4523 = vset.pattern.permute.xlu1 %v5963_v1 }
0x1641   :  { %2104 = vperm.xlu1 %4523, %v5587_v35   ;;  %v5964_v35 = vmov 0  }
0x1645   :  { %2109 = vperm.xlu1 %4523, %v2071_v26  }
0x1649   :  { %4524 = vset.pattern.permute.xlu1 %v4708_v8 }
0x164a   :  { %2132 = vperm.xlu1 %4524, %v2094_v6  }
0x164e   :  { %4525 = vset.pattern.permute.xlu1 %v5963_v1 }
0x164f   :  { %2114 = vperm.xlu1 %4525, %v5594_v32   ;;  %v3568_v32 = vrot.slane %v5376_v10, 1 }
0x1653   :  { %4526 = vset.pattern.permute.xlu1 %v4708_v8 }
0x1654   :  { %2142 = vperm.xlu1 %4526, %v2096_v16  }
0x1658   :  { %3551 = vrot.lane.b32.xlu1 %v3550_v20, %s4706_s18 }
0x1659   :  { %4528 = vset.pattern.permute.xlu1 %v5964_v35 }
0x165c   :  { %3560 = vrot.lane.b32.xlu1 %v3559_v42, %s4706_s18 }
0x1660   :  { %3542 = vrot.lane.b32.xlu1 %v3541_v12, %s4706_s18 }
0x1664   :  { %3569 = vrot.lane.b32.xlu1 %v3568_v32, %s4706_s18 }
0x1669   :  { %v2086_v39 = vpop.permute.xlu1 %2085 }
0x166a   :  { %v2095_v8 = vsub.f32 %v5454_v50, %v2086_v39  ;;  %v3572_v50 = vrot.slane %v5394_v4, 1 }
0x166c   :  { %2137 = vperm.xlu0 %4522, %v2095_v8  }
0x1670   :  { %3555 = vrot.lane.b32.xlu0 %v3554_v51, %s4706_s18 }
0x1671   :  { %4527 = vset.pattern.permute.xlu0 %v5964_v35 }
0x1674   :  { %3564 = vrot.lane.b32.xlu0 %v3563_v33, %s4706_s18 }
0x1697   :  { %v3269_v34 = vpop.permute.xlu1 %3268 }
0x1698   :  { %v3271_v59 = vmul.f32 %v5611_v29, %v3269_v34  ;;  %v1905_v29 = vmul.f32 %v1888_v9, %v5458_v44 }
0x169a   :  { %3282 = vrot.lane.b32.xlu0 %v3271_v59, %s4706_s18  ;;  %v3545_v10 = vrot.slane %v3271_v59, 1  ;;  %v1933_v56 = vadd.f32 %v1916_v31, %v1905_v29 }
0x169e   :  { %3546 = vrot.lane.b32.xlu0 %v3545_v10, %s4706_s18 }
0x16a1   :  { %v1926_v44 = vpop.permute.xlu0 %1925 }
0x16a2   :  { %3573 = vrot.lane.b32.xlu0 %v3572_v50, %s4706_s18  ;;  %s4669_s18 = scalar_lea.vmem %s3838_s8, 256 }
0x16a3   :  { %p4670_p0 = scmp.ne.s32.totalorder %s3838_s8, %s4669_s18  ;;  %p4675_p2 = scmp.lt.s32.totalorder %s4669_s18, %s4669_s18 }
0x16a5   :  { %v2128_v29 = vpop.permute.xlu0 %2127  ;;  %p4676_p3 = por %p4675_p2, %p4674_p1 }
0x16a7   :  { %p4677_p4 = pnand %p4676_p3, %p4670_p0 }
0x16a8   :  { %v1893_v41 = vpop.permute.xlu1 %1892 }
0x16a9   :  { %v1907_v13 = vmul.f32 %v1893_v41, %v5478_v3  ;;  %v1908_v2 = vmul.f32 %v1893_v41, %v5481_v0  ;;  %v5673_v3 = vmax.f32 %v1933_v56, 0.0  ;;  %v2117_v56 = vmul.f32 %v2100_v49, %v5464_v48 }
0x16ab   :  { %v1949_v58 = vmul.f32 %v5673_v3, %v5673_v3  ;;  %v2145_v27 = vadd.f32 %v2128_v29, %v2117_v56 }
0x16ac   :  { %v1898_v61 = vpop.permute.xlu1 %1897 }
0x16ad   :  { %v1909_v4 = vmul.f32 %v1898_v61, %v5490_v25  ;;  %v1910_v63 = vmul.f32 %v1898_v61, %v5493_v17 }
0x16af   :  { %v1937_v5 = vadd.f32 %v1926_v44, %v1909_v4  ;;  %v1938_v25 = vadd.f32 %v1926_v44, %v1910_v63  ;;  %v2146_v63 = vadd.f32 %v2128_v29, %v2118_v54 }
0x16b1   :  { %v1921_v21 = vpop.permute.xlu1 %1920  ;;  %v5692_v6 = vmax.f32 %v1938_v25, 0.0  ;;  %v5714_v25 = vmax.f32 %v2145_v27, 0.0  ;;  %v5716_v48 = vmax.f32 %v2146_v63, 0.0 }
0x16b2   :  { %v1935_v26 = vadd.f32 %v1921_v21, %v1907_v13  ;;  %v1936_v52 = vadd.f32 %v1921_v21, %v1908_v2 }
0x16b3   :  { %v1954_v12 = vmul.f32 %v5692_v6, %v5692_v6 }
0x16b4   :  { %v5670_v28 = vmax.f32 %v1935_v26, 0.0  ;;  %v5675_v0 = vmax.f32 %v1936_v52, 0.0 }
0x16b6   :  { %v1903_v19 = vpop.permute.xlu1 %1902  ;;  %v1951_v1 = vmul.f32 %v5670_v28, %v5670_v28  ;;  %v1952_v15 = vmul.f32 %v5675_v0, %v5675_v0 }
0x16b7   :  { %v1911_v57 = vmul.f32 %v1903_v19, %v5506_v60  ;;  %v1912_v47 = vmul.f32 %v1903_v19, %v5509_v30  ;;  %v5684_v60 = vmax.f32 %v1937_v5, 0.0  ;;  %v1950_v30 = vmul.f32 %v5678_v7, %v5678_v7 }
0x16b8   :  { %v1957_v46 = vadd.f32 %v1951_v1, %v1949_v58 }
0x16b9   :  { %v1953_v20 = vmul.f32 %v5684_v60, %v5684_v60  ;;  %v1966_v35 = vadd.f32 %v1952_v15, %v1950_v30 }
0x16bb   :  { %v1931_v11 = vpop.permute.xlu1 %1930  ;;  %v1958_v32 = vadd.f32 %v1957_v46, %v1953_v20  ;;  %v1967_v51 = vadd.f32 %v1966_v35, %v1954_v12  ;;  %v2161_v35 = vmul.f32 %v5714_v25, %v5714_v25 }
0x16bc   :  { %v1939_v45 = vadd.f32 %v1931_v11, %v1911_v57  ;;  %v1940_v17 = vadd.f32 %v1931_v11, %v1912_v47 }
0x16be   :  { %v5688_v38 = vmax.f32 %v1939_v45, 0.0  ;;  %v5694_v16 = vmax.f32 %v1940_v17, 0.0 }
0x16c0   :  { %v1955_v42 = vmul.f32 %v5688_v38, %v5688_v38  ;;  %v1956_v39 = vmul.f32 %v5694_v16, %v5694_v16  ;;  %v2105_v8 = vpop.permute.xlu1 %2104 }
0x16c1   :  { %v2119_v2 = vmul.f32 %v2105_v8, %v5520_v40  ;;  %v2120_v26 = vmul.f32 %v2105_v8, %v5523_v62 }
0x16c2   :  { %v1959_v33 = vadd.f32 %v1958_v32, %v1955_v42  ;;  %v1968_v34 = vadd.f32 %v1967_v51, %v1956_v39 }
0x16c4   :  { %v1960_v59 = vrot.slane %v1959_v33, 4  ;;  %v2110_v10 = vpop.permute.xlu1 %2109  ;;  %v1969_v50 = vrot.slane %v1968_v34, 4 }
0x16c5   :  { %v2121_v49 = vmul.f32 %v2110_v10, %v5526_v43  ;;  %v2122_v1 = vmul.f32 %v2110_v10, %v5529_v24  ;;  %v2162_v43 = vmul.f32 %v5716_v48, %v5716_v48 }
0x16c6   :  { %v1961_v41 = vadd.f32 %v1960_v59, %v1959_v33  ;;  %v1970_v61 = vadd.f32 %v1969_v50, %v1968_v34 }
0x16c8   :  { %v1962_v21 = vrot.slane %v1961_v41, 2  ;;  %v1971_v19 = vrot.slane %v1970_v61, 2 }
0x16c9   :  { %v2133_v9 = vpop.permute.xlu1 %2132 }
0x16ca   :  { %v1963_v31 = vadd.f32 %v1962_v21, %v1961_v41  ;;  %v1972_v4 = vadd.f32 %v1971_v19, %v1970_v61  ;;  %v2147_v52 = vadd.f32 %v2133_v9, %v2119_v2  ;;  %v2148_v11 = vadd.f32 %v2133_v9, %v2120_v26 }
0x16cc   :  { %v1964_v57 = vrot.slane %v1963_v31, 1  ;;  %v1973_v44 = vrot.slane %v1972_v4, 1  ;;  %v5708_v47 = vmax.f32 %v2147_v52, 0.0  ;;  %v5710_v45 = vmax.f32 %v2148_v11, 0.0 }
0x16ce   :  { %v2115_v13 = vpop.permute.xlu1 %2114  ;;  %v1965_v53 = vadd.f32 %v1964_v57, %v1963_v31  ;;  %v1974_v15 = vadd.f32 %v1973_v44, %v1972_v4  ;;  %v2163_v46 = vmul.f32 %v5708_v47, %v5708_v47 }
0x16cf   :  { %v2123_v40 = vmul.f32 %v2115_v13, %v5544_v23  ;;  %v2124_v62 = vmul.f32 %v2115_v13, %v5547_v55  ;;  %v2164_v23 = vmul.f32 %v5710_v45, %v5710_v45 }
0x16d0   :  { %4627 = vrsqrt.f32 %v1965_v53  ;;  %v2169_v39 = vadd.f32 %v2163_v46, %v2161_v35  ;;  %vm1977_vm3 = vcmp.eq.f32.partialorder %v1965_v53, inf  ;;  %vm1984_vm6 = vcmp.eq.f32.partialorder %v1974_v15, inf  ;;  %v5966_v35 = vld [vmem:[#allocation8_spill] sm:$0xff] }
0x16d1   :  { %4629 = vrsqrt.f32 %v1974_v15  ;;  %v2178_v8 = vadd.f32 %v2164_v23, %v2162_v43  ;;  %v1980_v57 = vand.u32 2147483648, %v1965_v53  ;;  %vm1979_vm9 = vcmp.eq.f32.partialorder %v1965_v53, 0.0 }
0x16d2   :  { %vm1986_vm7 = vcmp.eq.f32.partialorder %v1974_v15, 0.0  ;;  %v3294_v23 = vsel %vm106_vm8, %v5380_v14, %v5398_v37 }
0x16d3   :  { %v2143_v5 = vpop.permute.xlu1 %2142 }
0x16d4   :  { %v2151_v17 = vadd.f32 %v2143_v5, %v2123_v40  ;;  %v2152_v58 = vadd.f32 %v2143_v5, %v2124_v62  ;;  %v1987_v62 = vand.u32 2147483648, %v1974_v15 }
0x16d6   :  { %v5728_v24 = vmax.f32 %v2151_v17, 0.0  ;;  %v5730_v42 = vmax.f32 %v2152_v58, 0.0 }
0x16d8   :  { %v2167_v34 = vmul.f32 %v5728_v24, %v5728_v24  ;;  %v2168_v59 = vmul.f32 %v5730_v42, %v5730_v42 }
0x16da   :  { %v4628_v19 = vpop.eup %4627 }
0x16db   :  { %v4630_v29 = vpop.eup %4629  ;;  %v1976_v56 = vmul.f32 %v4628_v19, %v1965_v53 }
0x16dc   :  { %v1983_v54 = vmul.f32 %v4630_v29, %v1974_v15 }
0x16dd   :  { %v1978_v63 = vsel %vm1977_vm3, %v1965_v53, %v1976_v56  ;;  %v3295_v53 = vsel %vm106_vm8, %v5398_v37, %v5380_v14 }
0x16de   :  { %v1985_v44 = vsel %vm1984_vm6, %v1974_v15, %v1983_v54  ;;  %v3291_v15 = vsel %vm106_vm8, %v5362_v36, %v5416_v22  ;;  %vm3330_vm6 = vcmask 1046528  }
0x16df   :  { %v1988_v58 = vsel %vm1986_vm7, %v1987_v62, %v1985_v44  ;;  %vm3419_vm7 = vcmask 7168  }
0x16e0   :  { %v1990_v46 = vmax.f32 %v1988_v58, 1e-12 }
0x16eb   :  { %v2138_v30 = vpop.permute.xlu0 %2137 }
0x16ec   :  { %v2149_v55 = vadd.f32 %v2138_v30, %v2121_v49  ;;  %v2150_v20 = vadd.f32 %v2138_v30, %v2122_v1  ;;  %v1981_v49 = vsel %vm1979_vm9, %v1980_v57, %v1978_v63  ;;  %v5744_v1 = vpop.permute.xlu1 %3551 }
0x16ed   :  { %v1989_v30 = vmax.f32 %v1981_v49, 1e-12 }
0x16ee   :  { %v5732_v12 = vmax.f32 %v2149_v55, 0.0  ;;  %v5734_v32 = vmax.f32 %v2150_v20, 0.0  ;;  %v3296_v55 = vsel %vm106_vm8, %v5416_v22, %v5362_v36  ;;  %v5965_v20 = vld [vmem:[#allocation9_spill] sm:$0xff] }
0x16ef   :  { %v5746_v17 = vpop.permute.xlu0 %3555  ;;  %v3288_v43 = vsel %vm106_vm8, %v5966_v35, %v5965_v20  ;;  %v3297_v14 = vsel %vm106_vm8, %v5965_v20, %v5966_v35 }
0x16f0   :  { %v2165_v51 = vmul.f32 %v5732_v12, %v5732_v12  ;;  %v2166_v33 = vmul.f32 %v5734_v32, %v5734_v32  ;;  %v3561_v37 = vpop.permute.xlu1 %3560  ;;  %v3315_v36 = vrot.slane %v3297_v14, 2 }
0x16f2   :  { %v2170_v10 = vadd.f32 %v2169_v39, %v2165_v51  ;;  %v2179_v50 = vadd.f32 %v2178_v8, %v2166_v33  ;;  %v3306_v8 = vrot.slane %v3294_v23, 5  ;;  %v3309_v51 = vrot.slane %v3295_v53, 4 }
0x16f3   :  { %v3565_v39 = vpop.permute.xlu0 %3564  ;;  %v3303_v33 = vrot.slane %v3291_v15, 6 }
0x16f4   :  { %v2171_v41 = vadd.f32 %v2170_v10, %v2167_v34  ;;  %v2180_v61 = vadd.f32 %v2179_v50, %v2168_v59  ;;  %v3312_v34 = vrot.slane %v3296_v55, 3  ;;  %v3300_v59 = vrot.slane %v3288_v43, 7  ;;  %v3543_v19 = vpop.permute.xlu1 %3542 }
0x16f5   :  { %v3558_v10 = vsel %vm106_vm8, %v5744_v1, %v5746_v17  ;;  %v3567_v49 = vsel %vm106_vm8, %v3561_v37, %v3565_v39  ;;  %v3578_v15 = vsel %vm106_vm8, %v3565_v39, %v3561_v37  ;;  %v3579_v37 = vsel %vm106_vm8, %v5746_v17, %v5744_v1 }
0x16f6   :  { %v2172_v9 = vrot.slane %v2171_v41, 4  ;;  %v2181_v21 = vrot.slane %v2180_v61, 4  ;;  %v3582_v62 = vrot.slane %v3558_v10, 7  ;;  %v3585_v43 = vrot.slane %v3567_v49, 6 }
0x16f7   :  { %v3597_v1 = vrot.slane %v3579_v37, 2 }
0x16f8   :  { %v2173_v31 = vadd.f32 %v2172_v9, %v2171_v41  ;;  %v2182_v13 = vadd.f32 %v2181_v21, %v2180_v61  ;;  %v5967_v9 = vld [vmem:[#allocation7_spill] sm:$0xff]  ;;  %v3570_v53 = vpop.permute.xlu1 %3569 }
0x16fa   :  { %v2174_v2 = vrot.slane %v2173_v31, 2  ;;  %v2183_v26 = vrot.slane %v2182_v13, 2 }
0x16fc   :  { %v2175_v4 = vadd.f32 %v2174_v2, %v2173_v31  ;;  %v2184_v52 = vadd.f32 %v2183_v26, %v2182_v13 }
0x16fe   :  { %v2176_v11 = vrot.slane %v2175_v4, 1  ;;  %v2185_v27 = vrot.slane %v2184_v52, 1 }
0x1700   :  { %v2177_v5 = vadd.f32 %v2176_v11, %v2175_v4  ;;  %v2186_v40 = vadd.f32 %v2185_v27, %v2184_v52 }
0x1702   :  { %4631 = vrsqrt.f32 %v2177_v5  ;;  %vm2189_vm1 = vcmp.eq.f32.partialorder %v2177_v5, inf  ;;  %vm2191_vm0 = vcmp.eq.f32.partialorder %v2177_v5, 0.0  ;;  %v2192_v31 = vand.u32 2147483648, %v2177_v5 }
0x1703   :  { %4633 = vrsqrt.f32 %v2186_v40  ;;  %vm2196_vm13 = vcmp.eq.f32.partialorder %v2186_v40, inf  ;;  %vm2198_vm3 = vcmp.eq.f32.partialorder %v2186_v40, 0.0  ;;  %v2199_v26 = vand.u32 2147483648, %v2186_v40 }
0x1704   :  { %4635 = vrcp.f32 %v1989_v30 }
0x1705   :  { %4637 = vrcp.f32 %v1990_v46 }
0x170c   :  { %v4632_v22 = vpop.eup %4631  ;;  %v3283_v50 = vpop.permute.xlu0 %3282 }
0x170d   :  { %v4634_v41 = vpop.eup %4633  ;;  %v2188_v61 = vmul.f32 %v4632_v22, %v2177_v5  ;;  %v3285_v21 = vsel %vm106_vm8, %v5967_v9, %v3283_v50  ;;  %v3298_v52 = vsel %vm106_vm8, %v3283_v50, %v5967_v9  ;;  %v3594_v50 = vrot.slane %v3578_v15, 3 }
0x170e   :  { %v2195_v13 = vmul.f32 %v4634_v41, %v2186_v40  ;;  %v3320_v29 = vsel %vm2414_vm15, %v3285_v21, %v3300_v59  ;;  %v4636_v58 = vpop.eup %4635  ;;  %v3318_v30 = vrot.slane %v3298_v52, 1  ;;  %v5968_v15 = vmov 0.0|0.0  }
0x170f   :  { %v2190_v2 = vsel %vm2189_vm1, %v2177_v5, %v2188_v61  ;;  %v3322_v56 = vsel %vm3321_vm5, %v3320_v29, %v3303_v33  ;;  %v4638_v23 = vpop.eup %4637  ;;  %v1995_v22 = vmul.f32 %v4636_v58, %v5670_v28 }
0x1710   :  { %v2193_v54 = vsel %vm2191_vm0, %v2192_v31, %v2190_v2  ;;  %v2197_v4 = vsel %vm2196_vm13, %v2186_v40, %v2195_v13  ;;  %v3323_v11 = vsel %vm162_vm10, %v3322_v56, %v3306_v8  ;;  %v3547_v27 = vpop.permute.xlu0 %3546  ;;  %v1996_v10 = vmul.f32 %v4638_v23, %v5675_v0 }
0x1711   :  { %v2200_v63 = vsel %vm2198_vm3, %v2199_v26, %v2197_v4  ;;  %v2201_v57 = vmax.f32 %v2193_v54, 1e-12  ;;  %v3549_v44 = vsel %vm106_vm8, %v3543_v19, %v3547_v27  ;;  %v3325_v40 = vsel %vm3324_vm11, %v3323_v11, %v3309_v51 }
0x1712   :  { %v2202_v5 = vmax.f32 %v2200_v63, 1e-12  ;;  %v3327_v46 = vsel %vm3326_vm2, %v3325_v40, %v3312_v34  ;;  %v3602_v55 = vsel %vm2414_vm15, %v3549_v44, %v3582_v62  ;;  %v3580_v59 = vsel %vm106_vm8, %v3547_v27, %v3543_v19 }
0x1713   :  { %4639 = vrcp.f32 %v2201_v57  ;;  %v3329_v35 = vsel %vm3328_vm12, %v3327_v46, %v3315_v36  ;;  %v3603_v36 = vsel %vm3321_vm5, %v3602_v55, %v3585_v43  ;;  %v3600_v9 = vrot.slane %v3580_v59, 1 }
0x1714   :  { %4641 = vrcp.f32 %v2202_v5  ;;  %v3574_v20 = vpop.permute.xlu0 %3573  ;;  %v5800_v51 = vsel %vm3330_vm6, %v3329_v35, %v3318_v30  ;;  %v1999_v19 = vmul.f32 %v4636_v58, %v5688_v38  ;;  %v2000_v31 = vmul.f32 %v4638_v23, %v5694_v16 }
0x1715   :  { %v3576_v14 = vsel %vm106_vm8, %v3570_v53, %v3574_v20  ;;  %v3577_v8 = vsel %vm106_vm8, %v3574_v20, %v3570_v53  ;;  %v3332_v34 = vmul.f32 %v5800_v51, %v5800_v51  ;;  %v2004_v13 = vadd.f32 %v1996_v10, %v1995_v22 }
0x1716   :  { %v3588_v39 = vrot.slane %v3576_v14, 5  ;;  %v3591_v33 = vrot.slane %v3577_v8, 4  ;;  %v1993_v56 = vmul.f32 %v4636_v58, %v5673_v3  ;;  %v1994_v54 = vmul.f32 %v4638_v23, %v5678_v7 }
0x1717   :  { %v3333_v61 = vsel %vm2238_vm14, %v3332_v34, 0.0  ;;  %v2010_v4 = vadd.f32 %v2000_v31, %v1999_v19  ;;  %v1997_v27 = vmul.f32 %v4636_v58, %v5684_v60  ;;  %v1998_v63 = vmul.f32 %v4638_v23, %v5692_v6 }
0x1718   :  { %v3604_v41 = vsel %vm162_vm10, %v3603_v36, %v3588_v39  ;;  %3334 = vadd.xlane.f32.xlu1 %v3333_v61  ;;  %v2001_v11 = vadd.f32 %v1994_v54, %v1993_v56 }
0x1719   :  { %v3605_v17 = vsel %vm3324_vm11, %v3604_v41, %v3591_v33  ;;  %v2007_v7 = vadd.f32 %v1998_v63, %v1997_v27 }
0x171a   :  { %v3606_v21 = vsel %vm3326_vm2, %v3605_v17, %v3594_v50  ;;  %v5969_v50 = vmov 0.0  }
0x171b   :  { %v3607_v28 = vsel %vm3328_vm12, %v3606_v21, %v3597_v1 }
0x171c   :  { %v5821_v0 = vsel %vm3330_vm6, %v3607_v28, %v3600_v9  ;;  %2005 = vadd.xlane.f32.xlu1 %v2004_v13 }
0x171d   :  { %v4640_v29 = vpop.eup %4639  ;;  %v3609_v2 = vmul.f32 %v5821_v0, %v5821_v0 }
0x171e   :  { %v4642_v26 = vpop.eup %4641  ;;  %v2207_v16 = vmul.f32 %v4640_v29, %v5708_v47  ;;  %v2211_v44 = vmul.f32 %v4640_v29, %v5728_v24  ;;  %v2205_v5 = vmul.f32 %v4640_v29, %v5714_v25  ;;  %v2209_v62 = vmul.f32 %v4640_v29, %v5732_v12 }
0x171f   :  { %v3610_v38 = vsel %vm2238_vm14, %v3609_v2, 0.0  ;;  %v2208_v52 = vmul.f32 %v4642_v26, %v5710_v45  ;;  %v2212_v3 = vmul.f32 %v4642_v26, %v5730_v42  ;;  %v2206_v47 = vmul.f32 %v4642_v26, %v5716_v48 }
0x1720   :  { %3611 = vadd.xlane.f32.xlu0 %v3610_v38  ;;  %2011 = vadd.xlane.f32.xlu1 %v2010_v4  ;;  %v2210_v60 = vmul.f32 %v4642_v26, %v5734_v32 }
0x1721   :  { %v2216_v57 = vadd.f32 %v2208_v52, %v2207_v16  ;;  %v2222_v45 = vadd.f32 %v2212_v3, %v2211_v44  ;;  %v2213_v6 = vadd.f32 %v2206_v47, %v2205_v5 }
0x1722   :  { %v2219_v49 = vadd.f32 %v2210_v60, %v2209_v62 }
0x1724   :  { %2002 = vadd.xlane.f32.xlu0 %v2001_v11  ;;  %2217 = vadd.xlane.f32.xlu1 %v2216_v57 }
0x1728   :  { %2008 = vadd.xlane.f32.xlu0 %v2007_v7  ;;  %2223 = vadd.xlane.f32.xlu1 %v2222_v45 }
0x172c   :  { %2214 = vadd.xlane.f32.xlu0 %v2213_v6 }
0x1730   :  { %2220 = vadd.xlane.f32.xlu0 %v2219_v49 }
0x17a5   :  { %v3335_v24 = vpop.xlane.xlu1 %3334 }
0x17a6   :  { %4643 = vrsqrt.f32 %v3335_v24  ;;  %vm3338_vm8 = vcmp.eq.f32.partialorder %v3335_v24, inf  ;;  %v3341_v46 = vand.u32 2147483648, %v3335_v24  ;;  %vm3340_vm10 = vcmp.eq.f32.partialorder %v3335_v24, 0.0 }
0x17a9   :  { %v2006_v40 = vpop.xlane.xlu1 %2005 }
0x17ad   :  { %v3612_v42 = vpop.xlane.xlu0 %3611  ;;  %v2012_v32 = vpop.xlane.xlu1 %2011 }
0x17ae   :  { %4645 = vrsqrt.f32 %v3612_v42  ;;  %vm3615_vm15 = vcmp.eq.f32.partialorder %v3612_v42, inf  ;;  %v3618_v14 = vand.u32 2147483648, %v3612_v42  ;;  %vm3617_vm9 = vcmp.eq.f32.partialorder %v3612_v42, 0.0 }
0x17b0   :  { %v4644_v58 = vpop.eup %4643 }
0x17b1   :  { %v2003_v25 = vpop.xlane.xlu0 %2002  ;;  %v3337_v30 = vmul.f32 %v4644_v58, %v3335_v24  ;;  %v2218_v34 = vpop.xlane.xlu1 %2217 }
0x17b2   :  { %v4267_v48 = vpack.c.bf16 %v2006_v40, %v2003_v25 }
0x17b3   :  { %v3339_v23 = vsel %vm3338_vm8, %v3335_v24, %v3337_v30 }
0x17b4   :  { %4268 = vmatpush3.bf16.msra.mxu0 %v4267_v48  ;;  %v3342_v12 = vsel %vm3340_vm10, %v3341_v46, %v3339_v23 }
0x17b5   :  { %v2009_v53 = vpop.xlane.xlu0 %2008  ;;  %4269 = vmatprep.subr.bf16.mxu0 %v5968_v15  ;;  %v3343_v55 = vmax.f32 %v3342_v12, 1e-12  ;;  %v2224_v41 = vpop.xlane.xlu1 %2223 }
0x17b6   :  { %v4270_v20 = vpack.c.bf16 %v2012_v32, %v2009_v53  ;;  %v3272_v53 = vld [vmem:[%s5913_s9] sm:$0xff] }
0x17b7   :  { %4647 = vrcp.f32 %v3343_v55  ;;  %v3273_v55 = vld [vmem:[%s5913_s9 + $0x8] sm:$0xff] }
0x17b8   :  { %v4646_v35 = vpop.eup %4645  ;;  %4271 = vmatpush3.bf16.msra.mxu0 %v4270_v20  ;;  %v4273_v20 = vpack.c.bf16 %v3273_v55, %v3272_v53 }
0x17b9   :  { %v3614_v43 = vmul.f32 %v4646_v35, %v3612_v42  ;;  %4278 = vmatprep.subr.bf16.mxu0 %v5968_v15  ;;  %v2215_v33 = vpop.xlane.xlu0 %2214  ;;  %v3274_v35 = vld [vmem:[%s5913_s9 + $0x10] sm:$0xff] }
0x17ba   :  { %v4279_v22 = vpack.c.bf16 %v2218_v34, %v2215_v33  ;;  %4274 = vmatpush3.bf16.msra.mxu1 %v4273_v20 }
0x17bb   :  { %v3616_v8 = vsel %vm3615_vm15, %v3612_v42, %v3614_v43  ;;  %4275 = vmatprep.subr.bf16.mxu1 %v5968_v15  ;;  %v3275_v43 = vld [vmem:[%s5913_s9 + $0x18] sm:$0xff] }
0x17bc   :  { %v3619_v37 = vsel %vm3617_vm9, %v3618_v14, %v3616_v8  ;;  %v4276_v14 = vpack.c.bf16 %v3275_v43, %v3274_v35 }
0x17bd   :  { %v3620_v39 = vmax.f32 %v3619_v37, 1e-12  ;;  %v2221_v10 = vpop.xlane.xlu0 %2220  ;;  %v4667_v37 = vld [vmem:[%s5908_s4] sm:$0xff] }
0x17be   :  { %v4282_v61 = vpack.c.bf16 %v2224_v41, %v2221_v10  ;;  %4277 = vmatpush3.bf16.msra.mxu1 %v4276_v14  ;;  %v4668_v10 = vld [vmem:[%s5908_s4 + $0x8] sm:$0xff] }
0x17bf   :  { %4649 = vrcp.f32 %v3620_v39  ;;  %4284 = vmatprep.subr.bf16.mxu1 %v5968_v15 }
0x17c1   :  { %v4648_v59 = vpop.eup %4647 }
0x17c2   :  { %v3345_v36 = vmul.f32 %v4648_v59, %v5800_v51 }
0x17c4   :  { %4167 = vmatmul.mubr.msk.f32.vlgmr.msra.gmra.mrb[18].mxu0 %vm2238_vm14, %v3345_v36 }
0x17c5   :  { %4280 = vmatpush3.bf16.msra.mxu0 %v4279_v22  ;;  %4188 = vmatprep.mubr.msk.f32.mxu0 %vm4703_vm4, %v5969_v50 }
0x17c6   :  { %4281 = vmatprep.subr.bf16.mxu0 %v5968_v15 }
0x17c9   :  { %v4650_v1 = vpop.eup %4649  ;;  %4283 = vmatpush3.bf16.msra.mxu0 %v4282_v61 }
0x17ca   :  { %v3622_v17 = vmul.f32 %v4650_v1, %v5821_v0 }
0x17cc   :  { %4189 = vmatmul.mubr.msk.f32.vlgmr.msra.gmra.mrb[20].mxu0 %vm2238_vm14, %v3622_v17 }
0x1897   :  { %v3415_v51 = vpop.f32.mrb[18].mxu0 }
0x1898   :  { %v3420_v9 = vsel %vm3419_vm7, %v3415_v51, -inf  ;;  %v4168_v21 = vpop.f32.mrb[19].mxu0 }
0x1899   :  { %v3421_v19 = vrot.slane %v3420_v9, 4 }
0x189b   :  { %v3422_v31 = vmax.f32 %v3420_v9, %v3421_v19 }
0x189d   :  { %v3423_v13 = vrot.slane %v3422_v31, 2 }
0x189f   :  { %v3424_v28 = vmax.f32 %v3422_v31, %v3423_v13  ;;  %v3692_v29 = vpop.f32.mrb[20].mxu0 }
0x18a0   :  { %v3696_v2 = vsel %vm3419_vm7, %v3692_v29, -inf  ;;  %v4190_v26 = vpop.f32.mrb[21].mxu0 }
0x18a1   :  { %v3425_v56 = vrot.slane %v3424_v28, 1  ;;  %v3697_v54 = vrot.slane %v3696_v2, 4 }
0x18a3   :  { %v3426_v4 = vmax.f32 %v3424_v28, %v3425_v56  ;;  %v3698_v38 = vmax.f32 %v3696_v2, %v3697_v54 }
0x18a5   :  { %v3427_v0 = vsub.f32 %v3415_v51, %v3426_v4  ;;  %v3699_v16 = vrot.slane %v3698_v38, 2 }
0x18a7   :  { %v3428_v52 = vmul.f32 1.442695, %v3427_v0  ;;  %v3700_v11 = vmax.f32 %v3698_v38, %v3699_v16 }
0x18a9   :  { %4651 = vpow2.f32 %v3428_v52  ;;  %v3701_v27 = vrot.slane %v3700_v11, 1 }
0x18ab   :  { %v3702_v63 = vmax.f32 %v3700_v11, %v3701_v27 }
0x18ad   :  { %v3703_v57 = vsub.f32 %v3692_v29, %v3702_v63  ;;  %v3276_v29 = vld [vmem:[%s5913_s9 + $0x20] sm:$0x1]  ;;  %v5970_v63 = vld [vmem:[#allocation5_spill] sm:$0xff] }
0x18af   :  { %v3704_v44 = vmul.f32 1.442695, %v3703_v57  ;;  %v5971_v57 = vld [vmem:[#allocation6_spill] sm:$0xff] }
0x18b1   :  { %4653 = vpow2.f32 %v3704_v44 }
0x18b3   :  { %v4652_v3 = vpop.eup %4651 }
0x18b4   :  { %v3430_v7 = vsel %vm3419_vm7, %v4652_v3, 0.0 }
0x18b5   :  { %v3431_v5 = vrot.slane %v3430_v7, 4 }
0x18b7   :  { %v3432_v47 = vadd.f32 %v3431_v5, %v3430_v7 }
0x18b9   :  { %v3433_v45 = vrot.slane %v3432_v47, 2 }
0x18bb   :  { %v4654_v62 = vpop.eup %4653  ;;  %v3434_v60 = vadd.f32 %v3433_v45, %v3432_v47 }
0x18bc   :  { %v3706_v6 = vsel %vm3419_vm7, %v4654_v62, 0.0 }
0x18bd   :  { %v3435_v49 = vrot.slane %v3434_v60, 1  ;;  %v3707_v24 = vrot.slane %v3706_v6, 4 }
0x18bf   :  { %v3436_v42 = vadd.f32 %v3435_v49, %v3434_v60  ;;  %v3708_v40 = vadd.f32 %v3707_v24, %v3706_v6 }
0x18c1   :  { %4655 = vrcp.f32 %v3436_v42  ;;  %v3709_v58 = vrot.slane %v3708_v40, 2 }
0x18c3   :  { %v3710_v25 = vadd.f32 %v3709_v58, %v3708_v40  ;;  %v3821_v58 = vld [vmem:[%s5914_s10 + $0x8] sm:$0xff] }
0x18c5   :  { %v3711_v30 = vrot.slane %v3710_v25, 1 }
0x18c7   :  { %v3712_v48 = vadd.f32 %v3711_v30, %v3710_v25 }
0x18c9   :  { %4657 = vrcp.f32 %v3712_v48 }
0x18cb   :  { %v4656_v46 = vpop.eup %4655 }
0x18cc   :  { %v3438_v23 = vmul.f32 %v4656_v46, %v4652_v3 }
0x18ce   :  { %3441 = vperm.xlu0 %4527, %v3438_v23  }
0x18d3   :  { %v4658_v12 = vpop.eup %4657 }
0x18d4   :  { %v3714_v32 = vmul.f32 %v4658_v12, %v4654_v62 }
0x18d6   :  { %3717 = vperm.xlu1 %4528, %v3714_v32  }
0x194d   :  { %v3442_v8 = vpop.permute.xlu0 %3441 }
0x194e   :  { %v3444_v39 = vmul.f32 %v4667_v37, %v3442_v8 }
0x1950   :  { %v3445_v33 = vsel %vm2238_vm14, %v3444_v39, 0.0 }
0x1951   :  { %v3446_v34 = vrot.slane %v3445_v33, 4 }
0x1953   :  { %v3447_v59 = vadd.f32 %v3446_v34, %v3445_v33 }
0x1955   :  { %v3448_v36 = vrot.slane %v3447_v59, 2  ;;  %v3718_v22 = vpop.permute.xlu1 %3717 }
0x1956   :  { %v3720_v41 = vmul.f32 %v4668_v10, %v3718_v22 }
0x1957   :  { %v3449_v61 = vadd.f32 %v3448_v36, %v3447_v59 }
0x1958   :  { %v3721_v1 = vsel %vm2238_vm14, %v3720_v41, 0.0 }
0x1959   :  { %v3450_v17 = vrot.slane %v3449_v61, 1  ;;  %v3722_v51 = vrot.slane %v3721_v1, 4 }
0x195b   :  { %v3451_v9 = vadd.f32 %v3450_v17, %v3449_v61  ;;  %v3723_v21 = vadd.f32 %v3722_v51, %v3721_v1 }
0x195d   :  { %v3724_v19 = vrot.slane %v3723_v21, 2  ;;  %4178 = vmatmul.mubr.msk.f32.vlgmr.msra.gmra.mrb[18].mxu1 %vm2238_vm14, %v3451_v9 }
0x195e   :  { %4286 = vmatpush3.bf16.msra.mxu1 %v4273_v20  ;;  %4199 = vmatprep.mubr.msk.f32.mxu1 %vm4703_vm4, %v5969_v50  ;;  %vm3536_vm4 = vcmask 27648  }
0x195f   :  { %v3725_v31 = vadd.f32 %v3724_v19, %v3723_v21  ;;  %4287 = vmatprep.subr.bf16.mxu1 %v5968_v15 }
0x1961   :  { %v3726_v13 = vrot.slane %v3725_v31, 1 }
0x1962   :  { %4289 = vmatpush3.bf16.msra.mxu1 %v4276_v14 }
0x1963   :  { %v3727_v28 = vadd.f32 %v3726_v13, %v3725_v31 }
0x1965   :  { %4200 = vmatmul.mubr.msk.f32.vlgmr.msra.gmra.mrb[20].mxu1 %vm2238_vm14, %v3727_v28  ;;  %vm3279_vm14 = vcmp.eq.s32.totalorder %v5970_v63, %v4840_v18  ;;  %v3820_v18 = vld [vmem:[%s5914_s10] sm:$0xff] }
0x1a30   :  { %v3521_v2 = vpop.f32.mrb[18].mxu1 }
0x1a31   :  { %v3522_v26 = vadd.f32 %v3521_v2, %v3276_v29  ;;  %v4179_v56 = vpop.f32.mrb[19].mxu1 }
0x1a33   :  { %v3972_v54 = vmul.f32 -1.442695, %v3522_v26 }
0x1a35   :  { %4659 = vpow2.f32 %v3972_v54 }
0x1a38   :  { %v3797_v4 = vpop.f32.mrb[20].mxu1 }
0x1a39   :  { %v3798_v38 = vadd.f32 %v3797_v4, %v3276_v29  ;;  %v4201_v50 = vpop.f32.mrb[21].mxu1 }
0x1a3b   :  { %v3975_v0 = vmul.f32 -1.442695, %v3798_v38 }
0x1a3d   :  { %4661 = vpow2.f32 %v3975_v0 }
0x1a3f   :  { %v4660_v15 = vpop.eup %4659 }
0x1a40   :  { %v3528_v16 = vadd.f32 1.0, %v4660_v15 }
0x1a42   :  { %4663 = vrcp.f32 %v3528_v16 }
0x1a47   :  { %v4662_v52 = vpop.eup %4661 }
0x1a48   :  { %v3804_v11 = vadd.f32 1.0, %v4662_v52 }
0x1a4a   :  { %4665 = vrcp.f32 %v3804_v11 }
0x1a4c   :  { %v4664_v27 = vpop.eup %4663 }
0x1a4d   :  { %v3534_v44 = vrot.slane %v4664_v27, %v5971_v57 }
0x1a4f   :  { %v3535_v3 = vsel %vm3279_vm14, %v3534_v44, 0.0 }
0x1a50   :  { %v3537_v7 = vsel %vm3536_vm4, %v3535_v3, 0.0 }
0x1a51   :  { %3538 = vadd.xlane.f32.xlu0 %v3537_v7 }
0x1a54   :  { %v4666_v5 = vpop.eup %4665 }
0x1a55   :  { %v3810_v47 = vrot.slane %v4666_v5, %v5971_v57 }
0x1a57   :  { %v3811_v45 = vsel %vm3279_vm14, %v3810_v47, 0.0 }
0x1a58   :  { %v3812_v62 = vsel %vm3536_vm4, %v3811_v45, 0.0 }
0x1a59   :  { %3813 = vadd.xlane.f32.xlu1 %v3812_v62 }
0x1ade   :  { %v3539_v60 = vpop.xlane.xlu0 %3538 }
0x1adf   :  { %v3540_v24 = vadd.f32 1.0, %v3539_v60 }
0x1ae6   :  { %v3814_v6 = vpop.xlane.xlu1 %3813 }
0x1ae7   :  { %v3815_v49 = vadd.f32 1.0, %v3814_v6 }
0x1ae9   :  { %v3817_v42 = vrot.slane %v3815_v49, 4 }
0x1aeb   :  { %v3819_v40 = vsel %vm3324_vm11, %v3540_v24, %v3817_v42 }
0x1aec   :  { %3824 = vperm.xlu1 %4528, %v3819_v40  }
0x1b6b   :  { %v3825_v25 = vpop.permute.xlu1 %3824 }
0x1b6c   :  { %v3827_v30 = vmul.f32 %v3825_v25, %v3820_v18  ;;  %v3828_v48 = vmul.f32 %v3825_v25, %v3821_v58 }
0x1b6e   :  { %3829 = vst [vmem:[#allocation2] sm:$0xff] %v3827_v30  ;;  %3830 = vst [vmem:[#allocation2 + $0x8] sm:$0xff] %v3828_v48 }
0x1b6f   :  { %4680 = shalt.err (!%p4677_p4)
}
0x1b70   :  { %s4681_s21 = scalar_lea.hbm %s5915_s11, 256 }
0x1b71   :  { %p4682_p5 = scmp.ne.s32.totalorder %s5915_s11, %s4681_s21  ;;  %p4685_p6 = scmp.lt.u32.totalorder %s4681_s21, %s5915_s11 }
0x1b73   :  { %p4687_p7 = pnand %p4685_p6, %p4682_p5 }
0x1b75   :  { %4690 = shalt.err (!%p4687_p7)
}
0x1b76   :  { %3840 = dma.vmem_to_hbm [thread:$0]  %s3838_s8, 256, %s5915_s11, [#allocation3]  }
0x1b77   :  { %4691 = dma.done.wait [#allocation3], 256  }
0x1b78   :  { %4692 = vsyncadd [#allocation3], 4294967040 }
0x1b79   :  { %3844 = vsyncpa [#allocation3], 1 }

</bundles_post_ra>
